<compile_context>
chip_gen: v7x
topology: tpu7x:2x2x1
jax: 0.10.0
libtpu: 0.0.40
codegen_flags: <defaults>
</compile_context>

<pallas_src>
import functools

import jax
import jax.numpy as jnp
from jax.experimental import pallas as pl
from jax.experimental.pallas import tpu as pltpu

jax.config.update("jax_default_matmul_precision", "highest")


# ---------------------------------------------------------------------------
# Fused Pallas kernel: full GAT forward (all heads + output layer)
# ---------------------------------------------------------------------------
def _gat_fused_kernel(h_ref, adj_ref, w_all_ref, a_blk_ref, ow_ref, oa_ref, out_ref,
                      *, nheads: int, nhid: int):
    # h_ref    : [N, Fin]          node features (f32)
    # adj_ref  : [N, N]            adjacency mask (int8, nonzero = edge, self-loops expected)
    # w_all_ref: [Fin, H*nhid]     all heads' W concatenated along columns
    # a_blk_ref: [H*nhid, 2H]      block-diagonal attention vectors (cols [0,H)=a1, [H,2H)=a2)
    # ow_ref   : [H*nhid, nclass]  output-layer W (as in the PyTorch module)
    # oa_ref   : [nclass, 2]       output-layer a, columns = (a1, a2)
    # out_ref  : [N, nclass]       final class probabilities
    h = h_ref[...]

    # Additive adjacency bias, computed ONCE per call (upcast i8 -> f32 keeps the
    # compare/select in 32-bit layout; each attention layer then only pays one add).
    adjf = adj_ref[...].astype(jnp.float32)
    adj_bias = jnp.where(adjf > 0.0, jnp.float32(0.0), jnp.float32(-9e15))      # [N, N]

    def masked_attention(wh, e):
        # wh: [N, F] projected features; e: [N, N] raw attention logits.
        e = jnp.maximum(e, 0.01 * e)                        # LeakyReLU(0.01)
        att = e + adj_bias                                  # adjacency mask (additive)
        m = jnp.max(att, axis=1, keepdims=True)
        p = jnp.exp(att - m)
        att = p / jnp.sum(p, axis=1, keepdims=True)         # exact row softmax
        return jnp.dot(att, wh, preferred_element_type=jnp.float32)             # [N, F]

    # ---- all hidden heads, batched into two MXU passes ----------------------
    wh_all = jnp.dot(h, w_all_ref[...], preferred_element_type=jnp.float32)     # [N, H*nhid]
    s = jnp.dot(wh_all, a_blk_ref[...], preferred_element_type=jnp.float32)     # [N, 2H]
    s1 = s[:, :nheads]                        # [N, H]   Wh_h @ a1_h (per head, column h)
    s2t = jnp.transpose(s[:, nheads:])        # [H, N]   Wh_h @ a2_h (single transpose)

    hp = []
    for hd in range(nheads):                  # static unroll over heads
        wh_h = wh_all[:, hd * nhid:(hd + 1) * nhid]                    # [N, nhid] (static slice)
        e_h = s1[:, hd:hd + 1] + s2t[hd:hd + 1, :]                     # [N, N] broadcast add
        hp.append(jnp.maximum(masked_attention(wh_h, e_h), 0.0))       # relu (concat=True)
    x_cat = jnp.concatenate(hp, axis=1)       # [N, H*nhid]  lane concat, never leaves VMEM

    # ---- output attention layer (concat=False), ONE matmul for the projection ----
    wh_o = jnp.dot(x_cat, ow_ref[...], preferred_element_type=jnp.float32)      # [N, nclass]
    so = jnp.dot(wh_o, oa_ref[...], preferred_element_type=jnp.float32)         # [N, 2]
    e_o = so[:, 0:1] + jnp.transpose(so[:, 1:2])                                # [N, N]
    hp_o = jnp.maximum(masked_attention(wh_o, e_o), 0.0)                        # relu

    # final row softmax (exact division -> rows sum to 1 at f32 precision)
    m2 = jnp.max(hp_o, axis=1, keepdims=True)
    p2 = jnp.exp(hp_o - m2)
    out_ref[...] = p2 / jnp.sum(p2, axis=1, keepdims=True)


# ---------------------------------------------------------------------------
# One-time host-side parameter repacking (hoisted out of the forward)
# ---------------------------------------------------------------------------
def pack_gat_params(params):
    nheads = len(params["heads"])
    nhid = params["heads"][0][0].shape[1]
    nclass = params["out_W"].shape[1]

    # all heads' W side by side -> one input-projection matmul
    w_all = jnp.concatenate([W for (W, _) in params["heads"]], axis=1)          # [Fin, H*nhid]

    # block-diagonal attention vectors: cols [0,H) = a1 per head, [H,2H) = a2 per head
    a_blk = jnp.zeros((nheads * nhid, 2 * nheads), jnp.float32)
    for hd, (_, a) in enumerate(params["heads"]):
        a_blk = a_blk.at[hd * nhid:(hd + 1) * nhid, hd].set(a[:nhid, 0])
        a_blk = a_blk.at[hd * nhid:(hd + 1) * nhid, nheads + hd].set(a[nhid:, 0])

    oa2 = jnp.concatenate([params["out_a"][:nclass], params["out_a"][nclass:]], axis=1)  # [nclass, 2]

    return {"w_all": w_all, "a_blk": a_blk, "out_w": params["out_W"], "out_a2": oa2,
            "nheads": nheads, "nhid": nhid, "nclass": nclass}


def gat_forward(x, adj, packed):
    """Full GAT forward (eval mode) as a single grid-less Pallas call."""
    N = x.shape[0]
    nheads, nhid, nclass = packed["nheads"], packed["nhid"], packed["nclass"]

    # 4x smaller adjacency DMA than f32 (could itself be prepacked for production).
    adj_mask = (adj > 0).astype(jnp.int8)

    kernel = functools.partial(_gat_fused_kernel, nheads=nheads, nhid=nhid)
    vmem = lambda: pl.BlockSpec(memory_space=pltpu.MemorySpace.VMEM)

    return pl.pallas_call(
        kernel,
        out_shape=jax.ShapeDtypeStruct((N, nclass), jnp.float32),
        in_specs=[vmem() for _ in range(6)],
        out_specs=vmem(),
    )(x, adj_mask, packed["w_all"], packed["a_blk"], packed["out_w"], packed["out_a2"])


# ---------------------------------------------------------------------------
# Deterministic parameter init (xavier_uniform, gain=1.414)
# ---------------------------------------------------------------------------
def _xavier_uniform(key, shape, gain=1.414):
    fan_in, fan_out = shape[0], shape[1]
    bound = gain * jnp.sqrt(6.0 / (fan_in + fan_out))
    return jax.random.uniform(key, shape, jnp.float32, -bound, bound)


def init_gat_params(key, nfeat, nhid, nclass, nheads):
    keys = jax.random.split(key, 2 * nheads + 2)
    heads = []
    for h in range(nheads):
        W = _xavier_uniform(keys[2 * h], (nfeat, nhid))
        a = _xavier_uniform(keys[2 * h + 1], (2 * nhid, 1))
        heads.append((W, a))
    out_W = _xavier_uniform(keys[-2], (nhid * nheads, nclass))
    out_a = _xavier_uniform(keys[-1], (2 * nclass, 1))
    return {"heads": heads, "out_W": out_W, "out_a": out_a}


# ---------------------------------------------------------------------------
# Pure-JAX reference for correctness checking
# ---------------------------------------------------------------------------
def _ref_layer(h, adj, W, a, concat):
    Fout = W.shape[1]
    wh = h @ W
    e = wh @ a[:Fout] + (wh @ a[Fout:]).T
    e = jnp.where(e > 0, e, 0.01 * e)
    att = jnp.where(adj > 0, e, -9e15)
    att = jax.nn.softmax(att, axis=1)
    hp = att @ wh
    return jnp.maximum(hp, 0.0) if concat else hp


def _ref_gat(x, adj, params):
    x = jnp.concatenate(
        [_ref_layer(x, adj, W, a, True) for (W, a) in params["heads"]], axis=1)
    out = _ref_layer(x, adj, params["out_W"], params["out_a"], False)
    return jax.nn.softmax(jnp.maximum(out, 0.0), axis=1)


if __name__ == "__main__":
    N, nfeat, nhid, nclass, nheads = 64, 16, 8, 4, 2

    key = jax.random.PRNGKey(0)
    k_x, k_adj, k_p = jax.random.split(key, 3)

    x = jax.random.normal(k_x, (N, nfeat), jnp.float32)
    # random sparse-ish symmetric adjacency with self-loops
    adj_rand = jax.random.uniform(k_adj, (N, N), jnp.float32)
    adj = (adj_rand > 0.8).astype(jnp.float32)
    adj = jnp.maximum(adj, adj.T)
    adj = jnp.maximum(adj, jnp.eye(N, dtype=jnp.float32))

    params = init_gat_params(k_p, nfeat, nhid, nclass, nheads)
    packed = pack_gat_params(params)          # one-time repack, hoisted out of forward

    out = jax.block_until_ready(gat_forward(x, adj, packed))

    ref = _ref_gat(x, adj, params)
    assert out.shape == (N, nclass)
    assert jnp.allclose(out, ref, atol=1e-3, rtol=1e-3), "mismatch vs reference"
    assert jnp.allclose(jnp.sum(out, axis=1), 1.0, atol=1e-3)

    print("KERNEL_OK")
</pallas_src>

<mosaic_0001>
module attributes {stable_mosaic.version = 11 : i64} {
  func.func @_gat_fused_kernel(%arg0: memref<64x16xf32, #tpu.memory_space<vmem>>, %arg1: memref<64x64xi8, #tpu.memory_space<vmem>>, %arg2: memref<16x16xf32, #tpu.memory_space<vmem>>, %arg3: memref<16x4xf32, #tpu.memory_space<vmem>>, %arg4: memref<16x4xf32, #tpu.memory_space<vmem>>, %arg5: memref<4x2xf32, #tpu.memory_space<vmem>>, %arg6: memref<64x4xf32, #tpu.memory_space<vmem>>) attributes {dimension_semantics = [], scalar_prefetch = 0 : i64, scratch_operands = 0 : i64, tpu.core_type = #tpu.core_type<tc>} {
    %c0 = arith.constant 0 : index
    %c0_0 = arith.constant 0 : index
    %0 = vector.load %arg0[%c0, %c0_0] : memref<64x16xf32, #tpu.memory_space<vmem>>, vector<64x16xf32>
    %c0_1 = arith.constant 0 : index
    %c0_2 = arith.constant 0 : index
    %1 = vector.load %arg1[%c0_1, %c0_2] : memref<64x64xi8, #tpu.memory_space<vmem>>, vector<64x64xi8>
    %2 = arith.sitofp %1 : vector<64x64xi8> to vector<64x64xf32>
    %cst = arith.constant 0.000000e+00 : f32
    %3 = vector.broadcast %cst : f32 to vector<64x64xf32>
    %4 = arith.cmpf ogt, %2, %3 : vector<64x64xf32>
    %cst_3 = arith.constant 0.000000e+00 : f32
    %cst_4 = arith.constant -9.000000e+15 : f32
    %5 = vector.broadcast %cst_3 : f32 to vector<64x64xf32>
    %6 = vector.broadcast %cst_4 : f32 to vector<64x64xf32>
    %7 = arith.select %4, %5, %6 : vector<64x64xi1>, vector<64x64xf32>
    %c0_5 = arith.constant 0 : index
    %c0_6 = arith.constant 0 : index
    %8 = vector.load %arg2[%c0_5, %c0_6] : memref<16x16xf32, #tpu.memory_space<vmem>>, vector<16x16xf32>
    %cst_7 = arith.constant dense<0.000000e+00> : vector<64x16xf32>
    %9 = tpu.matmul %0, %8, %cst_7 {dimension_numbers = #tpu.dot_dimension_numbers<[1], [0], [0], [1], [0, 0, 1, 1], [], []>, precision = #tpu.contract_precision<fp32>} : vector<64x16xf32>, vector<16x16xf32>, vector<64x16xf32> -> vector<64x16xf32>
    %c0_8 = arith.constant 0 : index
    %c0_9 = arith.constant 0 : index
    %10 = vector.load %arg3[%c0_8, %c0_9] : memref<16x4xf32, #tpu.memory_space<vmem>>, vector<16x4xf32>
    %cst_10 = arith.constant dense<0.000000e+00> : vector<64x4xf32>
    %11 = tpu.matmul %9, %10, %cst_10 {dimension_numbers = #tpu.dot_dimension_numbers<[1], [0], [0], [1], [0, 0, 1, 1], [], []>, precision = #tpu.contract_precision<fp32>} : vector<64x16xf32>, vector<16x4xf32>, vector<64x4xf32> -> vector<64x4xf32>
    %12 = vector.extract_strided_slice %11 {offsets = [0, 0], sizes = [64, 2], strides = [1, 1]} : vector<64x4xf32> to vector<64x2xf32>
    %13 = vector.extract_strided_slice %11 {offsets = [0, 2], sizes = [64, 2], strides = [1, 1]} : vector<64x4xf32> to vector<64x2xf32>
    %14 = tpu.transpose %13, [1, 0] : vector<64x2xf32> -> vector<2x64xf32>
    %15 = vector.extract_strided_slice %9 {offsets = [0, 0], sizes = [64, 8], strides = [1, 1]} : vector<64x16xf32> to vector<64x8xf32>
    %16 = vector.extract_strided_slice %12 {offsets = [0, 0], sizes = [64, 1], strides = [1, 1]} : vector<64x2xf32> to vector<64x1xf32>
    %17 = vector.extract_strided_slice %14 {offsets = [0, 0], sizes = [1, 64], strides = [1, 1]} : vector<2x64xf32> to vector<1x64xf32>
    %18 = vector.broadcast %16 : vector<64x1xf32> to vector<64x64xf32>
    %19 = vector.broadcast %17 : vector<1x64xf32> to vector<64x64xf32>
    %20 = arith.addf %18, %19 : vector<64x64xf32>
    %cst_11 = arith.constant 0.00999999977 : f32
    %21 = vector.broadcast %cst_11 : f32 to vector<64x64xf32>
    %22 = arith.mulf %21, %20 : vector<64x64xf32>
    %23 = arith.maximumf %20, %22 : vector<64x64xf32>
    %24 = arith.addf %23, %7 : vector<64x64xf32>
    %cst_12 = arith.constant dense<0xFF800000> : vector<64xf32>
    %25 = vector.multi_reduction <maximumf>, %24, %cst_12 [1] : vector<64x64xf32> to vector<64xf32>
    %26 = vector.shape_cast %25 : vector<64xf32> to vector<64x1xf32>
    %27 = vector.broadcast %26 : vector<64x1xf32> to vector<64x64xf32>
    %28 = arith.subf %24, %27 : vector<64x64xf32>
    %29 = math.exp %28 : vector<64x64xf32>
    %cst_13 = arith.constant dense<0.000000e+00> : vector<64xf32>
    %30 = vector.multi_reduction <add>, %29, %cst_13 [1] : vector<64x64xf32> to vector<64xf32>
    %31 = vector.shape_cast %30 : vector<64xf32> to vector<64x1xf32>
    %32 = vector.broadcast %31 : vector<64x1xf32> to vector<64x64xf32>
    %33 = arith.divf %29, %32 : vector<64x64xf32>
    %cst_14 = arith.constant dense<0.000000e+00> : vector<64x8xf32>
    %34 = tpu.matmul %33, %15, %cst_14 {dimension_numbers = #tpu.dot_dimension_numbers<[1], [0], [0], [1], [0, 0, 1, 1], [], []>, precision = #tpu.contract_precision<fp32>} : vector<64x64xf32>, vector<64x8xf32>, vector<64x8xf32> -> vector<64x8xf32>
    %cst_15 = arith.constant 0.000000e+00 : f32
    %35 = vector.broadcast %cst_15 : f32 to vector<64x8xf32>
    %36 = arith.maximumf %34, %35 : vector<64x8xf32>
    %37 = vector.extract_strided_slice %9 {offsets = [0, 8], sizes = [64, 8], strides = [1, 1]} : vector<64x16xf32> to vector<64x8xf32>
    %38 = vector.extract_strided_slice %12 {offsets = [0, 1], sizes = [64, 1], strides = [1, 1]} : vector<64x2xf32> to vector<64x1xf32>
    %39 = vector.extract_strided_slice %14 {offsets = [1, 0], sizes = [1, 64], strides = [1, 1]} : vector<2x64xf32> to vector<1x64xf32>
    %40 = vector.broadcast %38 : vector<64x1xf32> to vector<64x64xf32>
    %41 = vector.broadcast %39 : vector<1x64xf32> to vector<64x64xf32>
    %42 = arith.addf %40, %41 : vector<64x64xf32>
    %cst_16 = arith.constant 0.00999999977 : f32
    %43 = vector.broadcast %cst_16 : f32 to vector<64x64xf32>
    %44 = arith.mulf %43, %42 : vector<64x64xf32>
    %45 = arith.maximumf %42, %44 : vector<64x64xf32>
    %46 = arith.addf %45, %7 : vector<64x64xf32>
    %cst_17 = arith.constant dense<0xFF800000> : vector<64xf32>
    %47 = vector.multi_reduction <maximumf>, %46, %cst_17 [1] : vector<64x64xf32> to vector<64xf32>
    %48 = vector.shape_cast %47 : vector<64xf32> to vector<64x1xf32>
    %49 = vector.broadcast %48 : vector<64x1xf32> to vector<64x64xf32>
    %50 = arith.subf %46, %49 : vector<64x64xf32>
    %51 = math.exp %50 : vector<64x64xf32>
    %cst_18 = arith.constant dense<0.000000e+00> : vector<64xf32>
    %52 = vector.multi_reduction <add>, %51, %cst_18 [1] : vector<64x64xf32> to vector<64xf32>
    %53 = vector.shape_cast %52 : vector<64xf32> to vector<64x1xf32>
    %54 = vector.broadcast %53 : vector<64x1xf32> to vector<64x64xf32>
    %55 = arith.divf %51, %54 : vector<64x64xf32>
    %cst_19 = arith.constant dense<0.000000e+00> : vector<64x8xf32>
    %56 = tpu.matmul %55, %37, %cst_19 {dimension_numbers = #tpu.dot_dimension_numbers<[1], [0], [0], [1], [0, 0, 1, 1], [], []>, precision = #tpu.contract_precision<fp32>} : vector<64x64xf32>, vector<64x8xf32>, vector<64x8xf32> -> vector<64x8xf32>
    %cst_20 = arith.constant 0.000000e+00 : f32
    %57 = vector.broadcast %cst_20 : f32 to vector<64x8xf32>
    %58 = arith.maximumf %56, %57 : vector<64x8xf32>
    %59 = tpu.concatenate %36, %58 in 1 : vector<64x8xf32>, vector<64x8xf32> -> vector<64x16xf32>
    %c0_21 = arith.constant 0 : index
    %c0_22 = arith.constant 0 : index
    %60 = vector.load %arg4[%c0_21, %c0_22] : memref<16x4xf32, #tpu.memory_space<vmem>>, vector<16x4xf32>
    %cst_23 = arith.constant dense<0.000000e+00> : vector<64x4xf32>
    %61 = tpu.matmul %59, %60, %cst_23 {dimension_numbers = #tpu.dot_dimension_numbers<[1], [0], [0], [1], [0, 0, 1, 1], [], []>, precision = #tpu.contract_precision<fp32>} : vector<64x16xf32>, vector<16x4xf32>, vector<64x4xf32> -> vector<64x4xf32>
    %c0_24 = arith.constant 0 : index
    %c0_25 = arith.constant 0 : index
    %62 = vector.load %arg5[%c0_24, %c0_25] : memref<4x2xf32, #tpu.memory_space<vmem>>, vector<4x2xf32>
    %cst_26 = arith.constant dense<0.000000e+00> : vector<64x2xf32>
    %63 = tpu.matmul %61, %62, %cst_26 {dimension_numbers = #tpu.dot_dimension_numbers<[1], [0], [0], [1], [0, 0, 1, 1], [], []>, precision = #tpu.contract_precision<fp32>} : vector<64x4xf32>, vector<4x2xf32>, vector<64x2xf32> -> vector<64x2xf32>
    %64 = vector.extract_strided_slice %63 {offsets = [0, 0], sizes = [64, 1], strides = [1, 1]} : vector<64x2xf32> to vector<64x1xf32>
    %65 = vector.extract_strided_slice %63 {offsets = [0, 1], sizes = [64, 1], strides = [1, 1]} : vector<64x2xf32> to vector<64x1xf32>
    %66 = tpu.transpose %65, [1, 0] : vector<64x1xf32> -> vector<1x64xf32>
    %67 = vector.broadcast %64 : vector<64x1xf32> to vector<64x64xf32>
    %68 = vector.broadcast %66 : vector<1x64xf32> to vector<64x64xf32>
    %69 = arith.addf %67, %68 : vector<64x64xf32>
    %cst_27 = arith.constant 0.00999999977 : f32
    %70 = vector.broadcast %cst_27 : f32 to vector<64x64xf32>
    %71 = arith.mulf %70, %69 : vector<64x64xf32>
    %72 = arith.maximumf %69, %71 : vector<64x64xf32>
    %73 = arith.addf %72, %7 : vector<64x64xf32>
    %cst_28 = arith.constant dense<0xFF800000> : vector<64xf32>
    %74 = vector.multi_reduction <maximumf>, %73, %cst_28 [1] : vector<64x64xf32> to vector<64xf32>
    %75 = vector.shape_cast %74 : vector<64xf32> to vector<64x1xf32>
    %76 = vector.broadcast %75 : vector<64x1xf32> to vector<64x64xf32>
    %77 = arith.subf %73, %76 : vector<64x64xf32>
    %78 = math.exp %77 : vector<64x64xf32>
    %cst_29 = arith.constant dense<0.000000e+00> : vector<64xf32>
    %79 = vector.multi_reduction <add>, %78, %cst_29 [1] : vector<64x64xf32> to vector<64xf32>
    %80 = vector.shape_cast %79 : vector<64xf32> to vector<64x1xf32>
    %81 = vector.broadcast %80 : vector<64x1xf32> to vector<64x64xf32>
    %82 = arith.divf %78, %81 : vector<64x64xf32>
    %cst_30 = arith.constant dense<0.000000e+00> : vector<64x4xf32>
    %83 = tpu.matmul %82, %61, %cst_30 {dimension_numbers = #tpu.dot_dimension_numbers<[1], [0], [0], [1], [0, 0, 1, 1], [], []>, precision = #tpu.contract_precision<fp32>} : vector<64x64xf32>, vector<64x4xf32>, vector<64x4xf32> -> vector<64x4xf32>
    %cst_31 = arith.constant 0.000000e+00 : f32
    %84 = vector.broadcast %cst_31 : f32 to vector<64x4xf32>
    %85 = arith.maximumf %83, %84 : vector<64x4xf32>
    %cst_32 = arith.constant dense<0xFF800000> : vector<64xf32>
    %86 = vector.multi_reduction <maximumf>, %85, %cst_32 [1] : vector<64x4xf32> to vector<64xf32>
    %87 = vector.shape_cast %86 : vector<64xf32> to vector<64x1xf32>
    %88 = vector.broadcast %87 : vector<64x1xf32> to vector<64x4xf32>
    %89 = arith.subf %85, %88 : vector<64x4xf32>
    %90 = math.exp %89 : vector<64x4xf32>
    %cst_33 = arith.constant dense<0.000000e+00> : vector<64xf32>
    %91 = vector.multi_reduction <add>, %90, %cst_33 [1] : vector<64x4xf32> to vector<64xf32>
    %92 = vector.shape_cast %91 : vector<64xf32> to vector<64x1xf32>
    %93 = vector.broadcast %92 : vector<64x1xf32> to vector<64x4xf32>
    %94 = arith.divf %90, %93 : vector<64x4xf32>
    %c0_34 = arith.constant 0 : index
    %c0_35 = arith.constant 0 : index
    %95 = vector.load %arg6[%c0_34, %c0_35] : memref<64x4xf32, #tpu.memory_space<vmem>>, vector<64x4xf32>
    tpu.vector_store %arg6[%c0_34, %c0_35], %94 {strides = array<i32>} : memref<64x4xf32, #tpu.memory_space<vmem>>, vector<64x4xf32>,
    return
  }
}

</mosaic_0001>

<bundles_post_ra>
// kernel: tpu_custom_call.1
= control target key start
LH: loop header
LB: loop body
LE: loop exit
PB: predicated region body
PF: predicated region fallthrough
CT: control target
= control target key end

     0   :  { %vm67_vm0 = vcmask 130048   ;;  %s8753_s19 = smov 120   ;;  %vm1770_vm4 = vcmask 523264   ;;  %s8756_s27 = smov 8   ;;  %vm4632_vm10 = vcmask 1043456   ;;  %vm3811_vm11 = vcmask 64512   ;;  %s10451_s2 = inlined_call_operand.vmem [shape: f32[16,16], index: 2, kind: input, shape index: {}]   ;;  %s10452_s0 = inlined_call_operand.vmem [shape: f32[64,16], index: 0, kind: input, shape index: {}]   ;;  %s10453_s3 = inlined_call_operand.vmem [shape: f32[16,4], index: 3, kind: input, shape index: {}]   ;;  %s10454_s1 = inlined_call_operand.vmem [shape: s8[64,64], index: 1, kind: input, shape index: {}]   ;;  %s10455_s4 = inlined_call_operand.vmem [shape: f32[16,4], index: 4, kind: input, shape index: {}]   ;;  %s10456_s5 = inlined_call_operand.vmem [shape: f32[4,2], index: 5, kind: input, shape index: {}]   ;;  %s10457_s6 = inlined_call_operand.vmem [shape: f32[64,4], index: 6, kind: output, shape index: {}]  }
   0x1   :  { %v65_v0 = vld [vmem:[%s10451_s2] sm:$0xff]  ;;  %v66_v1 = vld [vmem:[%s10451_s2 + $0x8] sm:$0xff]  ;;  %v25_v7 = vld [vmem:[%s10452_s0 + $0x10] sm:$0xff]  ;;  %vm4607_vm12 = vcmask 31744  }
   0x2   :  { %v23_v2 = vld [vmem:[%s10452_s0] sm:$0xff]  ;;  %v93_v3 = vand.u32 4294901760, %v65_v0  ;;  %v96_v4 = vand.u32 4294901760, %v66_v1  ;;  %v24_v6 = vld [vmem:[%s10452_s0 + $0x8] sm:$0xff]  ;;  %v26_v8 = vld [vmem:[%s10452_s0 + $0x18] sm:$0xff]  ;;  %v75_v11 = vsel %vm67_vm0, %v25_v7, 0 }
   0x3   :  { %v69_v5 = vsel %vm67_vm0, %v23_v2, 0  ;;  %v72_v10 = vsel %vm67_vm0, %v24_v6, 0  ;;  %v78_v12 = vsel %vm67_vm0, %v26_v8, 0  ;;  %v27_v13 = vld [vmem:[%s10452_s0 + $0x20] sm:$0xff]  ;;  %v8824_v16 = vand.u32 4294901760, %v75_v11  ;;  %v28_v18 = vld [vmem:[%s10452_s0 + $0x28] sm:$0xff] }
   0x4   :  { %v8812_v9 = vand.u32 4294901760, %v69_v5  ;;  %v8820_v14 = vpack.c.bf16 %v96_v4, %v93_v3  ;;  %v8822_v15 = vand.u32 4294901760, %v72_v10  ;;  %v241_v17 = vsub.f32 %v65_v0, %v93_v3  ;;  %v29_v39 = vld [vmem:[%s10452_s0 + $0x30] sm:$0xff]  ;;  %v30_v48 = vld [vmem:[%s10452_s0 + $0x38] sm:$0xff]  ;;  %v852_v8 = vld [vmem:[%s10453_s3] sm:$0xff] }
   0x5   :  { %v248_v20 = vsub.f32 %v66_v1, %v96_v4  ;;  %v8832_v21 = vand.u32 4294901760, %v78_v12  ;;  %v81_v22 = vsel %vm67_vm0, %v27_v13, 0  ;;  %v8841_v24 = vsub.f32 %v75_v11, %v8824_v16 }
   0x6   :  { %v8830_v19 = vsub.f32 %v69_v5, %v8812_v9  ;;  %7984 = vmatprep.subr.bf16.mxu0 %v8820_v14  ;;  %7972 = vmatprep.subr.bf16.mxu1 %v8820_v14  ;;  %v8838_v23 = vsub.f32 %v72_v10, %v8822_v15  ;;  %v242_v25 = vand.u32 4294901760, %v241_v17  ;;  %v8843_v26 = vand.u32 4294901760, %v81_v22 }
   0x7   :  { %7986 = vmatpush3.bf16.msra.mxu0 %v8820_v14  ;;  %7974 = vmatpush3.bf16.msra.mxu1 %v8820_v14  ;;  %v249_v28 = vand.u32 4294901760, %v248_v20  ;;  %v8849_v29 = vsub.f32 %v78_v12, %v8832_v21  ;;  %v84_v30 = vsel %vm67_vm0, %v28_v18, 0  ;;  %v181_v32 = vand.u32 4294901760, %v8841_v24 }
   0x8   :  { %v161_v27 = vand.u32 4294901760, %v8830_v19  ;;  %v171_v31 = vand.u32 4294901760, %v8838_v23  ;;  %v243_v33 = vsub.f32 %v241_v17, %v242_v25  ;;  %v8855_v34 = vsub.f32 %v81_v22, %v8843_v26 }
   0x9   :  { %v250_v36 = vsub.f32 %v248_v20, %v249_v28  ;;  %v191_v37 = vand.u32 4294901760, %v8849_v29  ;;  %v7987_v38 = vpack.c.bf16 %v249_v28, %v242_v25  ;;  %v182_v42 = vsub.f32 %v8841_v24, %v181_v32 }
   0xa   :  { %7147 = vmatprep.mubr.f32.mxu0 %v161_v27  ;;  %v162_v35 = vsub.f32 %v8830_v19, %v161_v27  ;;  %v172_v40 = vsub.f32 %v8838_v23, %v171_v31  ;;  %v244_v41 = vand.u32 4294901760, %v243_v33  ;;  %v201_v43 = vand.u32 4294901760, %v8855_v34 }
   0xb   :  { %7148 = vmatmul.mubr.f32.vlgmr.msra.gmra.mrb[0].mxu0 %v171_v31  ;;  %v251_v45 = vand.u32 4294901760, %v250_v36  ;;  %7988 = vmatprep.subr.bf16.mxu0 %v7987_v38  ;;  %v192_v46 = vsub.f32 %v8849_v29, %v191_v37  ;;  %v8866_v47 = vand.u32 4294901760, %v84_v30  ;;  %v183_v50 = vand.u32 4294901760, %v182_v42 }
   0xc   :  { %v163_v44 = vand.u32 4294901760, %v162_v35  ;;  %7150 = vmatprep.mubr.f32.mxu0 %v181_v32  ;;  %v173_v49 = vand.u32 4294901760, %v172_v40  ;;  %7990 = vmatpush3.bf16.msra.mxu0 %v7987_v38  ;;  %v202_v51 = vsub.f32 %v8855_v34, %v201_v43  ;;  %v87_v52 = vsel %vm67_vm0, %v29_v39, 0 }
   0xd   :  { %v7975_v53 = vpack.c.bf16 %v251_v45, %v244_v41  ;;  %v8874_v54 = vsub.f32 %v84_v30, %v8866_v47  ;;  %v219_v55 = vand.u32 4294901760, %v87_v52  ;;  %7992 = vmatprep.subr.bf16.mxu0 %v8820_v14  ;;  %v193_v56 = vand.u32 4294901760, %v192_v46 }
   0xe   :  { %7099 = vmatprep.mubr.f32.mxu1 %v163_v44  ;;  %v90_v57 = vsel %vm67_vm0, %v30_v48, 0  ;;  %v7979_v58 = vpack.c.bf16 %v248_v20, %v241_v17  ;;  %v203_v60 = vand.u32 4294901760, %v202_v51  ;;  %v879_v10 = vand.u32 4294901760, %v852_v8 }
   0xf   :  { %7100 = vmatmul.mubr.f32.vlgmr.msra.gmra.mrb[0].mxu1 %v173_v49  ;;  %7151 = vmatmul.mubr.f32.gmra.mrb[2].mxu0 %v191_v37  ;;  %v211_v59 = vand.u32 4294901760, %v8874_v54  ;;  %v220_v61 = vsub.f32 %v87_v52, %v219_v55  ;;  %v229_v62 = vand.u32 4294901760, %v90_v57 }
  0x10   :  { %7976 = vmatprep.subr.bf16.mxu1 %v7975_v53  ;;  %7102 = vmatprep.mubr.f32.mxu1 %v183_v50  ;;  %v1027_v13 = vsub.f32 %v852_v8, %v879_v10 }
  0x11   :  { %7978 = vmatpush3.bf16.msra.mxu1 %v7975_v53  ;;  %7153 = vmatprep.mubr.f32.mxu0 %v201_v43  ;;  %v221_v63 = vand.u32 4294901760, %v220_v61  ;;  %v212_v0 = vsub.f32 %v8874_v54, %v211_v59  ;;  %v230_v1 = vsub.f32 %v90_v57, %v229_v62 }
  0x12   :  { %7980 = vmatprep.subr.bf16.mxu1 %v7979_v58 }
  0x13   :  { %7103 = vmatmul.mubr.f32.gmra.mrb[2].mxu1 %v193_v56  ;;  %7154 = vmatmul.mubr.f32.gmra.mrb[4].mxu0 %v211_v59  ;;  %v213_v2 = vand.u32 4294901760, %v212_v0  ;;  %v231_v3 = vand.u32 4294901760, %v230_v1  ;;  %v222_v4 = vsub.f32 %v220_v61, %v221_v63 }
  0x14   :  { %7105 = vmatprep.mubr.f32.mxu1 %v203_v60  ;;  %7156 = vmatprep.mubr.f32.mxu0 %v221_v63 }
  0x15   :  { %v223_v5 = vand.u32 4294901760, %v222_v4  ;;  %v232_v6 = vsub.f32 %v230_v1, %v231_v3 }
  0x17   :  { %7106 = vmatmul.mubr.f32.gmra.mrb[4].mxu1 %v213_v2  ;;  %7157 = vmatmul.mubr.f32.gmra.mrb[6].mxu0 %v231_v3  ;;  %v233_v7 = vand.u32 4294901760, %v232_v6 }
  0x18   :  { %7108 = vmatprep.mubr.f32.mxu1 %v223_v5  ;;  %7163 = vmatprep.mubr.f32.mxu0 %v8812_v9 }
  0x1b   :  { %7109 = vmatmul.mubr.f32.gmra.mrb[6].mxu1 %v233_v7  ;;  %7164 = vmatmul.mubr.f32.vlgmr.msra.gmra.mrb[0].mxu0 %v8822_v15 }
  0x1c   :  { %7115 = vmatprep.mubr.f32.mxu1 %v8812_v9  ;;  %7166 = vmatprep.mubr.f32.mxu0 %v8824_v16 }
  0x1d   :  { %7994 = vmatpush3.bf16.msra.mxu0 %v8820_v14 }
  0x1f   :  { %7116 = vmatmul.mubr.f32.vlgmr.msra.gmra.mrb[0].mxu1 %v8822_v15  ;;  %7167 = vmatmul.mubr.f32.gmra.mrb[2].mxu0 %v8832_v21 }
  0x20   :  { %7982 = vmatpush3.bf16.msra.mxu1 %v7979_v58  ;;  %7118 = vmatprep.mubr.f32.mxu1 %v8824_v16 }
  0x21   :  { %7169 = vmatprep.mubr.f32.mxu0 %v8843_v26 }
  0x23   :  { %7119 = vmatmul.mubr.f32.gmra.mrb[2].mxu1 %v8832_v21  ;;  %7170 = vmatmul.mubr.f32.gmra.mrb[4].mxu0 %v8866_v47 }
  0x24   :  { %7121 = vmatprep.mubr.f32.mxu1 %v8843_v26  ;;  %7172 = vmatprep.mubr.f32.mxu0 %v219_v55 }
  0x27   :  { %7122 = vmatmul.mubr.f32.gmra.mrb[4].mxu1 %v8866_v47  ;;  %7173 = vmatmul.mubr.f32.gmra.mrb[6].mxu0 %v229_v62 }
  0x28   :  { %7124 = vmatprep.mubr.f32.mxu1 %v219_v55  ;;  %7179 = vmatprep.mubr.f32.mxu0 %v8812_v9  ;;  %v853_v9 = vld [vmem:[%s10453_s3 + $0x8] sm:$0xff]  ;;  %s8752_s3 = smov 126  }
  0x29   :  { %v882_v11 = vand.u32 4294901760, %v853_v9 }
  0x2b   :  { %7125 = vmatmul.mubr.f32.gmra.mrb[6].mxu1 %v229_v62  ;;  %7180 = vmatmul.mubr.f32.vlgmr.msra.gmra.mrb[0].mxu0 %v8822_v15  ;;  %v8911_v12 = vpack.c.bf16 %v882_v11, %v879_v10  ;;  %v1034_v14 = vsub.f32 %v853_v9, %v882_v11  ;;  %v1028_v15 = vand.u32 4294901760, %v1027_v13 }
  0x2c   :  { %7131 = vmatprep.mubr.f32.mxu1 %v8830_v19  ;;  %7182 = vmatprep.mubr.f32.mxu0 %v8824_v16 }
  0x2d   :  { %7996 = vmatprep.subr.bf16.mxu1 %v8911_v12  ;;  %v1035_v16 = vand.u32 4294901760, %v1034_v14  ;;  %v1029_v17 = vsub.f32 %v1027_v13, %v1028_v15  ;;  %v8918_v22 = vpack.c.bf16 %v1034_v14, %v1027_v13 }
  0x2f   :  { %7132 = vmatmul.mubr.f32.vlgmr.msra.gmra.mrb[0].mxu1 %v8838_v23  ;;  %7183 = vmatmul.mubr.f32.gmra.mrb[2].mxu0 %v8832_v21  ;;  %v1036_v18 = vsub.f32 %v1034_v14, %v1035_v16  ;;  %v1030_v19 = vand.u32 4294901760, %v1029_v17  ;;  %v8920_v23 = vpack.c.bf16 %v1035_v16, %v1028_v15 }
  0x30   :  { %7134 = vmatprep.mubr.f32.mxu1 %v8841_v24  ;;  %7185 = vmatprep.mubr.f32.mxu0 %v8843_v26 }
  0x31   :  { %7998 = vmatpush3.bf16.msra.mxu1 %v8911_v12  ;;  %v1037_v20 = vand.u32 4294901760, %v1036_v18 }
  0x33   :  { %7135 = vmatmul.mubr.f32.gmra.mrb[2].mxu1 %v8849_v29  ;;  %7186 = vmatmul.mubr.f32.gmra.mrb[4].mxu0 %v8866_v47  ;;  %v8915_v21 = vpack.c.bf16 %v1037_v20, %v1030_v19 }
  0x34   :  { %7137 = vmatprep.mubr.f32.mxu1 %v8855_v34  ;;  %7188 = vmatprep.mubr.f32.mxu0 %v219_v55 }
  0x35   :  { %8000 = vmatprep.subr.bf16.mxu1 %v8915_v21 }
  0x37   :  { %7138 = vmatmul.mubr.f32.gmra.mrb[4].mxu1 %v8874_v54  ;;  %7189 = vmatmul.mubr.f32.gmra.mrb[6].mxu0 %v229_v62 }
  0x38   :  { %7140 = vmatprep.mubr.f32.mxu1 %v220_v61 }
  0x3b   :  { %7141 = vmatmul.mubr.f32.gmra.mrb[6].mxu1 %v230_v1 }
  0xfe   :  { %v7181_v24 = vpop.f32.mrb[0].mxu0 }
  0xff   :  { %v806_v25 = vpop.f32.mrb[1].mxu0 }
 0x102   :  { %v7133_v26 = vpop.f32.mrb[0].mxu1  ;;  %v7184_v27 = vpop.f32.mrb[2].mxu0 }
 0x103   :  { %v8922_v28 = vadd.f32 %v7181_v24, %v7133_v26  ;;  %v434_v29 = vpop.f32.mrb[1].mxu1  ;;  %v818_v30 = vpop.f32.mrb[3].mxu0 }
 0x104   :  { %v8924_v31 = vadd.f32 %v806_v25, %v434_v29 }
 0x105   :  { %v858_v32 = vsel %vm67_vm0, %v8922_v28, 0  ;;  %v1887_v33 = vand.u32 4294901760, %v8922_v28 }
 0x106   :  { %v8929_v34 = vand.u32 4294901760, %v858_v32  ;;  %v855_v35 = vsel %vm67_vm0, %v8924_v31, 0  ;;  %v1884_v36 = vand.u32 4294901760, %v8924_v31  ;;  %v7136_v37 = vpop.f32.mrb[2].mxu1  ;;  %v7187_v38 = vpop.f32.mrb[4].mxu0 }
 0x107   :  { %v8935_v39 = vsub.f32 %v8922_v28, %v1887_v33  ;;  %v8937_v40 = vand.u32 4294901760, %v855_v35  ;;  %v8939_v41 = vadd.f32 %v7184_v27, %v7136_v37  ;;  %v448_v42 = vpop.f32.mrb[3].mxu1  ;;  %v830_v43 = vpop.f32.mrb[5].mxu0 }
 0x108   :  { %v8942_v44 = vsub.f32 %v858_v32, %v8929_v34  ;;  %v8944_v45 = vpack.c.bf16 %v1887_v33, %v1884_v36  ;;  %v8947_v46 = vsub.f32 %v8924_v31, %v1884_v36  ;;  %v8949_v47 = vadd.f32 %v818_v30, %v448_v42 }
 0x109   :  { %v864_v48 = vsel %vm67_vm0, %v8939_v41, 0  ;;  %v1893_v49 = vand.u32 4294901760, %v8939_v41  ;;  %v8955_v50 = vsub.f32 %v855_v35, %v8937_v40  ;;  %v10465_v51 = vand.u32 4294901760, %v8935_v39 }
 0x10a   :  { %v10462_v52 = vand.u32 4294901760, %v8942_v44  ;;  %v8959_v53 = vand.u32 4294901760, %v864_v48  ;;  %v861_v54 = vsel %vm67_vm0, %v8949_v47, 0  ;;  %v1890_v55 = vand.u32 4294901760, %v8949_v47  ;;  %v7139_v56 = vpop.f32.mrb[4].mxu1  ;;  %v7190_v57 = vpop.f32.mrb[6].mxu0  ;;  %8020 = vmatprep.subr.bf16.mxu0 %v8944_v45 }
 0x10b   :  { %v8966_v58 = vsub.f32 %v8939_v41, %v1893_v49  ;;  %v8968_v59 = vand.u32 4294901760, %v861_v54  ;;  %v8970_v60 = vadd.f32 %v7187_v38, %v7139_v56  ;;  %v462_v61 = vpop.f32.mrb[5].mxu1  ;;  %v842_v62 = vpop.f32.mrb[7].mxu0  ;;  %8022 = vmatpush3.bf16.msra.mxu0 %v8944_v45  ;;  %v10463_v63 = vand.u32 4294901760, %v8955_v50 }
 0x10c   :  { %v8974_v0 = vpack.c.bf16 %v1893_v49, %v1890_v55  ;;  %v8977_v1 = vsub.f32 %v8949_v47, %v1890_v55  ;;  %v8979_v2 = vadd.f32 %v830_v43, %v462_v61  ;;  %v958_v3 = vsub.f32 %v8942_v44, %v10462_v52 }
 0x10d   :  { %v870_v4 = vsel %vm67_vm0, %v8970_v60, 0  ;;  %v1899_v5 = vand.u32 4294901760, %v8970_v60  ;;  %v948_v6 = vsub.f32 %v8955_v50, %v10463_v63  ;;  %v8991_v7 = vsub.f32 %v861_v54, %v8968_v59 }
 0x10e   :  { %v8993_v8 = vand.u32 4294901760, %v870_v4  ;;  %v867_v9 = vsel %vm67_vm0, %v8979_v2, 0  ;;  %v1896_v10 = vand.u32 4294901760, %v8979_v2  ;;  %v7142_v11 = vpop.f32.mrb[6].mxu1  ;;  %8024 = vmatprep.subr.bf16.mxu0 %v8974_v0  ;;  %v959_v13 = vand.u32 4294901760, %v958_v3 }
 0x10f   :  { %v9000_v14 = vsub.f32 %v8970_v60, %v1899_v5  ;;  %v9002_v15 = vand.u32 4294901760, %v867_v9  ;;  %v9004_v16 = vadd.f32 %v7190_v57, %v7142_v11  ;;  %v476_v17 = vpop.f32.mrb[7].mxu1  ;;  %8026 = vmatpush3.bf16.msra.mxu0 %v8974_v0  ;;  %v949_v18 = vand.u32 4294901760, %v948_v6 }
 0x110   :  { %v9007_v19 = vpack.c.bf16 %v1899_v5, %v1896_v10  ;;  %v9010_v20 = vsub.f32 %v8979_v2, %v1896_v10  ;;  %v9012_v24 = vadd.f32 %v842_v62, %v476_v17  ;;  %v10461_v25 = vand.u32 4294901760, %v8991_v7 }
 0x111   :  { %v876_v26 = vsel %vm67_vm0, %v9004_v16, 0  ;;  %v1905_v27 = vand.u32 4294901760, %v9004_v16  ;;  %7195 = vmatprep.mubr.f32.mxu1 %v949_v18  ;;  %v9019_v29 = vsub.f32 %v864_v48, %v8959_v53  ;;  %v2039_v30 = vand.u32 4294901760, %v8947_v46 }
 0x112   :  { %v9022_v32 = vand.u32 4294901760, %v876_v26  ;;  %v873_v33 = vsel %vm67_vm0, %v9012_v24, 0  ;;  %v1902_v35 = vand.u32 4294901760, %v9012_v24  ;;  %7196 = vmatmul.mubr.f32.vlgmr.msra.gmra.mrb[8].mxu1 %v959_v13  ;;  %8028 = vmatprep.subr.bf16.mxu0 %v9007_v19  ;;  %v968_v36 = vsub.f32 %v8991_v7, %v10461_v25 }
 0x113   :  { %v9032_v37 = vsub.f32 %v9004_v16, %v1905_v27  ;;  %v9034_v38 = vand.u32 4294901760, %v873_v33  ;;  %8002 = vmatpush3.bf16.msra.mxu1 %v8915_v21  ;;  %8030 = vmatpush3.bf16.msra.mxu0 %v9007_v19  ;;  %v10460_v42 = vand.u32 4294901760, %v9019_v29  ;;  %v2040_v43 = vsub.f32 %v8947_v46, %v2039_v30 }
 0x114   :  { %v9042_v48 = vpack.c.bf16 %v1905_v27, %v1902_v35  ;;  %v2080_v49 = vsub.f32 %v9012_v24, %v1902_v35  ;;  %v969_v54 = vand.u32 4294901760, %v968_v36  ;;  %v2047_v55 = vsub.f32 %v8935_v39, %v10465_v51  ;;  %8004 = vmatprep.subr.bf16.mxu1 %v8918_v22 }
 0x115   :  { %v978_v21 = vsub.f32 %v9019_v29, %v10460_v42  ;;  %v2041_v56 = vand.u32 4294901760, %v2040_v43  ;;  %v9053_v57 = vsub.f32 %v867_v9, %v9002_v15  ;;  %v9056_v61 = vsub.f32 %v870_v4, %v8993_v8 }
 0x116   :  { %10491 = vst [vmem:[#allocation2_spill] sm:$0xff] %v9042_v48  ;;  %7198 = vmatprep.mubr.f32.mxu1 %v969_v54  ;;  %8032 = vmatprep.subr.bf16.mxu0 %v9042_v48  ;;  %v2048_v62 = vand.u32 4294901760, %v2047_v55  ;;  %v9060_v3 = vsub.f32 %v873_v33, %v9034_v38  ;;  %v9063_v5 = vsub.f32 %v876_v26, %v9022_v32  ;;  %v2053_v6 = vand.u32 4294901760, %v8977_v1 }
 0x117   :  { %v979_v10 = vand.u32 4294901760, %v978_v21  ;;  %8034 = vmatpush3.bf16.msra.mxu0 %v9042_v48  ;;  %v10459_v9 = vand.u32 4294901760, %v9053_v57  ;;  %v10458_v4 = vand.u32 4294901760, %v9056_v61  ;;  %v2060_v11 = vand.u32 4294901760, %v8966_v58 }
 0x118   :  { %v9070_v13 = vpack.c.bf16 %v2048_v62, %v2041_v56  ;;  %v10464_v17 = vand.u32 4294901760, %v9060_v3  ;;  %v1017_v18 = vand.u32 4294901760, %v9063_v5  ;;  %v2054_v26 = vsub.f32 %v8977_v1, %v2053_v6 }
 0x119   :  { %7199 = vmatmul.mubr.f32.gmra.mrb[10].mxu1 %v979_v10  ;;  %v988_v27 = vsub.f32 %v9053_v57, %v10459_v9  ;;  %v998_v33 = vsub.f32 %v9056_v61, %v10458_v4  ;;  %v2061_v35 = vsub.f32 %v8966_v58, %v2060_v11  ;;  %v2067_v36 = vand.u32 4294901760, %v9010_v20 }
 0x11a   :  { %8036 = vmatprep.subr.bf16.mxu0 %v9070_v13  ;;  %v1008_v43 = vsub.f32 %v9060_v3, %v10464_v17  ;;  %v1018_v54 = vsub.f32 %v9063_v5, %v1017_v18  ;;  %v2055_v55 = vand.u32 4294901760, %v2054_v26  ;;  %v2074_v21 = vand.u32 4294901760, %v9000_v14 }
 0x11b   :  { %v989_v56 = vand.u32 4294901760, %v988_v27  ;;  %v999_v62 = vand.u32 4294901760, %v998_v33  ;;  %v2062_v10 = vand.u32 4294901760, %v2061_v35  ;;  %v2068_v4 = vsub.f32 %v9010_v20, %v2067_v36 }
 0x11c   :  { %v1009_v9 = vand.u32 4294901760, %v1008_v43  ;;  %v1019_v42 = vand.u32 4294901760, %v1018_v54  ;;  %v2075_v25 = vsub.f32 %v9000_v14, %v2074_v21  ;;  %v2081_v52 = vand.u32 4294901760, %v2080_v49 }
 0x11d   :  { %7201 = vmatprep.mubr.f32.mxu1 %v989_v56  ;;  %v9093_v63 = vpack.c.bf16 %v2062_v10, %v2055_v55  ;;  %v2069_v17 = vand.u32 4294901760, %v2068_v4  ;;  %v2088_v51 = vand.u32 4294901760, %v9032_v37  ;;  %v9098_v26 = vpack.c.bf16 %v8935_v39, %v8947_v46 }
 0x11e   :  { %7202 = vmatmul.mubr.f32.gmra.mrb[12].mxu1 %v999_v62  ;;  %v2076_v27 = vand.u32 4294901760, %v2075_v25  ;;  %v2082_v33 = vsub.f32 %v2080_v49, %v2081_v52  ;;  %v9102_v35 = vpack.c.bf16 %v8966_v58, %v8977_v1  ;;  %v9106_v43 = vpack.c.bf16 %v9000_v14, %v9010_v20 }
 0x11f   :  { %7204 = vmatprep.mubr.f32.mxu1 %v1009_v9  ;;  %v2089_v4 = vsub.f32 %v9032_v37, %v2088_v51  ;;  %v9110_v54 = vpack.c.bf16 %v9032_v37, %v2080_v49  ;;  %v10492_v55 = vand.u32 4294901760, %v8935_v39  ;;  %v9118_v56 = vpack.c.bf16 %v2060_v11, %v2053_v6 }
 0x120   :  { %v9120_v58 = vpack.c.bf16 %v2076_v27, %v2069_v17  ;;  %v2083_v1 = vand.u32 4294901760, %v2082_v33  ;;  %v9122_v62 = vpack.c.bf16 %v2074_v21, %v2067_v36  ;;  %v9124_v14 = vpack.c.bf16 %v2088_v51, %v2081_v52 }
 0x121   :  { %v9116_v25 = vpack.c.bf16 %v10492_v55, %v2039_v30  ;;  %10494 = vst [vmem:[#allocation4_spill] sm:$0xff] %v9118_v56  ;;  %v2090_v20 = vand.u32 4294901760, %v2089_v4  ;;  %v10498_v39 = vand.u32 4294901760, %v8942_v44  ;;  %v10499_v46 = vand.u32 4294901760, %v8991_v7 }
 0x122   :  { %10495 = vst [vmem:[#allocation5_spill] sm:$0xff] %v9122_v62  ;;  %10496 = vst [vmem:[#allocation6_spill] sm:$0xff] %v9124_v14  ;;  %7205 = vmatmul.mubr.f32.gmra.mrb[14].mxu1 %v1019_v42  ;;  %v10500_v51 = vand.u32 4294901760, %v9019_v29  ;;  %v10501_v52 = vand.u32 4294901760, %v9053_v57  ;;  %v10502_v30 = vand.u32 4294901760, %v9056_v61 }
 0x123   :  { %10493 = vst [vmem:[#allocation3_spill] sm:$0xff] %v9116_v25  ;;  %7211 = vmatprep.mubr.f32.mxu1 %v8937_v40  ;;  %v9127_v37 = vpack.c.bf16 %v2090_v20, %v2083_v1 }
 0x126   :  { %7212 = vmatmul.mubr.f32.vlgmr.msra.gmra.mrb[8].mxu1 %v8929_v34 }
 0x127   :  { %7214 = vmatprep.mubr.f32.mxu1 %v8968_v59  ;;  %8006 = vmatpush3.bf16.msra.mxu1 %v8918_v22  ;;  %v10497_v22 = vand.u32 4294901760, %v8955_v50 }
 0x128   :  { %8008 = vmatprep.subr.bf16.mxu1 %v8911_v12 }
 0x12a   :  { %7215 = vmatmul.mubr.f32.gmra.mrb[10].mxu1 %v8959_v53 }
 0x12b   :  { %7217 = vmatprep.mubr.f32.mxu1 %v9002_v15 }
 0x12e   :  { %7218 = vmatmul.mubr.f32.gmra.mrb[12].mxu1 %v8993_v8 }
 0x12f   :  { %7220 = vmatprep.mubr.f32.mxu1 %v9034_v38 }
 0x132   :  { %7221 = vmatmul.mubr.f32.gmra.mrb[14].mxu1 %v9022_v32 }
 0x133   :  { %7227 = vmatprep.mubr.f32.mxu1 %v8955_v50  ;;  %v10503_v50 = vand.u32 4294901760, %v9060_v3 }
 0x136   :  { %7228 = vmatmul.mubr.f32.vlgmr.msra.gmra.mrb[8].mxu1 %v8942_v44 }
 0x137   :  { %7230 = vmatprep.mubr.f32.mxu1 %v8991_v7  ;;  %8010 = vmatpush3.bf16.msra.mxu1 %v8911_v12 }
 0x138   :  { %8012 = vmatprep.subr.bf16.mxu1 %v8920_v23 }
 0x13a   :  { %7231 = vmatmul.mubr.f32.gmra.mrb[10].mxu1 %v9019_v29 }
 0x13b   :  { %7233 = vmatprep.mubr.f32.mxu1 %v9053_v57 }
 0x13e   :  { %7234 = vmatmul.mubr.f32.gmra.mrb[12].mxu1 %v9056_v61 }
 0x13f   :  { %7236 = vmatprep.mubr.f32.mxu1 %v9060_v3 }
 0x142   :  { %7237 = vmatmul.mubr.f32.gmra.mrb[14].mxu1 %v9063_v5 }
 0x143   :  { %7243 = vmatprep.mubr.f32.mxu1 %v10497_v22 }
 0x146   :  { %7244 = vmatmul.mubr.f32.vlgmr.msra.gmra.mrb[8].mxu1 %v10498_v39 }
 0x147   :  { %7246 = vmatprep.mubr.f32.mxu1 %v10499_v46  ;;  %8014 = vmatpush3.bf16.msra.mxu1 %v8920_v23 }
 0x148   :  { %8016 = vmatprep.subr.bf16.mxu1 %v8911_v12 }
 0x14a   :  { %7247 = vmatmul.mubr.f32.gmra.mrb[10].mxu1 %v10500_v51 }
 0x14b   :  { %7249 = vmatprep.mubr.f32.mxu1 %v10501_v52 }
 0x14e   :  { %7250 = vmatmul.mubr.f32.gmra.mrb[12].mxu1 %v10502_v30 }
 0x14f   :  { %7252 = vmatprep.mubr.f32.mxu1 %v10503_v50 }
 0x152   :  { %7253 = vmatmul.mubr.f32.gmra.mrb[14].mxu1 %v1017_v18 }
 0x153   :  { %7259 = vmatprep.mubr.f32.mxu1 %v8937_v40 }
 0x156   :  { %7260 = vmatmul.mubr.f32.vlgmr.msra.gmra.mrb[8].mxu1 %v8929_v34 }
 0x157   :  { %7262 = vmatprep.mubr.f32.mxu1 %v8968_v59  ;;  %8018 = vmatpush3.bf16.msra.mxu1 %v8911_v12  ;;  %v8751_v12 = vmov 1  }
 0x158   :  { %8619 = vset.pattern.permute.xlu0 %v8751_v12  ;;  %8620 = vset.pattern.permute.xlu1 %v8751_v12 }
 0x15a   :  { %7263 = vmatmul.mubr.f32.gmra.mrb[10].mxu1 %v8959_v53 }
 0x15b   :  { %7265 = vmatprep.mubr.f32.mxu1 %v9002_v15 }
 0x15e   :  { %7266 = vmatmul.mubr.f32.gmra.mrb[12].mxu1 %v8993_v8 }
 0x15f   :  { %7268 = vmatprep.mubr.f32.mxu1 %v9034_v38 }
 0x162   :  { %7269 = vmatmul.mubr.f32.gmra.mrb[14].mxu1 %v9022_v32 }
 0x163   :  { %7275 = vmatprep.mubr.f32.mxu1 %v8937_v40 }
 0x166   :  { %7276 = vmatmul.mubr.f32.vlgmr.msra.gmra.mrb[8].mxu1 %v8929_v34 }
 0x167   :  { %7278 = vmatprep.mubr.f32.mxu1 %v8968_v59 }
 0x16a   :  { %7279 = vmatmul.mubr.f32.gmra.mrb[10].mxu1 %v8959_v53 }
 0x16b   :  { %7281 = vmatprep.mubr.f32.mxu1 %v9002_v15  ;;  %v8754_v15 = vmov 0  }
 0x16e   :  { %7282 = vmatmul.mubr.f32.gmra.mrb[12].mxu1 %v8993_v8 }
 0x16f   :  { %7284 = vmatprep.mubr.f32.mxu1 %v9034_v38 }
 0x172   :  { %7285 = vmatmul.mubr.f32.gmra.mrb[14].mxu1 %v9022_v32 }
 0x239   :  { %v7277_v23 = vpop.f32.mrb[8].mxu1 }
 0x23a   :  { %v1592_v44 = vpop.f32.mrb[9].mxu1 }
 0x23b   :  { %1646 = vrot.lane.b32.xlu0 %v1592_v44, %s8752_s3 }
 0x23d   :  { %v7280_v34 = vpop.f32.mrb[10].mxu1 }
 0x23e   :  { %1652 = vrot.lane.b32.xlu1 %v7280_v34, %s8752_s3  ;;  %v1604_v40 = vpop.f32.mrb[11].mxu1 }
 0x23f   :  { %1648 = vrot.lane.b32.xlu0 %v7277_v23, %s8752_s3 }
 0x241   :  { %v7283_v53 = vpop.f32.mrb[12].mxu1 }
 0x242   :  { %1650 = vrot.lane.b32.xlu1 %v1604_v40, %s8752_s3  ;;  %v1616_v59 = vpop.f32.mrb[13].mxu1 }
 0x243   :  { %1654 = vrot.lane.b32.xlu0 %v1616_v59, %s8752_s3 }
 0x245   :  { %v7286_v7 = vpop.f32.mrb[14].mxu1 }
 0x246   :  { %1656 = vrot.lane.b32.xlu1 %v7283_v53, %s8752_s3  ;;  %v1628_v8 = vpop.f32.mrb[15].mxu1 }
 0x247   :  { %1658 = vrot.lane.b32.xlu0 %v1628_v8, %s8752_s3 }
 0x24a   :  { %1660 = vrot.lane.b32.xlu1 %v7286_v7, %s8752_s3 }
 0x24b   :  { %2730 = vperm.xlu0 %8619, %v1592_v44  }
 0x24e   :  { %2734 = vperm.xlu1 %8620, %v7277_v23  }
 0x24f   :  { %2742 = vperm.xlu0 %8619, %v7280_v34  }
 0x252   :  { %2738 = vperm.xlu1 %8620, %v1604_v40  }
 0x253   :  { %2750 = vperm.xlu0 %8619, %v7283_v53  }
 0x256   :  { %2746 = vperm.xlu1 %8620, %v1616_v59  }
 0x257   :  { %2758 = vperm.xlu0 %8619, %v7286_v7  }
 0x25a   :  { %2885 = vrot.lane.b32.xlu1 %v8924_v31, %s8753_s19 }
 0x25b   :  { %8621 = vset.pattern.permute.xlu0 %v8754_v15 }
 0x25c   :  { %1703 = vperm.xlu0 %8621, %v1592_v44  }
 0x25e   :  { %2889 = vrot.lane.b32.xlu1 %v8949_v47, %s8753_s19 }
 0x260   :  { %1707 = vperm.xlu0 %8621, %v7277_v23  }
 0x262   :  { %2754 = vperm.xlu1 %8620, %v1628_v8  }
 0x264   :  { %1711 = vperm.xlu0 %8621, %v1604_v40  }
 0x268   :  { %1715 = vperm.xlu0 %8621, %v7280_v34  }
 0x26c   :  { %1719 = vperm.xlu0 %8621, %v1616_v59  }
 0x270   :  { %1723 = vperm.xlu0 %8621, %v7283_v53   ;;  %v1734_v53 = vlaneseq }
 0x274   :  { %1731 = vperm.xlu0 %8621, %v7286_v7   ;;  %v31_v7 = vld [vmem:[%s10454_s1] sm:$0xff] }
 0x278   :  { %2887 = vrot.lane.b32.xlu0 %v8922_v28, %s8753_s19 }
 0x27c   :  { %1727 = vperm.xlu0 %8621, %v1628_v8   ;;  %v9222_v8 = vshrl.u32 %v1734_v53, 7  ;;  %v8755_v53 = vmov -9e+15  }
 0x27e   :  { %10504 = vst [vmem:[#allocation7_spill] sm:$0xff] %v9222_v8 }
 0x2ad   :  { %v1647_v29 = vpop.permute.xlu0 %1646 }
 0x2ae   :  { %1670 = vxpose.xlu1.b32.start [1/8] (short) (narrow) %v1647_v29, 8  ;;  %v33_v29 = vunpack.c.0.s8 %v31_v7 }
 0x2b0   :  { %v1653_v31 = vpop.permute.xlu1 %1652 }
 0x2b1   :  { %v1649_v32 = vpop.permute.xlu0 %1648 }
 0x2b2   :  { %1671 = vxpose.xlu1.b32.cont [2/8] (short) (narrow) %v1649_v32, 8  ;;  %v35_v32 = vunpack.c.2.s8 %v31_v7 }
 0x2b4   :  { %v1651_v38 = vpop.permute.xlu1 %1650 }
 0x2b5   :  { %v1655_v47 = vpop.permute.xlu0 %1654 }
 0x2b6   :  { %1672 = vxpose.xlu1.b32.cont [3/8] (short) (narrow) %v1651_v38, 8  ;;  %v2763_v38 = vsub.s32 1, %v9222_v8 }
 0x2b8   :  { %v1657_v42 = vpop.permute.xlu1 %1656 }
 0x2b9   :  { %v1659_v49 = vpop.permute.xlu0 %1658 }
 0x2ba   :  { %1673 = vxpose.xlu1.b32.cont [4/8] (short) (narrow) %v1653_v31, 8 }
 0x2bc   :  { %v1661_v57 = vpop.permute.xlu1 %1660 }
 0x2be   :  { %1674 = vxpose.xlu1.b32.cont [5/8] (short) (narrow) %v1655_v47, 8 }
 0x2c2   :  { %1675 = vxpose.xlu1.b32.cont [6/8] (short) (narrow) %v1657_v42, 8  ;;  %v41_v42 = vcvt.s32.f32 %v33_v29 }
 0x2c4   :  { %vm49_vm2 = vcmp.gt.f32.partialorder %v41_v42, 0.0 }
 0x2c6   :  { %1676 = vxpose.xlu1.b32.cont [7/8] (short) (narrow) %v1659_v49, 8 }
 0x2ca   :  { %1677 = vxpose.xlu1.b32.end [8/8] (short) (narrow) %v1661_v57, 8  ;;  %v2731_v61 = vpop.permute.xlu0 %2730  ;;  %v43_v57 = vcvt.s32.f32 %v35_v32 }
 0x2cc   :  { %vm51_vm3 = vcmp.gt.f32.partialorder %v43_v57, 0.0 }
 0x2cd   :  { %v2735_v6 = vpop.permute.xlu1 %2734 }
 0x2ce   :  { %v2743_v3 = vpop.permute.xlu0 %2742 }
 0x2d1   :  { %v2739_v17 = vpop.permute.xlu1 %2738 }
 0x2d2   :  { %v9189_v28 = vpop.permute.xlu0 %2750 }
 0x2d5   :  { %v2747_v36 = vpop.permute.xlu1 %2746 }
 0x2d6   :  { %v9191_v5 = vpop.permute.xlu0 %2758 }
 0x2d9   :  { %v2886_v27 = vpop.permute.xlu1 %2885 }
 0x2da   :  { %v2934_v4 = vand.u32 4294901760, %v2886_v27 }
 0x2db   :  { %v9193_v9 = vpop.permute.xlu0 %1703 }
 0x2dc   :  { %v3088_v1 = vsub.f32 %v2886_v27, %v2934_v4 }
 0x2dd   :  { %v9217_v59 = vpop.permute.xlu1 %2889 }
 0x2de   :  { %v3089_v22 = vand.u32 4294901760, %v3088_v1 }
 0x2df   :  { %v9195_v11 = vpop.permute.xlu0 %1707 }
 0x2e0   :  { %v3090_v30 = vsub.f32 %v3088_v1, %v3089_v22 }
 0x2e1   :  { %v2755_v31 = vpop.permute.xlu1 %2754 }
 0x2e2   :  { %v3091_v44 = vand.u32 4294901760, %v3090_v30 }
 0x2e3   :  { %v9197_v18 = vpop.permute.xlu0 %1711 }
 0x2e7   :  { %v9199_v21 = vpop.permute.xlu0 %1715 }
 0x2e8   :  { %8622 = vset.pattern.permute.xlu1 %v8754_v15  ;;  %v34_v15 = vunpack.c.1.s8 %v31_v7 }
 0x2ea   :  { %v42_v47 = vcvt.s32.f32 %v34_v15 }
 0x2eb   :  { %v9201_v10 = vpop.permute.xlu0 %1719 }
 0x2ec   :  { %vm50_vm1 = vcmp.gt.f32.partialorder %v42_v47, 0.0 }
 0x2ed   :  { %v9228_v15 = vsel %vm50_vm1, 0.0, %v8755_v53 }
 0x2ee   :  { %10505 = vst [vmem:[#allocation8_spill] sm:$0xff] %v9228_v15 }
 0x2ef   :  { %v9203_v33 = vpop.permute.xlu0 %1723 }
 0x2f3   :  { %v9205_v55 = vpop.permute.xlu0 %1731 }
 0x2f7   :  { %v2888_v20 = vpop.permute.xlu0 %2887 }
 0x2f8   :  { %v2937_v39 = vand.u32 4294901760, %v2888_v20 }
 0x2fa   :  { %v9207_v46 = vpack.c.bf16 %v2937_v39, %v2934_v4  ;;  %v3095_v51 = vsub.f32 %v2888_v20, %v2937_v39  ;;  %v36_v4 = vunpack.c.3.s8 %v31_v7  ;;  %v9230_v7 = vsel %vm49_vm2, 0.0, %v8755_v53 }
 0x2fb   :  { %10506 = vst [vmem:[#allocation9_spill] sm:$0xff] %v9230_v7 }
 0x2fc   :  { %v3096_v52 = vand.u32 4294901760, %v3095_v51  ;;  %8116 = vmatprep.subr.bf16.mxu1 %v9207_v46  ;;  %v9210_v50 = vpack.c.bf16 %v3095_v51, %v3088_v1  ;;  %v32_v1 = vld [vmem:[%s10454_s1 + $0x8] sm:$0xff] }
 0x2fd   :  { %8118 = vmatpush3.bf16.msra.mxu1 %v9207_v46 }
 0x2fe   :  { %v3097_v12 = vsub.f32 %v3095_v51, %v3096_v52  ;;  %v9213_v23 = vpack.c.bf16 %v3096_v52, %v3089_v22  ;;  %v37_v52 = vunpack.c.0.s8 %v32_v1 }
 0x300   :  { %v3098_v34 = vand.u32 4294901760, %v3097_v12  ;;  %v45_v57 = vcvt.s32.f32 %v37_v52  ;;  %v39_v52 = vunpack.c.2.s8 %v32_v1 }
 0x302   :  { %v9215_v40 = vpack.c.bf16 %v3098_v34, %v3091_v44  ;;  %v44_v34 = vcvt.s32.f32 %v36_v4  ;;  %vm53_vm6 = vcmp.gt.f32.partialorder %v45_v57, 0.0 }
 0x304   :  { %vm52_vm5 = vcmp.gt.f32.partialorder %v44_v34, 0.0  ;;  %v40_v34 = vunpack.c.3.s8 %v32_v1 }
 0x306   :  { %v48_v57 = vcvt.s32.f32 %v40_v34 }
 0x308   :  { %vm56_vm9 = vcmp.gt.f32.partialorder %v48_v57, 0.0 }
 0x32e   :  { %v1686_v49 = vpop.trf.xlu1 }
 0x32f   :  { %v2764_v27 = vrot.slane %v1686_v49, %v2763_v38 }
 0x331   :  { %v2766_v20 = vadd.f32 %v2764_v27, %v2735_v6  ;;  %v2765_v22 = vadd.f32 %v2764_v27, %v2731_v61  ;;  %v2767_v39 = vadd.f32 %v2764_v27, %v2739_v17  ;;  %v2768_v51 = vadd.f32 %v2764_v27, %v2743_v3 }
 0x332   :  { %v2769_v29 = vadd.f32 %v2764_v27, %v2747_v36  ;;  %v9232_v61 = vsel %vm51_vm3, 0.0, %v8755_v53  ;;  %v38_v3 = vunpack.c.1.s8 %v32_v1  ;;  %v2770_v14 = vadd.f32 %v2764_v27, %v9189_v28 }
 0x333   :  { %v2774_v30 = vmul.f32 0.01, %v2766_v20  ;;  %v2773_v12 = vmul.f32 0.01, %v2765_v22  ;;  %v2775_v44 = vmul.f32 0.01, %v2767_v39  ;;  %v2771_v28 = vadd.f32 %v2764_v27, %v2755_v31 }
 0x334   :  { %v2776_v42 = vmul.f32 0.01, %v2768_v51  ;;  %10507 = vst [vmem:[#allocation10_spill] sm:$0xff] %v9232_v61  ;;  %v2777_v4 = vmul.f32 0.01, %v2769_v29  ;;  %v2772_v31 = vadd.f32 %v2764_v27, %v9191_v5 }
 0x335   :  { %v2782_v32 = vmax.f32 %v2766_v20, %v2774_v30  ;;  %v2781_v38 = vmax.f32 %v2765_v22, %v2773_v12  ;;  %v2783_v47 = vmax.f32 %v2767_v39, %v2775_v44  ;;  %v9248_v30 = vsel %vm52_vm5, 0.0, %v8755_v53 }
 0x336   :  { %v2784_v39 = vmax.f32 %v2768_v51, %v2776_v42  ;;  %10508 = vst [vmem:[#allocation11_spill] sm:$0xff] %v9248_v30  ;;  %v46_v12 = vcvt.s32.f32 %v38_v3  ;;  %v10468_v44 = vsub.s32 0, %v9222_v8  ;;  %v2778_v62 = vmul.f32 0.01, %v2770_v14 }
 0x337   :  { %v9235_v6 = vadd.f32 %v2782_v32, %v9228_v15  ;;  %v9238_v17 = vadd.f32 %v2781_v38, %v9230_v7  ;;  %v9246_v22 = vadd.f32 %v2783_v47, %v9232_v61  ;;  %v2785_v47 = vmax.f32 %v2769_v29, %v2777_v4 }
 0x338   :  { %v9254_v38 = vadd.f32 %v2784_v39, %v9248_v30  ;;  %v9256_v51 = vsel %vm53_vm6, 0.0, %v8755_v53  ;;  %vm54_vm7 = vcmp.gt.f32.partialorder %v46_v12, 0.0  ;;  %v47_v42 = vcvt.s32.f32 %v39_v52 }
 0x339   :  { %v2800_v36 = vsel %vm1770_vm4, %v9235_v6, -inf  ;;  %v2797_v20 = vsel %vm1770_vm4, %v9238_v17, -inf  ;;  %v2803_v32 = vsel %vm1770_vm4, %v9246_v22, -inf  ;;  %10509 = vst [vmem:[#allocation12_spill] sm:$0xff] %v9256_v51  ;;  %v1737_v3 = vrot.slane %v1686_v49, %v10468_v44 }
 0x33a   :  { %2801 = vmax.xlane.f32.xlu1 %v2800_v36  ;;  %2798 = vmax.xlane.f32.xlu0 %v2797_v20  ;;  %v2806_v1 = vsel %vm1770_vm4, %v9254_v38, -inf  ;;  %v9264_v36 = vadd.f32 %v2785_v47, %v9256_v51  ;;  %v2786_v20 = vmax.f32 %v2770_v14, %v2778_v62  ;;  %v2779_v29 = vmul.f32 0.01, %v2771_v28 }
 0x33b   :  { %v9266_v4 = vsel %vm54_vm7, 0.0, %v8755_v53  ;;  %vm55_vm8 = vcmp.gt.f32.partialorder %v47_v42, 0.0  ;;  %v2780_v39 = vmul.f32 0.01, %v2772_v31  ;;  %v1738_v27 = vadd.f32 %v1737_v3, %v9193_v9 }
 0x33c   :  { %10510 = vst [vmem:[#allocation13_spill] sm:$0xff] %v9266_v4  ;;  %v2809_v49 = vsel %vm1770_vm4, %v9264_v36, -inf  ;;  %v9271_v12 = vadd.f32 %v2786_v20, %v9266_v4  ;;  %v2787_v5 = vmax.f32 %v2771_v28, %v2779_v29  ;;  %v9274_v52 = vsel %vm55_vm8, 0.0, %v8755_v53 }
 0x33d   :  { %10511 = vst [vmem:[#allocation14_spill] sm:$0xff] %v9274_v52  ;;  %v9276_v62 = vsel %vm56_vm9, 0.0, %v8755_v53  ;;  %v2788_v14 = vmax.f32 %v2772_v31, %v2780_v39  ;;  %v1746_v47 = vmul.f32 0.01, %v1738_v27  ;;  %v1739_v42 = vadd.f32 %v1737_v3, %v9195_v11 }
 0x33e   :  { %2804 = vmax.xlane.f32.xlu0 %v2803_v32  ;;  %10512 = vst [vmem:[#allocation15_spill] sm:$0xff] %v9276_v62  ;;  %v2812_v34 = vsel %vm1770_vm4, %v9271_v12, -inf  ;;  %v9281_v32 = vadd.f32 %v2787_v5, %v9274_v52  ;;  %v1740_v31 = vadd.f32 %v1737_v3, %v9197_v18  ;;  %v1743_v39 = vadd.f32 %v1737_v3, %v9203_v33 }
 0x33f   :  { %v9287_v9 = vadd.f32 %v2788_v14, %v9276_v62  ;;  %v1754_v28 = vmax.f32 %v1738_v27, %v1746_v47  ;;  %v1747_v57 = vmul.f32 0.01, %v1739_v42  ;;  %v1745_v14 = vadd.f32 %v1737_v3, %v9205_v55 }
 0x340   :  { %v2815_v53 = vsel %vm1770_vm4, %v9281_v32, -inf  ;;  %v1748_v29 = vmul.f32 0.01, %v1740_v31  ;;  %v1742_v55 = vadd.f32 %v1737_v3, %v9201_v10 }
 0x341   :  { %v9295_v11 = vadd.f32 %v1754_v28, %v9230_v7  ;;  %v1755_v20 = vmax.f32 %v1739_v42, %v1747_v57  ;;  %v1751_v42 = vmul.f32 0.01, %v1743_v39  ;;  %v1753_v57 = vmul.f32 0.01, %v1745_v14 }
 0x342   :  { %2807 = vmax.xlane.f32.xlu0 %v2806_v1  ;;  %v2818_v1 = vsel %vm1770_vm4, %v9287_v9, -inf  ;;  %v1756_v18 = vmax.f32 %v1740_v31, %v1748_v29  ;;  %v1728_v31 = vpop.permute.xlu0 %1727 }
 0x343   :  { %v9302_v5 = vadd.f32 %v1755_v20, %v9228_v15  ;;  %v1759_v28 = vmax.f32 %v1743_v39, %v1751_v42  ;;  %v1761_v29 = vmax.f32 %v1745_v14, %v1753_v57 }
 0x344   :  { %v9308_v47 = vadd.f32 %v1756_v18, %v9232_v61 }
 0x345   :  { %v9319_v20 = vadd.f32 %v1759_v28, %v9266_v4  ;;  %v9324_v39 = vadd.f32 %v1761_v29, %v9276_v62 }
 0x346   :  { %2810 = vmax.xlane.f32.xlu0 %v2809_v49  ;;  %v1771_v49 = vsel %vm1770_vm4, %v9295_v11, -inf  ;;  %v1777_v33 = vsel %vm1770_vm4, %v9308_v47, -inf }
 0x347   :  { %v1786_v18 = vsel %vm1770_vm4, %v9319_v20, -inf }
 0x34a   :  { %2813 = vmax.xlane.f32.xlu0 %v2812_v34  ;;  %v1774_v34 = vsel %vm1770_vm4, %v9302_v5, -inf }
 0x34b   :  { %2891 = vrot.lane.b32.xlu1 %v8939_v41, %s8753_s19  ;;  %v1741_v41 = vadd.f32 %v1737_v3, %v9199_v21 }
 0x34d   :  { %v1749_v27 = vmul.f32 0.01, %v1741_v41 }
 0x34e   :  { %2816 = vmax.xlane.f32.xlu0 %v2815_v53 }
 0x34f   :  { %v1757_v21 = vmax.f32 %v1741_v41, %v1749_v27  ;;  %v1750_v41 = vmul.f32 0.01, %v1742_v55 }
 0x351   :  { %v9313_v53 = vadd.f32 %v1757_v21, %v9248_v30  ;;  %v1758_v27 = vmax.f32 %v1742_v55, %v1750_v41 }
 0x352   :  { %2819 = vmax.xlane.f32.xlu0 %v2818_v1 }
 0x353   :  { %v1780_v1 = vsel %vm1770_vm4, %v9313_v53, -inf  ;;  %v9329_v21 = vadd.f32 %v1758_v27, %v9256_v51 }
 0x356   :  { %1772 = vmax.xlane.f32.xlu0 %v1771_v49  ;;  %v1744_v49 = vadd.f32 %v1737_v3, %v1728_v31  ;;  %v1783_v3 = vsel %vm1770_vm4, %v9329_v21, -inf }
 0x358   :  { %v1752_v10 = vmul.f32 0.01, %v1744_v49 }
 0x35a   :  { %1775 = vmax.xlane.f32.xlu0 %v1774_v34  ;;  %v1792_v34 = vsel %vm1770_vm4, %v9324_v39, -inf  ;;  %v1760_v14 = vmax.f32 %v1744_v49, %v1752_v10 }
 0x35c   :  { %v9334_v42 = vadd.f32 %v1760_v14, %v9274_v52 }
 0x35e   :  { %1778 = vmax.xlane.f32.xlu0 %v1777_v33  ;;  %v1789_v33 = vsel %vm1770_vm4, %v9334_v42, -inf }
 0x362   :  { %1781 = vmax.xlane.f32.xlu0 %v1780_v1 }
 0x366   :  { %1787 = vmax.xlane.f32.xlu0 %v1786_v18  ;;  %v10469_v18 = vand.u32 4294901760, %v9217_v59 }
 0x36a   :  { %1793 = vmax.xlane.f32.xlu0 %v1792_v34 }
 0x36f   :  { %1784 = vmax.xlane.f32.xlu1 %v1783_v3 }
 0x373   :  { %1790 = vmax.xlane.f32.xlu1 %v1789_v33 }
 0x380   :  { %2893 = vrot.lane.b32.xlu0 %v8979_v2, %s8753_s19 }
 0x384   :  { %2895 = vrot.lane.b32.xlu1 %v8970_v60, %s8753_s19 }
 0x3c7   :  { %v2802_v28 = vpop.xlane.xlu1 %2801  ;;  %v2799_v57 = vpop.xlane.xlu0 %2798 }
 0x3c8   :  { %v2822_v55 = vsub.f32 %v9235_v6, %v2802_v28  ;;  %v2821_v31 = vsub.f32 %v9238_v17, %v2799_v57 }
 0x3ca   :  { %v2831_v1 = vmul.f32 1.442695, %v2822_v55  ;;  %v2829_v29 = vmul.f32 1.442695, %v2821_v31 }
 0x3cb   :  { %v2892_v41 = vpop.permute.xlu1 %2891  ;;  %v2805_v49 = vpop.xlane.xlu0 %2804 }
 0x3cc   :  { %8623 = vpow2.f32 %v2831_v1  ;;  %v2943_v27 = vand.u32 4294901760, %v2892_v41  ;;  %v2823_v10 = vsub.f32 %v9246_v22, %v2805_v49 }
 0x3cd   :  { %8625 = vpow2.f32 %v2829_v29 }
 0x3ce   :  { %v9348_v60 = vpack.c.bf16 %v2943_v27, %v10469_v18  ;;  %v9350_v2 = vsub.f32 %v2892_v41, %v2943_v27  ;;  %v2833_v6 = vmul.f32 1.442695, %v2823_v10 }
 0x3cf   :  { %v2808_v34 = vpop.xlane.xlu0 %2807 }
 0x3d0   :  { %8627 = vpow2.f32 %v2833_v6  ;;  %v2824_v17 = vsub.f32 %v9254_v38, %v2808_v34  ;;  %8120 = vmatprep.subr.bf16.mxu1 %v9348_v60 }
 0x3d1   :  { %8122 = vmatpush3.bf16.msra.mxu1 %v9348_v60 }
 0x3d2   :  { %v2835_v14 = vmul.f32 1.442695, %v2824_v17 }
 0x3d3   :  { %v2811_v3 = vpop.xlane.xlu0 %2810 }
 0x3d4   :  { %8629 = vpow2.f32 %v2835_v14  ;;  %v2825_v22 = vsub.f32 %v9264_v36, %v2811_v3 }
 0x3d6   :  { %v9356_v33 = vpop.eup %8623  ;;  %v2837_v28 = vmul.f32 1.442695, %v2825_v22 }
 0x3d7   :  { %v9358_v57 = vpop.eup %8625  ;;  %v2814_v55 = vpop.xlane.xlu0 %2813  ;;  %v2848_v31 = vsel %vm1770_vm4, %v9356_v33, 0.0 }
 0x3d8   :  { %8631 = vpow2.f32 %v2837_v28  ;;  %v2826_v38 = vsub.f32 %v9271_v12, %v2814_v55  ;;  %2849 = vadd.xlane.f32.xlu0 %v2848_v31  ;;  %v2845_v1 = vsel %vm1770_vm4, %v9358_v57, 0.0 }
 0x3d9   :  { %2846 = vadd.xlane.f32.xlu1 %v2845_v1 }
 0x3da   :  { %v9365_v29 = vpop.eup %8627  ;;  %v2839_v36 = vmul.f32 1.442695, %v2826_v38 }
 0x3db   :  { %v2817_v41 = vpop.xlane.xlu0 %2816  ;;  %v2851_v49 = vsel %vm1770_vm4, %v9365_v29, 0.0 }
 0x3dc   :  { %8633 = vpow2.f32 %v2839_v36  ;;  %v2827_v27 = vsub.f32 %v9281_v32, %v2817_v41 }
 0x3dd   :  { %2852 = vadd.xlane.f32.xlu1 %v2851_v49 }
 0x3de   :  { %v9370_v10 = vpop.eup %8629  ;;  %v2841_v6 = vmul.f32 1.442695, %v2827_v27 }
 0x3df   :  { %v2820_v12 = vpop.xlane.xlu0 %2819  ;;  %v2854_v34 = vsel %vm1770_vm4, %v9370_v10, 0.0 }
 0x3e0   :  { %8635 = vpow2.f32 %v2841_v6  ;;  %v2828_v17 = vsub.f32 %v9287_v9, %v2820_v12  ;;  %2855 = vadd.xlane.f32.xlu0 %v2854_v34 }
 0x3e2   :  { %v9375_v14 = vpop.eup %8631  ;;  %v2843_v3 = vmul.f32 1.442695, %v2828_v17 }
 0x3e3   :  { %v1773_v22 = vpop.xlane.xlu0 %1772  ;;  %v2857_v28 = vsel %vm1770_vm4, %v9375_v14, 0.0 }
 0x3e4   :  { %8637 = vpow2.f32 %v2843_v3  ;;  %2858 = vadd.xlane.f32.xlu1 %v2857_v28 }
 0x3e6   :  { %v9379_v32 = vpop.eup %8633 }
 0x3e7   :  { %v1776_v55 = vpop.xlane.xlu0 %1775  ;;  %v2860_v31 = vsel %vm1770_vm4, %v9379_v32, 0.0 }
 0x3e8   :  { %2861 = vadd.xlane.f32.xlu0 %v2860_v31 }
 0x3ea   :  { %v9383_v38 = vpop.eup %8635 }
 0x3eb   :  { %v1779_v9 = vpop.xlane.xlu0 %1778  ;;  %v2863_v1 = vsel %vm1770_vm4, %v9383_v38, 0.0 }
 0x3ec   :  { %2864 = vadd.xlane.f32.xlu1 %v2863_v1 }
 0x3ee   :  { %v9387_v36 = vpop.eup %8637 }
 0x3ef   :  { %v1782_v41 = vpop.xlane.xlu0 %1781  ;;  %v2866_v49 = vsel %vm1770_vm4, %v9387_v36, 0.0 }
 0x3f0   :  { %2867 = vadd.xlane.f32.xlu0 %v2866_v49 }
 0x3f3   :  { %v1788_v27 = vpop.xlane.xlu0 %1787 }
 0x3f7   :  { %v1794_v6 = vpop.xlane.xlu0 %1793 }
 0x3fb   :  { %v2894_v12 = vpop.permute.xlu0 %2893 }
 0x3fc   :  { %v1785_v34 = vpop.xlane.xlu1 %1784  ;;  %v2946_v17 = vand.u32 4294901760, %v2894_v12 }
 0x3fd   :  { %2899 = vrot.lane.b32.xlu1 %v9004_v16, %s8753_s19  ;;  %v1796_v16 = vsub.f32 %v9302_v5, %v1776_v55  ;;  %v1800_v5 = vsub.f32 %v9319_v20, %v1788_v27 }
 0x3fe   :  { %v3116_v28 = vsub.f32 %v2894_v12, %v2946_v17 }
 0x400   :  { %v1791_v3 = vpop.xlane.xlu1 %1790  ;;  %v3117_v44 = vand.u32 4294901760, %v3116_v28 }
 0x401   :  { %v1801_v8 = vsub.f32 %v9334_v42, %v1791_v3 }
 0x402   :  { %v3118_v49 = vsub.f32 %v3116_v28, %v3117_v44 }
 0x404   :  { %v2896_v31 = vpop.permute.xlu1 %2895  ;;  %v3119_v61 = vand.u32 4294901760, %v3118_v49 }
 0x405   :  { %v2949_v1 = vand.u32 4294901760, %v2896_v31 }
 0x406   :  { %2897 = vrot.lane.b32.xlu0 %v9012_v24, %s8753_s19  ;;  %v1795_v24 = vsub.f32 %v9295_v11, %v1773_v22 }
 0x407   :  { %v9395_v18 = vpack.c.bf16 %v2949_v1, %v2946_v17  ;;  %v3123_v52 = vsub.f32 %v2896_v31, %v2949_v1  ;;  %v1805_v17 = vmul.f32 1.442695, %v1796_v16  ;;  %v1799_v31 = vsub.f32 %v9329_v21, %v1785_v34 }
 0x408   :  { %v1803_v7 = vmul.f32 1.442695, %v1795_v24 }
 0x409   :  { %v3124_v4 = vand.u32 4294901760, %v3123_v52  ;;  %8124 = vmatprep.subr.bf16.mxu1 %v9395_v18  ;;  %v9398_v51 = vpack.c.bf16 %v3123_v52, %v3116_v28  ;;  %v1797_v28 = vsub.f32 %v9308_v47, %v1779_v9  ;;  %8639 = vpow2.f32 %v1805_v17 }
 0x40a   :  { %8126 = vmatpush3.bf16.msra.mxu1 %v9395_v18  ;;  %v1811_v62 = vmul.f32 1.442695, %v1799_v31  ;;  %8641 = vpow2.f32 %v1803_v7  ;;  %v1802_v47 = vsub.f32 %v9324_v39, %v1794_v6 }
 0x40b   :  { %v3125_v12 = vsub.f32 %v3123_v52, %v3124_v4  ;;  %v9402_v30 = vpack.c.bf16 %v3124_v4, %v3117_v44  ;;  %v1807_v52 = vmul.f32 1.442695, %v1797_v28  ;;  %v1798_v44 = vsub.f32 %v9313_v53, %v1782_v41 }
 0x40c   :  { %8643 = vpow2.f32 %v1811_v62  ;;  %v1815_v4 = vmul.f32 1.442695, %v1801_v8  ;;  %v1817_v8 = vmul.f32 1.442695, %v1802_v47 }
 0x40d   :  { %v3126_v15 = vand.u32 4294901760, %v3125_v12  ;;  %8645 = vpow2.f32 %v1807_v52  ;;  %v1809_v11 = vmul.f32 1.442695, %v1798_v44 }
 0x40e   :  { %8647 = vpow2.f32 %v1815_v4 }
 0x40f   :  { %v9406_v1 = vpack.c.bf16 %v3126_v15, %v3119_v61  ;;  %8649 = vpow2.f32 %v1809_v11  ;;  %v1813_v61 = vmul.f32 1.442695, %v1800_v5 }
 0x411   :  { %8651 = vpow2.f32 %v1813_v61 }
 0x412   :  { %8653 = vpow2.f32 %v1817_v8 }
 0x413   :  { %v9412_v15 = vpop.eup %8639 }
 0x414   :  { %v9415_v21 = vpop.eup %8641  ;;  %v1822_v7 = vsel %vm1770_vm4, %v9412_v15, 0.0 }
 0x415   :  { %v1819_v53 = vsel %vm1770_vm4, %v9415_v21, 0.0 }
 0x416   :  { %v9419_v42 = vpop.eup %8643 }
 0x417   :  { %v9421_v62 = vpop.eup %8645  ;;  %v1831_v20 = vsel %vm1770_vm4, %v9419_v42, 0.0 }
 0x418   :  { %v9427_v22 = vpop.eup %8647  ;;  %v1825_v55 = vsel %vm1770_vm4, %v9421_v62, 0.0 }
 0x419   :  { %v1837_v39 = vsel %vm1770_vm4, %v9427_v22, 0.0  ;;  %v9433_v9 = vpop.eup %8649 }
 0x41a   :  { %v1828_v41 = vsel %vm1770_vm4, %v9433_v9, 0.0 }
 0x41b   :  { %v9437_v27 = vpop.eup %8651 }
 0x41c   :  { %v1834_v6 = vsel %vm1770_vm4, %v9437_v27, 0.0  ;;  %v9441_v34 = vpop.eup %8653 }
 0x41d   :  { %v1840_v3 = vsel %vm1770_vm4, %v9441_v34, 0.0 }
 0x421   :  { %1823 = vadd.xlane.f32.xlu1 %v1822_v7 }
 0x425   :  { %1820 = vadd.xlane.f32.xlu0 %v1819_v53  ;;  %1832 = vadd.xlane.f32.xlu1 %v1831_v20 }
 0x429   :  { %1838 = vadd.xlane.f32.xlu1 %v1837_v39  ;;  %1826 = vadd.xlane.f32.xlu0 %v1825_v55 }
 0x42d   :  { %1829 = vadd.xlane.f32.xlu0 %v1828_v41 }
 0x431   :  { %1835 = vadd.xlane.f32.xlu0 %v1834_v6  ;;  %v10513_v6 = vand.u32 4294901760, %v9217_v59 }
 0x435   :  { %1841 = vadd.xlane.f32.xlu0 %v1840_v3 }
 0x465   :  { %v2850_v49 = vpop.xlane.xlu0 %2849 }
 0x466   :  { %v2847_v16 = vpop.xlane.xlu1 %2846  ;;  %8655 = vrcp.f32 %v2850_v49 }
 0x467   :  { %8657 = vrcp.f32 %v2847_v16 }
 0x46a   :  { %v2853_v12 = vpop.xlane.xlu1 %2852 }
 0x46b   :  { %8659 = vrcp.f32 %v2853_v12 }
 0x46d   :  { %v2856_v24 = vpop.xlane.xlu0 %2855 }
 0x46e   :  { %8661 = vrcp.f32 %v2856_v24 }
 0x470   :  { %v8656_v17 = vpop.eup %8655 }
 0x471   :  { %v8658_v31 = vpop.eup %8657  ;;  %v2872_v28 = vmul.f32 %v8656_v17, %v9356_v33  ;;  %v2859_v52 = vpop.xlane.xlu1 %2858 }
 0x472   :  { %v2870_v44 = vmul.f32 %v8658_v31, %v9358_v57  ;;  %8663 = vrcp.f32 %v2859_v52  ;;  %v10479_v52 = vand.u32 4294901760, %v9350_v2 }
 0x473   :  { %v2913_v5 = vsel %vm1770_vm4, %v2872_v28, 0 }
 0x474   :  { %v2910_v4 = vsel %vm1770_vm4, %v2870_v44, 0  ;;  %v9455_v33 = vand.u32 4294901760, %v2913_v5 }
 0x475   :  { %v8660_v11 = vpop.eup %8659  ;;  %v2862_v61 = vpop.xlane.xlu0 %2861  ;;  %v9449_v47 = vand.u32 4294901760, %v2910_v4 }
 0x476   :  { %v2874_v7 = vmul.f32 %v8660_v11, %v9365_v29  ;;  %8665 = vrcp.f32 %v2862_v61  ;;  %v9465_v29 = vsub.f32 %v9217_v59, %v10513_v6 }
 0x477   :  { %v9453_v8 = vsub.f32 %v2910_v4, %v9449_v47 }
 0x478   :  { %v8662_v53 = vpop.eup %8661  ;;  %v2916_v57 = vsel %vm1770_vm4, %v2874_v7, 0  ;;  %v10480_v44 = vand.u32 4294901760, %v9465_v29 }
 0x479   :  { %v2876_v20 = vmul.f32 %v8662_v53, %v9370_v10  ;;  %v2865_v39 = vpop.xlane.xlu1 %2864  ;;  %v10483_v55 = vand.u32 4294901760, %v9453_v8  ;;  %v9460_v41 = vand.u32 4294901760, %v2916_v57  ;;  %v9472_v10 = vsub.f32 %v2913_v5, %v9455_v33 }
 0x47a   :  { %8667 = vrcp.f32 %v2865_v39  ;;  %v3111_v39 = vsub.f32 %v9350_v2, %v10479_v52 }
 0x47b   :  { %v3009_v3 = vsub.f32 %v9453_v8, %v10483_v55  ;;  %v2919_v49 = vsel %vm1770_vm4, %v2876_v20, 0  ;;  %v9478_v59 = vsub.f32 %v2916_v57, %v9460_v41  ;;  %v10481_v61 = vand.u32 4294901760, %v9472_v10 }
 0x47c   :  { %v8664_v16 = vpop.eup %8663  ;;  %v9474_v12 = vand.u32 4294901760, %v2919_v49 }
 0x47d   :  { %v2878_v24 = vmul.f32 %v8664_v16, %v9375_v14  ;;  %v2900_v17 = vpop.permute.xlu1 %2899  ;;  %v2868_v31 = vpop.xlane.xlu0 %2867  ;;  %v3010_v28 = vand.u32 4294901760, %v3009_v3  ;;  %v10482_v20 = vand.u32 4294901760, %v9478_v59 }
 0x47e   :  { %8669 = vrcp.f32 %v2868_v31  ;;  %v2955_v4 = vand.u32 4294901760, %v2900_v17  ;;  %v9485_v14 = vsub.f32 %v2919_v49, %v9474_v12  ;;  %v3104_v49 = vsub.f32 %v9465_v29, %v10480_v44 }
 0x47f   :  { %7471 = vmatprep.mubr.f32.mxu1 %v3010_v28  ;;  %v2922_v11 = vsel %vm1770_vm4, %v2878_v24, 0  ;;  %v3029_v52 = vsub.f32 %v9478_v59, %v10482_v20 }
 0x480   :  { %v8666_v5 = vpop.eup %8665  ;;  %v9487_v7 = vand.u32 4294901760, %v2922_v11  ;;  %v9497_v16 = vsub.f32 %v2900_v17, %v2955_v4  ;;  %v3105_v55 = vand.u32 4294901760, %v3104_v49 }
 0x481   :  { %v2880_v53 = vmul.f32 %v8666_v5, %v9379_v32  ;;  %v2898_v57 = vpop.permute.xlu0 %2897  ;;  %v3019_v5 = vsub.f32 %v9472_v10, %v10481_v61 }
 0x482   :  { %v2952_v6 = vand.u32 4294901760, %v2898_v57  ;;  %v9495_v3 = vsub.f32 %v2922_v11, %v9487_v7  ;;  %v10488_v11 = vand.u32 4294901760, %v9485_v14 }
 0x483   :  { %v2925_v24 = vsel %vm1770_vm4, %v2880_v53, 0  ;;  %v3020_v20 = vand.u32 4294901760, %v3019_v5 }
 0x484   :  { %v8668_v32 = vpop.eup %8667  ;;  %v9503_v31 = vpack.c.bf16 %v2955_v4, %v2952_v6  ;;  %v9505_v28 = vsub.f32 %v2898_v57, %v2952_v6  ;;  %v9516_v53 = vand.u32 4294901760, %v2925_v24  ;;  %v3112_v57 = vand.u32 4294901760, %v3111_v39 }
 0x485   :  { %v2882_v17 = vmul.f32 %v8668_v32, %v9383_v38  ;;  %v3039_v4 = vsub.f32 %v9485_v14, %v10488_v11  ;;  %v3030_v6 = vand.u32 4294901760, %v3029_v52  ;;  %v10514_v56 = vand.u32 4294901760, %v9495_v3 }
 0x486   :  { %8128 = vmatprep.subr.bf16.mxu1 %v9503_v31  ;;  %v9523_v61 = vsub.f32 %v2925_v24, %v9516_v53  ;;  %v10515_v25 = vand.u32 4294901760, %v9505_v28  ;;  %v8135_v49 = vpack.c.bf16 %v3112_v57, %v3105_v55  ;;  %v10516_v11 = vand.u32 4294901760, %v9497_v16 }
 0x487   :  { %8130 = vmatpush3.bf16.msra.mxu1 %v9503_v31  ;;  %v2928_v38 = vsel %vm1770_vm4, %v2882_v17, 0  ;;  %v3049_v24 = vsub.f32 %v9495_v3, %v10514_v56  ;;  %v3040_v52 = vand.u32 4294901760, %v3039_v4 }
 0x488   :  { %v8670_v32 = vpop.eup %8669  ;;  %8132 = vmatprep.subr.bf16.mxu1 %v9215_v40  ;;  %v9530_v44 = vand.u32 4294901760, %v2928_v38  ;;  %v3058_v17 = vand.u32 4294901760, %v9523_v61  ;;  %v3132_v5 = vsub.f32 %v9505_v28, %v10515_v25 }
 0x489   :  { %v2884_v39 = vmul.f32 %v8670_v32, %v9387_v36  ;;  %v3139_v36 = vsub.f32 %v9497_v16, %v10516_v11  ;;  %v3050_v57 = vand.u32 4294901760, %v3049_v24 }
 0x48a   :  { %7472 = vmatmul.mubr.f32.vlgmr.msra.gmra.mrb[16].mxu1 %v3020_v20  ;;  %v9541_v48 = vsub.f32 %v2928_v38, %v9530_v44  ;;  %v3059_v25 = vsub.f32 %v9523_v61, %v3058_v17 }
 0x48b   :  { %7474 = vmatprep.mubr.f32.mxu1 %v3030_v6  ;;  %8134 = vmatpush3.bf16.msra.mxu1 %v9215_v40  ;;  %v2931_v56 = vsel %vm1770_vm4, %v2884_v39, 0  ;;  %v3133_v6 = vand.u32 4294901760, %v3132_v5  ;;  %v3140_v32 = vand.u32 4294901760, %v3139_v36 }
 0x48c   :  { %8136 = vmatprep.subr.bf16.mxu1 %v8135_v49  ;;  %v3068_v55 = vand.u32 4294901760, %v9541_v48  ;;  %v9552_v20 = vand.u32 4294901760, %v2931_v56  ;;  %v3060_v4 = vand.u32 4294901760, %v3059_v25 }
 0x48d   :  { %v8143_v24 = vpack.c.bf16 %v3140_v32, %v3133_v6  ;;  %v10519_v32 = vand.u32 4294901760, %v9465_v29 }
 0x48e   :  { %7475 = vmatmul.mubr.f32.gmra.mrb[18].mxu1 %v3040_v52  ;;  %v3069_v11 = vsub.f32 %v9541_v48, %v3068_v55  ;;  %v9558_v40 = vsub.f32 %v2931_v56, %v9552_v20 }
 0x48f   :  { %7477 = vmatprep.mubr.f32.mxu1 %v3050_v57  ;;  %8138 = vmatpush3.bf16.msra.mxu1 %v8135_v49  ;;  %v8151_v49 = vpack.c.bf16 %v9350_v2, %v9465_v29  ;;  %v10517_v57 = vand.u32 4294901760, %v9453_v8  ;;  %v10522_v29 = vand.u32 4294901760, %v9485_v14 }
 0x490   :  { %8140 = vmatprep.subr.bf16.mxu1 %v9406_v1  ;;  %v3070_v38 = vand.u32 4294901760, %v3069_v11  ;;  %v3078_v39 = vand.u32 4294901760, %v9558_v40 }
 0x492   :  { %7478 = vmatmul.mubr.f32.gmra.mrb[20].mxu1 %v3060_v4  ;;  %v3079_v52 = vsub.f32 %v9558_v40, %v3078_v39  ;;  %v10518_v4 = vand.u32 4294901760, %v9472_v10 }
 0x493   :  { %7480 = vmatprep.mubr.f32.mxu1 %v3070_v38  ;;  %8142 = vmatpush3.bf16.msra.mxu1 %v9406_v1  ;;  %v8159_v1 = vpack.c.bf16 %v9497_v16, %v9505_v28 }
 0x494   :  { %8144 = vmatprep.subr.bf16.mxu1 %v8143_v24  ;;  %v3080_v5 = vand.u32 4294901760, %v3079_v52 }
 0x496   :  { %7481 = vmatmul.mubr.f32.gmra.mrb[22].mxu1 %v3080_v5  ;;  %v10521_v5 = vand.u32 4294901760, %v9478_v59 }
 0x497   :  { %8146 = vmatpush3.bf16.msra.mxu1 %v8143_v24  ;;  %7499 = vmatprep.mubr.f32.mxu1 %v9449_v47  ;;  %v10520_v24 = vand.u32 4294901760, %v9350_v2 }
 0x498   :  { %8148 = vmatprep.subr.bf16.mxu1 %v9210_v50 }
 0x499   :  { %v8183_v52 = vpack.c.bf16 %v10520_v24, %v10519_v32 }
 0x49a   :  { %7500 = vmatmul.mubr.f32.vlgmr.msra.gmra.mrb[16].mxu1 %v9455_v33 }
 0x49b   :  { %7502 = vmatprep.mubr.f32.mxu1 %v9460_v41  ;;  %8150 = vmatpush3.bf16.msra.mxu1 %v9210_v50 }
 0x49c   :  { %8152 = vmatprep.subr.bf16.mxu1 %v8151_v49 }
 0x49e   :  { %7503 = vmatmul.mubr.f32.gmra.mrb[18].mxu1 %v9474_v12 }
 0x49f   :  { %7505 = vmatprep.mubr.f32.mxu1 %v9487_v7  ;;  %8154 = vmatpush3.bf16.msra.mxu1 %v8151_v49 }
 0x4a0   :  { %8156 = vmatprep.subr.bf16.mxu1 %v9398_v51 }
 0x4a2   :  { %7506 = vmatmul.mubr.f32.gmra.mrb[20].mxu1 %v9516_v53 }
 0x4a3   :  { %7508 = vmatprep.mubr.f32.mxu1 %v9530_v44  ;;  %8158 = vmatpush3.bf16.msra.mxu1 %v9398_v51 }
 0x4a4   :  { %8160 = vmatprep.subr.bf16.mxu1 %v8159_v1 }
 0x4a6   :  { %7509 = vmatmul.mubr.f32.gmra.mrb[22].mxu1 %v9552_v20 }
 0x4a7   :  { %8162 = vmatpush3.bf16.msra.mxu1 %v8159_v1  ;;  %7527 = vmatprep.mubr.f32.mxu1 %v9453_v8 }
 0x4a8   :  { %8164 = vmatprep.subr.bf16.mxu1 %v9207_v46 }
 0x4aa   :  { %7528 = vmatmul.mubr.f32.vlgmr.msra.gmra.mrb[16].mxu1 %v9472_v10 }
 0x4ab   :  { %7530 = vmatprep.mubr.f32.mxu1 %v9478_v59  ;;  %8166 = vmatpush3.bf16.msra.mxu1 %v9207_v46 }
 0x4ac   :  { %8168 = vmatprep.subr.bf16.mxu1 %v9348_v60 }
 0x4ae   :  { %v1824_v50 = vpop.xlane.xlu1 %1823  ;;  %7531 = vmatmul.mubr.f32.gmra.mrb[18].mxu1 %v9485_v14 }
 0x4af   :  { %8671 = vrcp.f32 %v1824_v50  ;;  %7533 = vmatprep.mubr.f32.mxu1 %v9495_v3  ;;  %8170 = vmatpush3.bf16.msra.mxu1 %v9348_v60 }
 0x4b0   :  { %8172 = vmatprep.subr.bf16.mxu1 %v9395_v18 }
 0x4b2   :  { %v1833_v51 = vpop.xlane.xlu1 %1832  ;;  %7534 = vmatmul.mubr.f32.gmra.mrb[20].mxu1 %v9523_v61  ;;  %v1821_v36 = vpop.xlane.xlu0 %1820 }
 0x4b3   :  { %8673 = vrcp.f32 %v1833_v51  ;;  %7536 = vmatprep.mubr.f32.mxu1 %v9541_v48  ;;  %8174 = vmatpush3.bf16.msra.mxu1 %v9395_v18 }
 0x4b4   :  { %8675 = vrcp.f32 %v1821_v36  ;;  %8176 = vmatprep.subr.bf16.mxu1 %v9503_v31 }
 0x4b6   :  { %v1839_v56 = vpop.xlane.xlu1 %1838  ;;  %7537 = vmatmul.mubr.f32.gmra.mrb[22].mxu1 %v9558_v40  ;;  %v1827_v25 = vpop.xlane.xlu0 %1826 }
 0x4b7   :  { %8677 = vrcp.f32 %v1839_v56  ;;  %8178 = vmatpush3.bf16.msra.mxu1 %v9503_v31  ;;  %7555 = vmatprep.mubr.f32.mxu1 %v10517_v57 }
 0x4b8   :  { %8679 = vrcp.f32 %v1827_v25  ;;  %8180 = vmatprep.subr.bf16.mxu1 %v9213_v23 }
 0x4b9   :  { %v8672_v11 = vpop.eup %8671 }
 0x4ba   :  { %v1846_v6 = vmul.f32 %v8672_v11, %v9412_v15  ;;  %7556 = vmatmul.mubr.f32.vlgmr.msra.gmra.mrb[16].mxu1 %v10518_v4  ;;  %v1830_v38 = vpop.xlane.xlu0 %1829 }
 0x4bb   :  { %8681 = vrcp.f32 %v1830_v38  ;;  %7558 = vmatprep.mubr.f32.mxu1 %v10521_v5  ;;  %8182 = vmatpush3.bf16.msra.mxu1 %v9213_v23  ;;  %v10523_v23 = vand.u32 4294901760, %v9495_v3  ;;  %v10525_v3 = vand.u32 4294901760, %v9497_v16 }
 0x4bc   :  { %v1863_v8 = vsel %vm1770_vm4, %v1846_v6, 0  ;;  %8184 = vmatprep.subr.bf16.mxu1 %v8183_v52 }
 0x4bd   :  { %v8674_v49 = vpop.eup %8673  ;;  %v9612_v15 = vand.u32 4294901760, %v1863_v8 }
 0x4be   :  { %v8676_v10 = vpop.eup %8675  ;;  %v1852_v1 = vmul.f32 %v8674_v49, %v9419_v42  ;;  %7559 = vmatmul.mubr.f32.gmra.mrb[18].mxu1 %v10522_v29  ;;  %v1836_v2 = vpop.xlane.xlu0 %1835 }
 0x4bf   :  { %v9618_v50 = vsub.f32 %v1863_v8, %v9612_v15  ;;  %v1844_v59 = vmul.f32 %v8676_v10, %v9415_v21  ;;  %8683 = vrcp.f32 %v1836_v2  ;;  %7561 = vmatprep.mubr.f32.mxu1 %v10523_v23  ;;  %8186 = vmatpush3.bf16.msra.mxu1 %v8183_v52  ;;  %v10524_v21 = vand.u32 4294901760, %v9505_v28 }
 0x4c0   :  { %8188 = vmatprep.subr.bf16.mxu1 %v9402_v30  ;;  %v1872_v51 = vsel %vm1770_vm4, %v1852_v1, 0 }
 0x4c1   :  { %v8678_v36 = vpop.eup %8677  ;;  %v1860_v42 = vsel %vm1770_vm4, %v1844_v59, 0  ;;  %v8191_v57 = vpack.c.bf16 %v10525_v3, %v10524_v21  ;;  %v9640_v61 = vand.u32 4294901760, %v1872_v51 }
 0x4c2   :  { %v8680_v14 = vpop.eup %8679  ;;  %v1856_v56 = vmul.f32 %v8678_v36, %v9427_v22  ;;  %7562 = vmatmul.mubr.f32.gmra.mrb[20].mxu1 %v3058_v17  ;;  %v1842_v25 = vpop.xlane.xlu0 %1841  ;;  %v9633_v11 = vand.u32 4294901760, %v1860_v42  ;;  %v1968_v22 = vand.u32 4294901760, %v9618_v50 }
 0x4c3   :  { %v1848_v6 = vmul.f32 %v8680_v14, %v9421_v62  ;;  %8685 = vrcp.f32 %v1842_v25  ;;  %7564 = vmatprep.mubr.f32.mxu1 %v3068_v55  ;;  %8190 = vmatpush3.bf16.msra.mxu1 %v9402_v30  ;;  %v9658_v38 = vsub.f32 %v1872_v51, %v9640_v61 }
 0x4c4   :  { %8192 = vmatprep.subr.bf16.mxu1 %v8191_v57  ;;  %v9643_v28 = vsub.f32 %v1860_v42, %v9633_v11  ;;  %v1878_v16 = vsel %vm1770_vm4, %v1856_v56, 0  ;;  %v1969_v55 = vsub.f32 %v9618_v50, %v1968_v22 }
 0x4c5   :  { %v8682_v17 = vpop.eup %8681  ;;  %v1866_v4 = vsel %vm1770_vm4, %v1848_v6, 0  ;;  %v9660_v32 = vand.u32 4294901760, %v1878_v16  ;;  %v1998_v29 = vand.u32 4294901760, %v9658_v38 }
 0x4c6   :  { %v1850_v62 = vmul.f32 %v8682_v17, %v9433_v9  ;;  %7565 = vmatmul.mubr.f32.gmra.mrb[22].mxu1 %v3078_v39  ;;  %v1958_v48 = vand.u32 4294901760, %v9643_v28  ;;  %v9651_v30 = vand.u32 4294901760, %v1866_v4  ;;  %v1970_v10 = vand.u32 4294901760, %v1969_v55 }
 0x4c7   :  { %8194 = vmatpush3.bf16.msra.mxu1 %v8191_v57  ;;  %7583 = vmatprep.mubr.f32.mxu1 %v9449_v47  ;;  %v9682_v2 = vsub.f32 %v1878_v16, %v9660_v32  ;;  %v1999_v56 = vsub.f32 %v9658_v38, %v1998_v29 }
 0x4c8   :  { %8196 = vmatprep.subr.bf16.mxu1 %v9207_v46  ;;  %v1959_v9 = vsub.f32 %v9643_v28, %v1958_v48  ;;  %v9667_v40 = vsub.f32 %v1866_v4, %v9651_v30  ;;  %v1869_v39 = vsel %vm1770_vm4, %v1850_v62, 0 }
 0x4c9   :  { %v8684_v24 = vpop.eup %8683  ;;  %v9670_v52 = vand.u32 4294901760, %v1869_v39  ;;  %v2000_v6 = vand.u32 4294901760, %v1999_v56 }
 0x4ca   :  { %v1854_v5 = vmul.f32 %v8684_v24, %v9437_v27  ;;  %7584 = vmatmul.mubr.f32.vlgmr.msra.gmra.mrb[16].mxu1 %v9455_v33  ;;  %v1960_v8 = vand.u32 4294901760, %v1959_v9  ;;  %v1978_v49 = vand.u32 4294901760, %v9667_v40 }
 0x4cb   :  { %7586 = vmatprep.mubr.f32.mxu1 %v9460_v41  ;;  %8198 = vmatpush3.bf16.msra.mxu1 %v9207_v46  ;;  %v9678_v1 = vsub.f32 %v1869_v39, %v9670_v52 }
 0x4cc   :  { %7303 = vmatprep.mubr.f32.mxu0 %v1960_v8  ;;  %8200 = vmatprep.subr.bf16.mxu1 %v9348_v60  ;;  %v1979_v27 = vsub.f32 %v9667_v40, %v1978_v49  ;;  %v1875_v59 = vsel %vm1770_vm4, %v1854_v5, 0 }
 0x4cd   :  { %v8686_v23 = vpop.eup %8685  ;;  %7304 = vmatmul.mubr.f32.vlgmr.msra.gmra.mrb[8].mxu0 %v1970_v10  ;;  %v1988_v46 = vand.u32 4294901760, %v9678_v1  ;;  %v9690_v51 = vand.u32 4294901760, %v1875_v59 }
 0x4ce   :  { %v1858_v36 = vmul.f32 %v8686_v23, %v9441_v34  ;;  %8038 = vmatpush3.bf16.msra.mxu0 %v9070_v13  ;;  %7587 = vmatmul.mubr.f32.gmra.mrb[18].mxu1 %v9474_v12  ;;  %v1980_v42 = vand.u32 4294901760, %v1979_v27  ;;  %v2018_v13 = vand.u32 4294901760, %v9682_v2 }
 0x4cf   :  { %8040 = vmatprep.subr.bf16.mxu0 %v9093_v63  ;;  %7589 = vmatprep.mubr.f32.mxu1 %v9487_v7  ;;  %v1989_v14 = vsub.f32 %v9678_v1, %v1988_v46  ;;  %v9704_v25 = vsub.f32 %v1875_v59, %v9690_v51 }
 0x4d0   :  { %7306 = vmatprep.mubr.f32.mxu0 %v1980_v42  ;;  %8202 = vmatpush3.bf16.msra.mxu1 %v9348_v60  ;;  %v1881_v34 = vsel %vm1770_vm4, %v1858_v36, 0  ;;  %v2019_v16 = vsub.f32 %v9682_v2, %v2018_v13  ;;  %v4606_v36 = vld [vmem:[%s10456_s5] sm:$0xf]  ;;  %s8757_s5 = smov 127  }
 0x4d1   :  { %8204 = vmatprep.subr.bf16.mxu1 %v9395_v18  ;;  %v1990_v21 = vand.u32 4294901760, %v1989_v14  ;;  %v2008_v3 = vand.u32 4294901760, %v9704_v25  ;;  %v9711_v57 = vand.u32 4294901760, %v1881_v34  ;;  %v9855_v42 = vsel %vm4632_vm10, %v4606_v36, 0 }
 0x4d2   :  { %8042 = vmatpush3.bf16.msra.mxu0 %v9093_v63  ;;  %7590 = vmatmul.mubr.f32.gmra.mrb[20].mxu1 %v9516_v53  ;;  %v2020_v62 = vand.u32 4294901760, %v2019_v16  ;;  %v9858_v14 = vand.u32 4294901760, %v9855_v42 }
 0x4d3   :  { %8044 = vmatprep.subr.bf16.mxu0 %v9120_v58  ;;  %7307 = vmatmul.mubr.f32.gmra.mrb[10].mxu0 %v1990_v21  ;;  %v2009_v60 = vsub.f32 %v9704_v25, %v2008_v3  ;;  %v9723_v17 = vsub.f32 %v1881_v34, %v9711_v57 }
 0x4d4   :  { %7592 = vmatprep.mubr.f32.mxu1 %v9530_v44  ;;  %8206 = vmatpush3.bf16.msra.mxu1 %v9395_v18 }
 0x4d5   :  { %7309 = vmatprep.mubr.f32.mxu0 %v2000_v6  ;;  %8208 = vmatprep.subr.bf16.mxu1 %v9503_v31  ;;  %v2010_v63 = vand.u32 4294901760, %v2009_v60  ;;  %v2028_v4 = vand.u32 4294901760, %v9723_v17 }
 0x4d6   :  { %8046 = vmatpush3.bf16.msra.mxu0 %v9120_v58  ;;  %7593 = vmatmul.mubr.f32.gmra.mrb[22].mxu1 %v9552_v20  ;;  %v10530_v58 = vld [vmem:[#allocation6_spill] sm:$0xff] }
 0x4d7   :  { %8048 = vmatprep.subr.bf16.mxu0 %v9127_v37  ;;  %7310 = vmatmul.mubr.f32.gmra.mrb[12].mxu0 %v2010_v63  ;;  %v2029_v55 = vsub.f32 %v9723_v17, %v2028_v4 }
 0x4d8   :  { %8210 = vmatpush3.bf16.msra.mxu1 %v9503_v31  ;;  %7611 = vmatprep.mubr.f32.mxu1 %v9449_v47  ;;  %v3821_v47 = vld [vmem:[%s10455_s4 + $0x8] sm:$0xff] }
 0x4d9   :  { %7312 = vmatprep.mubr.f32.mxu0 %v2020_v62  ;;  %v2030_v18 = vand.u32 4294901760, %v2029_v55  ;;  %7719 = vmatprep.subr.mxu1 %v9858_v14 }
 0x4da   :  { %8050 = vmatpush3.bf16.msra.mxu0 %v9127_v37  ;;  %v3820_v37 = vld [vmem:[%s10455_s4] sm:$0xff] }
 0x4db   :  { %8052 = vmatprep.subr.bf16.mxu0 %v9098_v26  ;;  %7612 = vmatmul.mubr.f32.vlgmr.msra.gmra.mrb[16].mxu1 %v9455_v33 }
 0x4dc   :  { %7313 = vmatmul.mubr.f32.gmra.mrb[14].mxu0 %v2030_v18  ;;  %7614 = vmatprep.mubr.f32.mxu1 %v9460_v41  ;;  %v3847_v41 = vand.u32 4294901760, %v3820_v37 }
 0x4dd   :  { %7331 = vmatprep.mubr.f32.mxu0 %v9633_v11  ;;  %7720 = vmatpush3.msra.mxu1 %v9858_v14 }
 0x4df   :  { %7615 = vmatmul.mubr.f32.gmra.mrb[18].mxu1 %v9474_v12  ;;  %v3850_v12 = vand.u32 4294901760, %v3821_v47 }
 0x4e0   :  { %7332 = vmatmul.mubr.f32.vlgmr.msra.gmra.mrb[8].mxu0 %v9612_v15  ;;  %7617 = vmatprep.mubr.f32.mxu1 %v9487_v7 }
 0x4e1   :  { %8054 = vmatpush3.bf16.msra.mxu0 %v9098_v26  ;;  %7334 = vmatprep.mubr.f32.mxu0 %v9651_v30  ;;  %v10526_v26 = vld [vmem:[#allocation2_spill] sm:$0xff]  ;;  %v9833_v7 = vpack.c.bf16 %v3850_v12, %v3847_v41 }
 0x4e2   :  { %8056 = vmatprep.subr.bf16.mxu0 %v9102_v35 }
 0x4e3   :  { %7618 = vmatmul.mubr.f32.gmra.mrb[20].mxu1 %v9516_v53 }
 0x4e4   :  { %7335 = vmatmul.mubr.f32.gmra.mrb[10].mxu0 %v9670_v52  ;;  %7620 = vmatprep.mubr.f32.mxu1 %v9530_v44 }
 0x4e5   :  { %8058 = vmatpush3.bf16.msra.mxu0 %v9102_v35  ;;  %7337 = vmatprep.mubr.f32.mxu0 %v9640_v61  ;;  %v10527_v35 = vld [vmem:[#allocation3_spill] sm:$0xff] }
 0x4e6   :  { %8060 = vmatprep.subr.bf16.mxu0 %v9106_v43 }
 0x4e7   :  { %7621 = vmatmul.mubr.f32.gmra.mrb[22].mxu1 %v9552_v20 }
 0x4e8   :  { %7338 = vmatmul.mubr.f32.gmra.mrb[12].mxu0 %v9690_v51 }
 0x4e9   :  { %8062 = vmatpush3.bf16.msra.mxu0 %v9106_v43  ;;  %7340 = vmatprep.mubr.f32.mxu0 %v9660_v32  ;;  %v10528_v43 = vld [vmem:[#allocation4_spill] sm:$0xff] }
 0x4ea   :  { %8064 = vmatprep.subr.bf16.mxu0 %v9110_v54 }
 0x4ec   :  { %7341 = vmatmul.mubr.f32.gmra.mrb[14].mxu0 %v9711_v57 }
 0x4ed   :  { %8066 = vmatpush3.bf16.msra.mxu0 %v9110_v54  ;;  %7359 = vmatprep.mubr.f32.mxu0 %v9643_v28  ;;  %v10529_v54 = vld [vmem:[#allocation5_spill] sm:$0xff] }
 0x4ee   :  { %8068 = vmatprep.subr.bf16.mxu0 %v8944_v45 }
 0x4f0   :  { %7360 = vmatmul.mubr.f32.vlgmr.msra.gmra.mrb[8].mxu0 %v9618_v50 }
 0x4f1   :  { %8070 = vmatpush3.bf16.msra.mxu0 %v8944_v45  ;;  %7362 = vmatprep.mubr.f32.mxu0 %v9667_v40 }
 0x4f2   :  { %8072 = vmatprep.subr.bf16.mxu0 %v8974_v0 }
 0x4f4   :  { %7363 = vmatmul.mubr.f32.gmra.mrb[10].mxu0 %v9678_v1 }
 0x4f5   :  { %8074 = vmatpush3.bf16.msra.mxu0 %v8974_v0  ;;  %7365 = vmatprep.mubr.f32.mxu0 %v9658_v38 }
 0x4f6   :  { %8076 = vmatprep.subr.bf16.mxu0 %v9007_v19 }
 0x4f8   :  { %7366 = vmatmul.mubr.f32.gmra.mrb[12].mxu0 %v9704_v25 }
 0x4f9   :  { %8078 = vmatpush3.bf16.msra.mxu0 %v9007_v19  ;;  %7368 = vmatprep.mubr.f32.mxu0 %v9682_v2 }
 0x4fa   :  { %8080 = vmatprep.subr.bf16.mxu0 %v10526_v26 }
 0x4fc   :  { %7369 = vmatmul.mubr.f32.gmra.mrb[14].mxu0 %v9723_v17 }
 0x4fd   :  { %8082 = vmatpush3.bf16.msra.mxu0 %v10526_v26  ;;  %7387 = vmatprep.mubr.f32.mxu0 %v1958_v48 }
 0x4fe   :  { %8084 = vmatprep.subr.bf16.mxu0 %v10527_v35 }
 0x500   :  { %7388 = vmatmul.mubr.f32.vlgmr.msra.gmra.mrb[8].mxu0 %v1968_v22  ;;  %v3995_v22 = vsub.f32 %v3820_v37, %v3847_v41 }
 0x501   :  { %8086 = vmatpush3.bf16.msra.mxu0 %v10527_v35  ;;  %7390 = vmatprep.mubr.f32.mxu0 %v1978_v49 }
 0x502   :  { %8088 = vmatprep.subr.bf16.mxu0 %v10528_v43 }
 0x504   :  { %7391 = vmatmul.mubr.f32.gmra.mrb[10].mxu0 %v1988_v46 }
 0x505   :  { %8090 = vmatpush3.bf16.msra.mxu0 %v10528_v43  ;;  %7393 = vmatprep.mubr.f32.mxu0 %v1998_v29 }
 0x506   :  { %8092 = vmatprep.subr.bf16.mxu0 %v10529_v54 }
 0x508   :  { %7394 = vmatmul.mubr.f32.gmra.mrb[12].mxu0 %v2008_v3 }
 0x509   :  { %8094 = vmatpush3.bf16.msra.mxu0 %v10529_v54  ;;  %7396 = vmatprep.mubr.f32.mxu0 %v2018_v13 }
 0x50a   :  { %8096 = vmatprep.subr.bf16.mxu0 %v10530_v58 }
 0x50c   :  { %7397 = vmatmul.mubr.f32.gmra.mrb[14].mxu0 %v2028_v4 }
 0x50d   :  { %8098 = vmatpush3.bf16.msra.mxu0 %v10530_v58  ;;  %7415 = vmatprep.mubr.f32.mxu0 %v9633_v11 }
 0x50e   :  { %8100 = vmatprep.subr.bf16.mxu0 %v8944_v45 }
 0x510   :  { %7416 = vmatmul.mubr.f32.vlgmr.msra.gmra.mrb[8].mxu0 %v9612_v15 }
 0x511   :  { %8102 = vmatpush3.bf16.msra.mxu0 %v8944_v45  ;;  %7418 = vmatprep.mubr.f32.mxu0 %v9651_v30 }
 0x512   :  { %8104 = vmatprep.subr.bf16.mxu0 %v8974_v0 }
 0x514   :  { %7419 = vmatmul.mubr.f32.gmra.mrb[10].mxu0 %v9670_v52 }
 0x515   :  { %8106 = vmatpush3.bf16.msra.mxu0 %v8974_v0  ;;  %7421 = vmatprep.mubr.f32.mxu0 %v9640_v61 }
 0x516   :  { %8108 = vmatprep.subr.bf16.mxu0 %v9007_v19 }
 0x518   :  { %7422 = vmatmul.mubr.f32.gmra.mrb[12].mxu0 %v9690_v51 }
 0x519   :  { %8110 = vmatpush3.bf16.msra.mxu0 %v9007_v19  ;;  %7424 = vmatprep.mubr.f32.mxu0 %v9660_v32 }
 0x51a   :  { %8112 = vmatprep.subr.bf16.mxu0 %v10526_v26 }
 0x51c   :  { %7425 = vmatmul.mubr.f32.gmra.mrb[14].mxu0 %v9711_v57 }
 0x51d   :  { %8114 = vmatpush3.bf16.msra.mxu0 %v10526_v26  ;;  %7443 = vmatprep.mubr.f32.mxu0 %v9633_v11 }
 0x51e   :  { %8212 = vmatprep.subr.bf16.mxu0 %v9833_v7 }
 0x520   :  { %7444 = vmatmul.mubr.f32.vlgmr.msra.gmra.mrb[8].mxu0 %v9612_v15 }
 0x521   :  { %7446 = vmatprep.mubr.f32.mxu0 %v9651_v30  ;;  %8214 = vmatpush3.bf16.msra.mxu0 %v9833_v7  ;;  %v3996_v30 = vand.u32 4294901760, %v3995_v22 }
 0x523   :  { %v3997_v40 = vsub.f32 %v3995_v22, %v3996_v30 }
 0x524   :  { %7447 = vmatmul.mubr.f32.gmra.mrb[10].mxu0 %v9670_v52 }
 0x525   :  { %7449 = vmatprep.mubr.f32.mxu0 %v9640_v61  ;;  %v4002_v61 = vsub.f32 %v3821_v47, %v3850_v12  ;;  %v3998_v24 = vand.u32 4294901760, %v3997_v40 }
 0x527   :  { %v4003_v38 = vand.u32 4294901760, %v4002_v61  ;;  %v9846_v49 = vpack.c.bf16 %v4002_v61, %v3995_v22 }
 0x528   :  { %7450 = vmatmul.mubr.f32.gmra.mrb[12].mxu0 %v9690_v51 }
 0x529   :  { %7452 = vmatprep.mubr.f32.mxu0 %v9660_v32  ;;  %v4004_v39 = vsub.f32 %v4002_v61, %v4003_v38  ;;  %v9848_v10 = vpack.c.bf16 %v4003_v38, %v3996_v30 }
 0x52b   :  { %v4005_v52 = vand.u32 4294901760, %v4004_v39 }
 0x52c   :  { %7453 = vmatmul.mubr.f32.gmra.mrb[14].mxu0 %v9711_v57 }
 0x52d   :  { %v9842_v8 = vpack.c.bf16 %v4005_v52, %v3998_v24 }
 0x52f   :  { %8216 = vmatprep.subr.bf16.mxu0 %v9842_v8 }
 0x5ae   :  { %v7613_v45 = vpop.f32.mrb[16].mxu1 }
 0x5af   :  { %v3772_v0 = vmax.f32 %v7613_v45, 0.0  ;;  %v3725_v19 = vpop.f32.mrb[17].mxu1 }
 0x5b0   :  { %v3771_v33 = vmax.f32 %v3725_v19, 0.0 }
 0x5b1   :  { %3789 = vrot.lane.b32.xlu0 %v3772_v0, %s8756_s27 }
 0x5b2   :  { %3787 = vrot.lane.b32.xlu1 %v3771_v33, %s8756_s27  ;;  %v7616_v44 = vpop.f32.mrb[18].mxu1 }
 0x5b3   :  { %v3737_v31 = vpop.f32.mrb[19].mxu1  ;;  %v3774_v50 = vmax.f32 %v7616_v44, 0.0 }
 0x5b4   :  { %v3773_v53 = vmax.f32 %v3737_v31, 0.0 }
 0x5b6   :  { %3791 = vrot.lane.b32.xlu1 %v3773_v53, %s8756_s27  ;;  %v7619_v20 = vpop.f32.mrb[20].mxu1 }
 0x5b7   :  { %v3749_v15 = vpop.f32.mrb[21].mxu1  ;;  %v3776_v32 = vmax.f32 %v7619_v20, 0.0 }
 0x5b8   :  { %v3775_v11 = vmax.f32 %v3749_v15, 0.0 }
 0x5ba   :  { %3793 = vrot.lane.b32.xlu1 %v3774_v50, %s8756_s27  ;;  %3795 = vrot.lane.b32.xlu0 %v3775_v11, %s8756_s27  ;;  %v7622_v28 = vpop.f32.mrb[22].mxu1 }
 0x5bb   :  { %v3761_v48 = vpop.f32.mrb[23].mxu1  ;;  %v3778_v5 = vmax.f32 %v7622_v28, 0.0 }
 0x5bc   :  { %v3777_v9 = vmax.f32 %v3761_v48, 0.0 }
 0x5be   :  { %3797 = vrot.lane.b32.xlu1 %v3776_v32, %s8756_s27  ;;  %3799 = vrot.lane.b32.xlu0 %v3777_v9, %s8756_s27 }
 0x5c2   :  { %3801 = vrot.lane.b32.xlu1 %v3778_v5, %s8756_s27 }
 0x5f3   :  { %v7445_v1 = vpop.f32.mrb[8].mxu0 }
 0x5f4   :  { %v2675_v29 = vpop.f32.mrb[9].mxu0  ;;  %v2722_v56 = vmax.f32 %v7445_v1, 0.0 }
 0x5f5   :  { %v2721_v25 = vmax.f32 %v2675_v29, 0.0 }
 0x5f7   :  { %v7448_v2 = vpop.f32.mrb[10].mxu0 }
 0x5f8   :  { %v2687_v27 = vpop.f32.mrb[11].mxu0  ;;  %v2724_v35 = vmax.f32 %v7448_v2, 0.0 }
 0x5f9   :  { %v2723_v16 = vmax.f32 %v2687_v27, 0.0 }
 0x5fb   :  { %v7451_v59 = vpop.f32.mrb[12].mxu0 }
 0x5fc   :  { %v2699_v23 = vpop.f32.mrb[13].mxu0  ;;  %v2726_v12 = vmax.f32 %v7451_v59, 0.0 }
 0x5fd   :  { %v2725_v43 = vmax.f32 %v2699_v23, 0.0 }
 0x5ff   :  { %v9850_v46 = vpop.f32.mrb[14].mxu0 }
 0x600   :  { %v2711_v51 = vpop.f32.mrb[15].mxu0  ;;  %v2728_v9 = vmax.f32 %v9850_v46, 0.0 }
 0x601   :  { %v2727_v44 = vmax.f32 %v2711_v51, 0.0 }
 0x623   :  { %v3790_v13 = vpop.permute.xlu0 %3789 }
 0x624   :  { %v3813_v34 = vsel %vm3811_vm11, %v2722_v56, %v3790_v13  ;;  %v3788_v21 = vpop.permute.xlu1 %3787 }
 0x625   :  { %v3826_v3 = vsel %vm67_vm0, %v3813_v34, 0  ;;  %v3812_v57 = vsel %vm3811_vm11, %v2721_v25, %v3788_v21 }
 0x626   :  { %v9865_v6 = vand.u32 4294901760, %v3826_v3  ;;  %v3823_v60 = vsel %vm67_vm0, %v3812_v57, 0 }
 0x627   :  { %v9868_v17 = vand.u32 4294901760, %v3823_v60 }
 0x628   :  { %v9871_v63 = vsub.f32 %v3826_v3, %v9865_v6  ;;  %v3792_v4 = vpop.permute.xlu1 %3791 }
 0x629   :  { %v9874_v62 = vsub.f32 %v3823_v60, %v9868_v17  ;;  %v3814_v55 = vsel %vm3811_vm11, %v2723_v16, %v3792_v4 }
 0x62a   :  { %v3925_v18 = vand.u32 4294901760, %v9871_v63  ;;  %v3829_v26 = vsel %vm67_vm0, %v3814_v55, 0 }
 0x62b   :  { %v9879_v54 = vand.u32 4294901760, %v3829_v26  ;;  %v3915_v58 = vand.u32 4294901760, %v9874_v62 }
 0x62c   :  { %v3926_v45 = vsub.f32 %v9871_v63, %v3925_v18  ;;  %v3794_v0 = vpop.permute.xlu1 %3793  ;;  %v3796_v19 = vpop.permute.xlu0 %3795 }
 0x62d   :  { %v9886_v37 = vsub.f32 %v3829_v26, %v9879_v54  ;;  %v3815_v47 = vsel %vm3811_vm11, %v2724_v35, %v3794_v0  ;;  %v3816_v33 = vsel %vm3811_vm11, %v2725_v43, %v3796_v19  ;;  %v3916_v41 = vsub.f32 %v9874_v62, %v3915_v58 }
 0x62e   :  { %v3832_v31 = vsel %vm67_vm0, %v3815_v47, 0  ;;  %v3835_v53 = vsel %vm67_vm0, %v3816_v33, 0  ;;  %v3927_v22 = vand.u32 4294901760, %v3926_v45 }
 0x62f   :  { %v9895_v20 = vand.u32 4294901760, %v3832_v31  ;;  %v9897_v15 = vand.u32 4294901760, %v3835_v53  ;;  %v3917_v50 = vand.u32 4294901760, %v3916_v41  ;;  %v3935_v11 = vand.u32 4294901760, %v9886_v37 }
 0x630   :  { %v3798_v61 = vpop.permute.xlu1 %3797  ;;  %v3800_v28 = vpop.permute.xlu0 %3799 }
 0x631   :  { %v9901_v48 = vsub.f32 %v3832_v31, %v9895_v20  ;;  %v9904_v30 = vsub.f32 %v3835_v53, %v9897_v15  ;;  %v3817_v38 = vsel %vm3811_vm11, %v2726_v12, %v3798_v61  ;;  %v3818_v32 = vsel %vm3811_vm11, %v2727_v44, %v3800_v28  ;;  %7627 = vmatprep.mubr.f32.mxu0 %v3917_v50 }
 0x632   :  { %v3838_v40 = vsel %vm67_vm0, %v3817_v38, 0  ;;  %v3841_v39 = vsel %vm67_vm0, %v3818_v32, 0  ;;  %7628 = vmatmul.mubr.f32.vlgmr.msra.gmra.mrb[16].mxu0 %v3927_v22  ;;  %v3936_v24 = vsub.f32 %v9886_v37, %v3935_v11 }
 0x633   :  { %v9914_v52 = vand.u32 4294901760, %v3838_v40  ;;  %v9916_v5 = vand.u32 4294901760, %v3841_v39  ;;  %8218 = vmatpush3.bf16.msra.mxu0 %v9842_v8  ;;  %v3945_v1 = vand.u32 4294901760, %v9901_v48  ;;  %v3955_v29 = vand.u32 4294901760, %v9904_v30 }
 0x634   :  { %v3802_v2 = vpop.permute.xlu1 %3801  ;;  %v3937_v27 = vand.u32 4294901760, %v3936_v24  ;;  %8220 = vmatprep.subr.bf16.mxu0 %v9846_v49 }
 0x635   :  { %v3964_v59 = vsub.f32 %v3838_v40, %v9914_v52  ;;  %v3974_v23 = vsub.f32 %v3841_v39, %v9916_v5  ;;  %v3819_v46 = vsel %vm3811_vm11, %v2728_v9, %v3802_v2  ;;  %v3946_v51 = vsub.f32 %v9901_v48, %v3945_v1 }
 0x636   :  { %v3844_v36 = vsel %vm67_vm0, %v3819_v46, 0  ;;  %7630 = vmatprep.mubr.f32.mxu0 %v3937_v27  ;;  %v3956_v8 = vsub.f32 %v9904_v30, %v3955_v29 }
 0x637   :  { %v9928_v56 = vand.u32 4294901760, %v3844_v36  ;;  %v3947_v25 = vand.u32 4294901760, %v3946_v51  ;;  %v3965_v13 = vand.u32 4294901760, %v3964_v59  ;;  %v3975_v34 = vand.u32 4294901760, %v3974_v23 }
 0x638   :  { %v3957_v21 = vand.u32 4294901760, %v3956_v8 }
 0x639   :  { %v3984_v3 = vsub.f32 %v3844_v36, %v9928_v56  ;;  %7631 = vmatmul.mubr.f32.gmra.mrb[18].mxu0 %v3947_v25  ;;  %v3966_v57 = vsub.f32 %v3964_v59, %v3965_v13  ;;  %v3976_v60 = vsub.f32 %v3974_v23, %v3975_v34 }
 0x63a   :  { %7633 = vmatprep.mubr.f32.mxu0 %v3957_v21 }
 0x63b   :  { %v3967_v16 = vand.u32 4294901760, %v3966_v57  ;;  %v3977_v4 = vand.u32 4294901760, %v3976_v60  ;;  %v3985_v55 = vand.u32 4294901760, %v3984_v3 }
 0x63d   :  { %7634 = vmatmul.mubr.f32.gmra.mrb[20].mxu0 %v3967_v16  ;;  %v3986_v26 = vsub.f32 %v3984_v3, %v3985_v55 }
 0x63e   :  { %7636 = vmatprep.mubr.f32.mxu0 %v3977_v4 }
 0x63f   :  { %v3987_v35 = vand.u32 4294901760, %v3986_v26 }
 0x641   :  { %7637 = vmatmul.mubr.f32.gmra.mrb[22].mxu0 %v3987_v35 }
 0x642   :  { %7643 = vmatprep.mubr.f32.mxu0 %v9868_v17 }
 0x645   :  { %7644 = vmatmul.mubr.f32.vlgmr.msra.gmra.mrb[16].mxu0 %v9865_v6 }
 0x646   :  { %7646 = vmatprep.mubr.f32.mxu0 %v9879_v54  ;;  %8222 = vmatpush3.bf16.msra.mxu0 %v9846_v49 }
 0x647   :  { %8224 = vmatprep.subr.bf16.mxu0 %v9833_v7 }
 0x649   :  { %7647 = vmatmul.mubr.f32.gmra.mrb[18].mxu0 %v9895_v20 }
 0x64a   :  { %7649 = vmatprep.mubr.f32.mxu0 %v9897_v15 }
 0x64d   :  { %7650 = vmatmul.mubr.f32.gmra.mrb[20].mxu0 %v9914_v52 }
 0x64e   :  { %7652 = vmatprep.mubr.f32.mxu0 %v9916_v5 }
 0x651   :  { %7653 = vmatmul.mubr.f32.gmra.mrb[22].mxu0 %v9928_v56 }
 0x652   :  { %7659 = vmatprep.mubr.f32.mxu0 %v9874_v62 }
 0x655   :  { %7660 = vmatmul.mubr.f32.vlgmr.msra.gmra.mrb[16].mxu0 %v9871_v63 }
 0x656   :  { %7662 = vmatprep.mubr.f32.mxu0 %v9886_v37  ;;  %8226 = vmatpush3.bf16.msra.mxu0 %v9833_v7 }
 0x657   :  { %8228 = vmatprep.subr.bf16.mxu0 %v9848_v10 }
 0x659   :  { %7663 = vmatmul.mubr.f32.gmra.mrb[18].mxu0 %v9901_v48 }
 0x65a   :  { %7665 = vmatprep.mubr.f32.mxu0 %v9904_v30 }
 0x65d   :  { %7666 = vmatmul.mubr.f32.gmra.mrb[20].mxu0 %v3964_v59 }
 0x65e   :  { %7668 = vmatprep.mubr.f32.mxu0 %v3974_v23 }
 0x661   :  { %7669 = vmatmul.mubr.f32.gmra.mrb[22].mxu0 %v3984_v3 }
 0x662   :  { %7675 = vmatprep.mubr.f32.mxu0 %v3915_v58 }
 0x665   :  { %7676 = vmatmul.mubr.f32.vlgmr.msra.gmra.mrb[16].mxu0 %v3925_v18 }
 0x666   :  { %7678 = vmatprep.mubr.f32.mxu0 %v3935_v11  ;;  %8230 = vmatpush3.bf16.msra.mxu0 %v9848_v10 }
 0x667   :  { %8232 = vmatprep.subr.bf16.mxu0 %v9833_v7 }
 0x669   :  { %7679 = vmatmul.mubr.f32.gmra.mrb[18].mxu0 %v3945_v1 }
 0x66a   :  { %7681 = vmatprep.mubr.f32.mxu0 %v3955_v29 }
 0x66d   :  { %7682 = vmatmul.mubr.f32.gmra.mrb[20].mxu0 %v3965_v13 }
 0x66e   :  { %7684 = vmatprep.mubr.f32.mxu0 %v3975_v34 }
 0x671   :  { %7685 = vmatmul.mubr.f32.gmra.mrb[22].mxu0 %v3985_v55 }
 0x672   :  { %7691 = vmatprep.mubr.f32.mxu0 %v9868_v17 }
 0x675   :  { %7692 = vmatmul.mubr.f32.vlgmr.msra.gmra.mrb[16].mxu0 %v9865_v6 }
 0x676   :  { %7694 = vmatprep.mubr.f32.mxu0 %v9879_v54  ;;  %8234 = vmatpush3.bf16.msra.mxu0 %v9833_v7  ;;  %v9975_v7 = vsub.f32 %v9855_v42, %v9858_v14 }
 0x678   :  { %v9978_v49 = vand.u32 4294901760, %v9975_v7 }
 0x679   :  { %7695 = vmatmul.mubr.f32.gmra.mrb[18].mxu0 %v9895_v20 }
 0x67a   :  { %7697 = vmatprep.mubr.f32.mxu0 %v9897_v15  ;;  %v4786_v10 = vsub.f32 %v9975_v7, %v9978_v49 }
 0x67d   :  { %7698 = vmatmul.mubr.f32.gmra.mrb[20].mxu0 %v9914_v52 }
 0x67e   :  { %7700 = vmatprep.mubr.f32.mxu0 %v9916_v5 }
 0x681   :  { %7701 = vmatmul.mubr.f32.gmra.mrb[22].mxu0 %v9928_v56 }
 0x682   :  { %7707 = vmatprep.mubr.f32.mxu0 %v9868_v17 }
 0x685   :  { %7708 = vmatmul.mubr.f32.vlgmr.msra.gmra.mrb[16].mxu0 %v9865_v6  ;;  %v9982_v6 = vand.u32 4294901760, %v4786_v10 }
 0x686   :  { %7710 = vmatprep.mubr.f32.mxu0 %v9879_v54 }
 0x687   :  { %7733 = vmatprep.subr.mxu1 %v9982_v6 }
 0x689   :  { %7711 = vmatmul.mubr.f32.gmra.mrb[18].mxu0 %v9895_v20 }
 0x68a   :  { %7713 = vmatprep.mubr.f32.mxu0 %v9897_v15 }
 0x68d   :  { %7714 = vmatmul.mubr.f32.gmra.mrb[20].mxu0 %v9914_v52 }
 0x68e   :  { %7716 = vmatprep.mubr.f32.mxu0 %v9916_v5 }
 0x691   :  { %7717 = vmatmul.mubr.f32.gmra.mrb[22].mxu0 %v9928_v56 }
 0x758   :  { %v7709_v17 = vpop.f32.mrb[16].mxu0 }
 0x759   :  { %v4612_v63 = vsel %vm4607_vm12, %v7709_v17, 0  ;;  %v5631_v62 = vand.u32 4294901760, %v7709_v17  ;;  %v4560_v18 = vpop.f32.mrb[17].mxu0 }
 0x75a   :  { %v9986_v43 = vand.u32 4294901760, %v4612_v63  ;;  %v4609_v42 = vsel %vm4607_vm12, %v4560_v18, 0  ;;  %v5628_v54 = vand.u32 4294901760, %v4560_v18 }
 0x75b   :  { %v9989_v58 = vsub.f32 %v7709_v17, %v5631_v62  ;;  %v9991_v45 = vand.u32 4294901760, %v4609_v42 }
 0x75c   :  { %v9994_v0 = vsub.f32 %v4612_v63, %v9986_v43  ;;  %v9996_v19 = vpack.c.bf16 %v5631_v62, %v5628_v54  ;;  %v9998_v37 = vsub.f32 %v4560_v18, %v5628_v54  ;;  %v7712_v47 = vpop.f32.mrb[18].mxu0 }
 0x75d   :  { %v5790_v33 = vand.u32 4294901760, %v9989_v58  ;;  %v10002_v41 = vsub.f32 %v4609_v42, %v9991_v45  ;;  %v4618_v12 = vsel %vm4607_vm12, %v7712_v47, 0  ;;  %v5637_v44 = vand.u32 4294901760, %v7712_v47  ;;  %v4572_v31 = vpop.f32.mrb[19].mxu0 }
 0x75e   :  { %v4714_v53 = vand.u32 4294901760, %v9994_v0  ;;  %v5783_v20 = vand.u32 4294901760, %v9998_v37  ;;  %v10007_v15 = vand.u32 4294901760, %v4618_v12  ;;  %v4615_v50 = vsel %vm4607_vm12, %v4572_v31, 0  ;;  %8236 = vmatprep.subr.bf16.mxu0 %v9996_v19 }
 0x75f   :  { %v10011_v11 = vsub.f32 %v7712_v47, %v5637_v44  ;;  %v10013_v22 = vand.u32 4294901760, %v4615_v50  ;;  %v5634_v61 = vand.u32 4294901760, %v4572_v31  ;;  %8238 = vmatpush3.bf16.msra.mxu0 %v9996_v19  ;;  %v4704_v38 = vand.u32 4294901760, %v10002_v41 }
 0x760   :  { %v4715_v28 = vsub.f32 %v9994_v0, %v4714_v53  ;;  %v10020_v48 = vsub.f32 %v4618_v12, %v10007_v15  ;;  %v7715_v30 = vpop.f32.mrb[20].mxu0  ;;  %v10026_v32 = vsub.f32 %v9998_v37, %v5783_v20  ;;  %v5791_v52 = vsub.f32 %v9989_v58, %v5790_v33 }
 0x761   :  { %v10029_v9 = vsub.f32 %v4615_v50, %v10013_v22  ;;  %v10031_v40 = vpack.c.bf16 %v5637_v44, %v5634_v61  ;;  %v10033_v39 = vsub.f32 %v4572_v31, %v5634_v61  ;;  %v4584_v24 = vpop.f32.mrb[21].mxu0  ;;  %v5804_v5 = vand.u32 4294901760, %v10011_v11 }
 0x762   :  { %v4624_v1 = vsel %vm4607_vm12, %v7715_v30, 0  ;;  %v5643_v29 = vand.u32 4294901760, %v7715_v30  ;;  %v4621_v2 = vsel %vm4607_vm12, %v4584_v24, 0  ;;  %v4716_v27 = vand.u32 4294901760, %v4715_v28 }
 0x763   :  { %v10041_v59 = vand.u32 4294901760, %v4624_v1  ;;  %v10043_v23 = vand.u32 4294901760, %v4621_v2  ;;  %v5640_v46 = vand.u32 4294901760, %v4584_v24  ;;  %8240 = vmatprep.subr.bf16.mxu0 %v10031_v40  ;;  %v4705_v8 = vsub.f32 %v10002_v41, %v4704_v38 }
 0x764   :  { %v10046_v51 = vsub.f32 %v7715_v30, %v5643_v29  ;;  %8242 = vmatpush3.bf16.msra.mxu0 %v10031_v40  ;;  %v7718_v36 = vpop.f32.mrb[22].mxu0  ;;  %v4724_v56 = vand.u32 4294901760, %v10029_v9  ;;  %v4734_v25 = vand.u32 4294901760, %v10020_v48  ;;  %v5797_v13 = vand.u32 4294901760, %v10033_v39 }
 0x765   :  { %v10056_v34 = vsub.f32 %v4624_v1, %v10041_v59  ;;  %v10058_v21 = vpack.c.bf16 %v5643_v29, %v5640_v46  ;;  %v10060_v3 = vsub.f32 %v4584_v24, %v5640_v46  ;;  %v4596_v57 = vpop.f32.mrb[23].mxu0  ;;  %v10063_v60 = vsub.f32 %v4621_v2, %v10043_v23 }
 0x766   :  { %v4630_v16 = vsel %vm4607_vm12, %v7718_v36, 0  ;;  %v5649_v4 = vand.u32 4294901760, %v7718_v36  ;;  %v4627_v55 = vsel %vm4607_vm12, %v4596_v57, 0  ;;  %v5818_v26 = vand.u32 4294901760, %v10046_v51 }
 0x767   :  { %v10068_v35 = vand.u32 4294901760, %v4630_v16  ;;  %v10070_v10 = vand.u32 4294901760, %v4627_v55  ;;  %v5646_v17 = vand.u32 4294901760, %v4596_v57  ;;  %8244 = vmatprep.subr.bf16.mxu0 %v10058_v21  ;;  %v4706_v62 = vand.u32 4294901760, %v4705_v8 }
 0x768   :  { %v5831_v63 = vsub.f32 %v7718_v36, %v5649_v4  ;;  %8246 = vmatpush3.bf16.msra.mxu0 %v10058_v21  ;;  %v4725_v18 = vsub.f32 %v10029_v9, %v4724_v56  ;;  %v4735_v42 = vsub.f32 %v10020_v48, %v4734_v25  ;;  %v5811_v31 = vand.u32 4294901760, %v10060_v3 }
 0x769   :  { %v10081_v54 = vsub.f32 %v4630_v16, %v10068_v35  ;;  %v10084_v47 = vsub.f32 %v4627_v55, %v10070_v10  ;;  %v10086_v12 = vpack.c.bf16 %v5649_v4, %v5646_v17  ;;  %v5824_v44 = vsub.f32 %v4596_v57, %v5646_v17  ;;  %7721 = vmatprep.mubr.f32.mxu1 %v4706_v62 }
 0x76a   :  { %v5832_v50 = vand.u32 4294901760, %v5831_v63  ;;  %v4726_v61 = vand.u32 4294901760, %v4725_v18  ;;  %v5785_v28 = vand.u32 4294901760, %v10026_v32  ;;  %7722 = vmatmul.mubr.f32.vlgmr.msra.gmra.mrb[24].mxu1 %v4716_v27  ;;  %v5792_v24 = vand.u32 4294901760, %v5791_v52 }
 0x76b   :  { %v5825_v30 = vand.u32 4294901760, %v5824_v44  ;;  %8248 = vmatprep.subr.bf16.mxu0 %v10086_v12  ;;  %v4744_v1 = vand.u32 4294901760, %v10063_v60  ;;  %v4754_v29 = vand.u32 4294901760, %v10056_v34  ;;  %7734 = vmatpush3.msra.mxu1 %v9982_v6  ;;  %v10490_v2 = vand.u32 4294901760, %v10084_v47 }
 0x76c   :  { %7724 = vmatprep.mubr.f32.mxu1 %v4726_v61  ;;  %v10489_v46 = vand.u32 4294901760, %v10081_v54  ;;  %v5798_v32 = vsub.f32 %v10033_v39, %v5797_v13  ;;  %v5805_v27 = vsub.f32 %v10011_v11, %v5804_v5  ;;  %v4736_v52 = vand.u32 4294901760, %v4735_v42  ;;  %8250 = vmatpush3.bf16.msra.mxu0 %v10086_v12 }
 0x76d   :  { %v10103_v36 = vpack.c.bf16 %v5792_v24, %v5785_v28  ;;  %v4745_v6 = vsub.f32 %v10063_v60, %v4744_v1  ;;  %v4755_v8 = vsub.f32 %v10056_v34, %v4754_v29  ;;  %7747 = vmatprep.subr.mxu1 %v9975_v7  ;;  %v4765_v57 = vsub.f32 %v10084_v47, %v10490_v2 }
 0x76e   :  { %v5799_v16 = vand.u32 4294901760, %v5798_v32  ;;  %v5806_v4 = vand.u32 4294901760, %v5805_v27  ;;  %7725 = vmatmul.mubr.f32.gmra.mrb[26].mxu1 %v4736_v52  ;;  %v4775_v17 = vsub.f32 %v10081_v54, %v10489_v46  ;;  %v5812_v62 = vsub.f32 %v10060_v3, %v5811_v31 }
 0x76f   :  { %8252 = vmatprep.subr.bf16.mxu0 %v10103_v36  ;;  %v4746_v55 = vand.u32 4294901760, %v4745_v6  ;;  %v5819_v18 = vsub.f32 %v10046_v51, %v5818_v26  ;;  %v4756_v42 = vand.u32 4294901760, %v4755_v8  ;;  %v4766_v61 = vand.u32 4294901760, %v4765_v57 }
 0x770   :  { %v10123_v28 = vpack.c.bf16 %v5806_v4, %v5799_v16  ;;  %v5826_v24 = vsub.f32 %v5824_v44, %v5825_v30  ;;  %v5813_v32 = vand.u32 4294901760, %v5812_v62  ;;  %v5833_v52 = vsub.f32 %v5831_v63, %v5832_v50 }
 0x771   :  { %7727 = vmatprep.mubr.f32.mxu1 %v4746_v55  ;;  %v5820_v27 = vand.u32 4294901760, %v5819_v18  ;;  %v10127_v6 = vpack.c.bf16 %v9989_v58, %v9998_v37  ;;  %v10131_v2 = vpack.c.bf16 %v10011_v11, %v10033_v39  ;;  %v10135_v8 = vpack.c.bf16 %v10046_v51, %v10060_v3 }
 0x772   :  { %v5827_v46 = vand.u32 4294901760, %v5826_v24  ;;  %v10137_v57 = vpack.c.bf16 %v5831_v63, %v5824_v44  ;;  %7728 = vmatmul.mubr.f32.gmra.mrb[28].mxu1 %v4756_v42  ;;  %v5834_v4 = vand.u32 4294901760, %v5833_v52  ;;  %v10145_v55 = vpack.c.bf16 %v5790_v33, %v5783_v20  ;;  %v10535_v24 = vld [vmem:[#allocation15_spill] sm:$0xff] }
 0x773   :  { %v10139_v16 = vpack.c.bf16 %v5820_v27, %v5813_v32  ;;  %v10151_v62 = vpack.c.bf16 %v5804_v5, %v5797_v13  ;;  %7730 = vmatprep.mubr.f32.mxu1 %v4766_v61  ;;  %v10155_v3 = vpack.c.bf16 %v5818_v26, %v5811_v31  ;;  %v10157_v63 = vpack.c.bf16 %v5832_v50, %v5825_v30  ;;  %v10536_v27 = vld [vmem:[#allocation9_spill] sm:$0xff] }
 0x774   :  { %v4776_v44 = vand.u32 4294901760, %v4775_v17  ;;  %v10159_v18 = vpack.c.bf16 %v5834_v4, %v5827_v46  ;;  %v10532_v58 = vand.u32 4294901760, %v10081_v54 }
 0x776   :  { %7731 = vmatmul.mubr.f32.gmra.mrb[30].mxu1 %v4776_v44 }
 0x777   :  { %7735 = vmatprep.mubr.f32.mxu1 %v9991_v45 }
 0x77a   :  { %7736 = vmatmul.mubr.f32.vlgmr.msra.gmra.mrb[24].mxu1 %v9986_v43 }
 0x77b   :  { %7738 = vmatprep.mubr.f32.mxu1 %v10013_v22  ;;  %7748 = vmatpush3.msra.mxu1 %v9975_v7  ;;  %v10531_v7 = vand.u32 4294901760, %v10084_v47 }
 0x77c   :  { %7761 = vmatprep.subr.mxu1 %v9858_v14 }
 0x77e   :  { %7739 = vmatmul.mubr.f32.gmra.mrb[26].mxu1 %v10007_v15 }
 0x77f   :  { %7741 = vmatprep.mubr.f32.mxu1 %v10043_v23 }
 0x782   :  { %7742 = vmatmul.mubr.f32.gmra.mrb[28].mxu1 %v10041_v59 }
 0x783   :  { %7744 = vmatprep.mubr.f32.mxu1 %v10070_v10 }
 0x786   :  { %7745 = vmatmul.mubr.f32.gmra.mrb[30].mxu1 %v10068_v35 }
 0x787   :  { %7749 = vmatprep.mubr.f32.mxu1 %v10002_v41 }
 0x78a   :  { %7750 = vmatmul.mubr.f32.vlgmr.msra.gmra.mrb[24].mxu1 %v9994_v0 }
 0x78b   :  { %7752 = vmatprep.mubr.f32.mxu1 %v10029_v9  ;;  %7762 = vmatpush3.msra.mxu1 %v9858_v14 }
 0x78c   :  { %7775 = vmatprep.subr.mxu1 %v9978_v49 }
 0x78e   :  { %7753 = vmatmul.mubr.f32.gmra.mrb[26].mxu1 %v10020_v48 }
 0x78f   :  { %7755 = vmatprep.mubr.f32.mxu1 %v10063_v60 }
 0x792   :  { %7756 = vmatmul.mubr.f32.gmra.mrb[28].mxu1 %v10056_v34  ;;  %v10533_v34 = vld [vmem:[#allocation7_spill] sm:$0xff] }
 0x793   :  { %7758 = vmatprep.mubr.f32.mxu1 %v10084_v47  ;;  %v10534_v60 = vsub.s32 0, %v10533_v34 }
 0x796   :  { %7759 = vmatmul.mubr.f32.gmra.mrb[30].mxu1 %v10081_v54 }
 0x797   :  { %7763 = vmatprep.mubr.f32.mxu1 %v4704_v38 }
 0x79a   :  { %7764 = vmatmul.mubr.f32.vlgmr.msra.gmra.mrb[24].mxu1 %v4714_v53 }
 0x79b   :  { %7766 = vmatprep.mubr.f32.mxu1 %v4724_v56  ;;  %7776 = vmatpush3.msra.mxu1 %v9978_v49 }
 0x79c   :  { %7789 = vmatprep.subr.mxu1 %v9858_v14 }
 0x79e   :  { %7767 = vmatmul.mubr.f32.gmra.mrb[26].mxu1 %v4734_v25 }
 0x79f   :  { %7769 = vmatprep.mubr.f32.mxu1 %v4744_v1 }
 0x7a2   :  { %7770 = vmatmul.mubr.f32.gmra.mrb[28].mxu1 %v4754_v29 }
 0x7a3   :  { %7772 = vmatprep.mubr.f32.mxu1 %v10531_v7 }
 0x7a6   :  { %7773 = vmatmul.mubr.f32.gmra.mrb[30].mxu1 %v10532_v58 }
 0x7a7   :  { %7777 = vmatprep.mubr.f32.mxu1 %v9991_v45 }
 0x7aa   :  { %7778 = vmatmul.mubr.f32.vlgmr.msra.gmra.mrb[24].mxu1 %v9986_v43 }
 0x7ab   :  { %7780 = vmatprep.mubr.f32.mxu1 %v10013_v22  ;;  %7790 = vmatpush3.msra.mxu1 %v9858_v14 }
 0x7ae   :  { %7781 = vmatmul.mubr.f32.gmra.mrb[26].mxu1 %v10007_v15 }
 0x7af   :  { %7783 = vmatprep.mubr.f32.mxu1 %v10043_v23 }
 0x7b2   :  { %7784 = vmatmul.mubr.f32.gmra.mrb[28].mxu1 %v10041_v59 }
 0x7b3   :  { %7786 = vmatprep.mubr.f32.mxu1 %v10070_v10 }
 0x7b6   :  { %7787 = vmatmul.mubr.f32.gmra.mrb[30].mxu1 %v10068_v35 }
 0x7b7   :  { %7791 = vmatprep.mubr.f32.mxu1 %v9991_v45 }
 0x7ba   :  { %7792 = vmatmul.mubr.f32.vlgmr.msra.gmra.mrb[24].mxu1 %v9986_v43 }
 0x7bb   :  { %7794 = vmatprep.mubr.f32.mxu1 %v10013_v22 }
 0x7be   :  { %7795 = vmatmul.mubr.f32.gmra.mrb[26].mxu1 %v10007_v15 }
 0x7bf   :  { %7797 = vmatprep.mubr.f32.mxu1 %v10043_v23 }
 0x7c2   :  { %7798 = vmatmul.mubr.f32.gmra.mrb[28].mxu1 %v10041_v59 }
 0x7c3   :  { %7800 = vmatprep.mubr.f32.mxu1 %v10070_v10 }
 0x7c6   :  { %7801 = vmatmul.mubr.f32.gmra.mrb[30].mxu1 %v10068_v35 }
 0x88d   :  { %v7793_v14 = vpop.f32.mrb[24].mxu1 }
 0x88e   :  { %5393 = vrot.lane.b32.xlu1 %v7793_v14, %s8757_s5  ;;  %v5337_v49 = vpop.f32.mrb[25].mxu1 }
 0x88f   :  { %5391 = vrot.lane.b32.xlu0 %v5337_v49, %s8757_s5 }
 0x891   :  { %v7796_v45 = vpop.f32.mrb[26].mxu1 }
 0x892   :  { %5397 = vrot.lane.b32.xlu1 %v7796_v45, %s8757_s5  ;;  %v5349_v43 = vpop.f32.mrb[27].mxu1 }
 0x893   :  { %5395 = vrot.lane.b32.xlu0 %v5349_v43, %s8757_s5 }
 0x895   :  { %v7799_v0 = vpop.f32.mrb[28].mxu1 }
 0x896   :  { %5401 = vrot.lane.b32.xlu1 %v7799_v0, %s8757_s5  ;;  %v5361_v37 = vpop.f32.mrb[29].mxu1 }
 0x897   :  { %5399 = vrot.lane.b32.xlu0 %v5361_v37, %s8757_s5 }
 0x899   :  { %v7802_v33 = vpop.f32.mrb[30].mxu1 }
 0x89a   :  { %5405 = vrot.lane.b32.xlu1 %v7802_v33, %s8757_s5  ;;  %v5373_v41 = vpop.f32.mrb[31].mxu1 }
 0x89b   :  { %5448 = vperm.xlu0 %8621, %v5337_v49  }
 0x89e   :  { %5452 = vperm.xlu1 %8622, %v7793_v14   ;;  %v10537_v14 = vld [vmem:[#allocation8_spill] sm:$0xff] }
 0x89f   :  { %5456 = vperm.xlu0 %8621, %v5349_v43  }
 0x8a2   :  { %5460 = vperm.xlu1 %8622, %v7796_v45  }
 0x8a3   :  { %5464 = vperm.xlu0 %8621, %v5361_v37   ;;  %v10538_v37 = vld [vmem:[#allocation10_spill] sm:$0xff] }
 0x8a6   :  { %5468 = vperm.xlu1 %8622, %v7799_v0  }
 0x8a7   :  { %5403 = vrot.lane.b32.xlu0 %v5373_v41, %s8757_s5 }
 0x8aa   :  { %5476 = vperm.xlu1 %8622, %v7802_v33  }
 0x8ab   :  { %5472 = vperm.xlu0 %8621, %v5373_v41  }
 0x900   :  { %v5394_v20 = vpop.permute.xlu1 %5393 }
 0x901   :  { %v5392_v53 = vpop.permute.xlu0 %5391 }
 0x902   :  { %5415 = vxpose.xlu0.b32.start [1/8] (short) (narrow) %v5392_v53, 8 }
 0x904   :  { %v5398_v11 = vpop.permute.xlu1 %5397 }
 0x905   :  { %v5396_v15 = vpop.permute.xlu0 %5395 }
 0x906   :  { %5416 = vxpose.xlu0.b32.cont [2/8] (short) (narrow) %v5394_v20, 8 }
 0x908   :  { %v5402_v48 = vpop.permute.xlu1 %5401 }
 0x909   :  { %v5400_v22 = vpop.permute.xlu0 %5399 }
 0x90a   :  { %5417 = vxpose.xlu0.b32.cont [3/8] (short) (narrow) %v5396_v15, 8 }
 0x90c   :  { %v5406_v59 = vpop.permute.xlu1 %5405 }
 0x90e   :  { %5418 = vxpose.xlu0.b32.cont [4/8] (short) (narrow) %v5398_v11, 8  ;;  %v10539_v11 = vld [vmem:[#allocation11_spill] sm:$0xff] }
 0x912   :  { %5419 = vxpose.xlu0.b32.cont [5/8] (short) (narrow) %v5400_v22, 8 }
 0x916   :  { %5420 = vxpose.xlu0.b32.cont [6/8] (short) (narrow) %v5402_v48, 8 }
 0x91a   :  { %v5449_v38 = vpop.permute.xlu0 %5448 }
 0x91d   :  { %v5453_v23 = vpop.permute.xlu1 %5452 }
 0x91e   :  { %v5457_v9 = vpop.permute.xlu0 %5456 }
 0x921   :  { %v5461_v51 = vpop.permute.xlu1 %5460 }
 0x922   :  { %v5465_v39 = vpop.permute.xlu0 %5464 }
 0x925   :  { %v5469_v56 = vpop.permute.xlu1 %5468 }
 0x926   :  { %v5404_v5 = vpop.permute.xlu0 %5403 }
 0x927   :  { %5421 = vxpose.xlu0.b32.cont [7/8] (short) (narrow) %v5404_v5, 8 }
 0x929   :  { %v5477_v35 = vpop.permute.xlu1 %5476 }
 0x92a   :  { %v5473_v25 = vpop.permute.xlu0 %5472 }
 0x92b   :  { %5422 = vxpose.xlu0.b32.end [8/8] (short) (narrow) %v5406_v59, 8 }
 0x98f   :  { %v5431_v13 = vpop.trf.xlu0 }
 0x990   :  { %v5482_v26 = vrot.slane %v5431_v13, %v10534_v60  ;;  %v10542_v60 = vld [vmem:[#allocation14_spill] sm:$0xff] }
 0x992   :  { %v5490_v10 = vadd.f32 %v5482_v26, %v5477_v35  ;;  %v5483_v54 = vadd.f32 %v5482_v26, %v5449_v38  ;;  %v5484_v47 = vadd.f32 %v5482_v26, %v5453_v23  ;;  %v5485_v31 = vadd.f32 %v5482_v26, %v5457_v9 }
 0x993   :  { %v5486_v29 = vadd.f32 %v5482_v26, %v5461_v51  ;;  %v5487_v44 = vadd.f32 %v5482_v26, %v5465_v39  ;;  %v5488_v43 = vadd.f32 %v5482_v26, %v5469_v56  ;;  %v5489_v20 = vadd.f32 %v5482_v26, %v5473_v25  ;;  %v10540_v39 = vld [vmem:[#allocation12_spill] sm:$0xff]  ;;  %v10541_v56 = vld [vmem:[#allocation13_spill] sm:$0xff] }
 0x994   :  { %v5498_v50 = vmul.f32 0.01, %v5490_v10  ;;  %v5491_v30 = vmul.f32 0.01, %v5483_v54  ;;  %v5492_v1 = vmul.f32 0.01, %v5484_v47 }
 0x995   :  { %v5493_v61 = vmul.f32 0.01, %v5485_v31  ;;  %v5494_v4 = vmul.f32 0.01, %v5486_v29  ;;  %v5495_v53 = vmul.f32 0.01, %v5487_v44 }
 0x996   :  { %v5506_v46 = vmax.f32 %v5490_v10, %v5498_v50  ;;  %v5499_v17 = vmax.f32 %v5483_v54, %v5491_v30  ;;  %v5500_v42 = vmax.f32 %v5484_v47, %v5492_v1  ;;  %v5496_v38 = vmul.f32 0.01, %v5488_v43 }
 0x997   :  { %v5501_v45 = vmax.f32 %v5485_v31, %v5493_v61  ;;  %v5502_v41 = vmax.f32 %v5486_v29, %v5494_v4  ;;  %v5503_v48 = vmax.f32 %v5487_v44, %v5495_v53  ;;  %v5497_v23 = vmul.f32 0.01, %v5489_v20 }
 0x998   :  { %v10219_v32 = vadd.f32 %v5506_v46, %v10535_v24  ;;  %v5507_v52 = vadd.f32 %v5499_v17, %v10536_v27  ;;  %v5508_v49 = vadd.f32 %v5500_v42, %v10537_v14  ;;  %v5504_v59 = vmax.f32 %v5488_v43, %v5496_v38 }
 0x999   :  { %v5509_v33 = vadd.f32 %v5501_v45, %v10538_v37  ;;  %v5510_v22 = vadd.f32 %v5502_v41, %v10539_v11  ;;  %v5511_v5 = vadd.f32 %v5503_v48, %v10540_v39  ;;  %v5505_v34 = vmax.f32 %v5489_v20, %v5497_v23 }
 0x99a   :  { %v5536_v7 = vsel %vm1770_vm4, %v10219_v32, -inf  ;;  %v5515_v58 = vsel %vm1770_vm4, %v5507_v52, -inf  ;;  %v5518_v0 = vsel %vm1770_vm4, %v5508_v49, -inf  ;;  %v5512_v13 = vadd.f32 %v5504_v59, %v10541_v56 }
 0x99b   :  { %5537 = vmax.xlane.f32.xlu0 %v5536_v7  ;;  %5516 = vmax.xlane.f32.xlu1 %v5515_v58  ;;  %v5521_v15 = vsel %vm1770_vm4, %v5509_v33, -inf  ;;  %v5524_v9 = vsel %vm1770_vm4, %v5510_v22, -inf  ;;  %v5527_v51 = vsel %vm1770_vm4, %v5511_v5, -inf  ;;  %v5513_v26 = vadd.f32 %v5505_v34, %v10542_v60 }
 0x99c   :  { %v5530_v25 = vsel %vm1770_vm4, %v5512_v13, -inf }
 0x99d   :  { %v5533_v35 = vsel %vm1770_vm4, %v5513_v26, -inf }
 0x99f   :  { %5519 = vmax.xlane.f32.xlu1 %v5518_v0 }
 0x9a3   :  { %5522 = vmax.xlane.f32.xlu1 %v5521_v15 }
 0x9a7   :  { %5525 = vmax.xlane.f32.xlu1 %v5524_v9 }
 0x9ab   :  { %5528 = vmax.xlane.f32.xlu1 %v5527_v51 }
 0x9af   :  { %5531 = vmax.xlane.f32.xlu1 %v5530_v25 }
 0x9b3   :  { %5534 = vmax.xlane.f32.xlu1 %v5533_v35 }
 0xa28   :  { %v5517_v10 = vpop.xlane.xlu1 %5516 }
 0xa29   :  { %v5539_v54 = vsub.f32 %v5507_v52, %v5517_v10 }
 0xa2b   :  { %v5547_v47 = vmul.f32 1.442695, %v5539_v54 }
 0xa2c   :  { %v5520_v31 = vpop.xlane.xlu1 %5519 }
 0xa2d   :  { %v5540_v50 = vsub.f32 %v5508_v49, %v5520_v31  ;;  %8687 = vpow2.f32 %v5547_v47  ;;  %v5538_v49 = vpop.xlane.xlu0 %5537 }
 0xa2e   :  { %v5546_v37 = vsub.f32 %v10219_v32, %v5538_v49 }
 0xa2f   :  { %v5549_v30 = vmul.f32 1.442695, %v5540_v50 }
 0xa30   :  { %v5523_v1 = vpop.xlane.xlu1 %5522  ;;  %v5561_v11 = vmul.f32 1.442695, %v5546_v37 }
 0xa31   :  { %8689 = vpow2.f32 %v5549_v30  ;;  %v5541_v29 = vsub.f32 %v5509_v33, %v5523_v1 }
 0xa33   :  { %v5551_v46 = vmul.f32 1.442695, %v5541_v29 }
 0xa34   :  { %v5526_v17 = vpop.xlane.xlu1 %5525 }
 0xa35   :  { %8691 = vpow2.f32 %v5551_v46  ;;  %v5542_v42 = vsub.f32 %v5510_v22, %v5526_v17 }
 0xa37   :  { %v5553_v61 = vmul.f32 1.442695, %v5542_v42  ;;  %v8688_v24 = vpop.eup %8687 }
 0xa38   :  { %v5529_v27 = vpop.xlane.xlu1 %5528  ;;  %v5563_v44 = vsel %vm1770_vm4, %v8688_v24, 0.0 }
 0xa39   :  { %8693 = vpow2.f32 %v5553_v61  ;;  %v5543_v4 = vsub.f32 %v5511_v5, %v5529_v27  ;;  %5564 = vadd.xlane.f32.xlu1 %v5563_v44 }
 0xa3b   :  { %v8690_v52 = vpop.eup %8689  ;;  %v5555_v7 = vmul.f32 1.442695, %v5543_v4 }
 0xa3c   :  { %v5532_v58 = vpop.xlane.xlu1 %5531  ;;  %v5566_v14 = vsel %vm1770_vm4, %v8690_v52, 0.0 }
 0xa3d   :  { %8695 = vpow2.f32 %v5555_v7  ;;  %v5544_v45 = vsub.f32 %v5512_v13, %v5532_v58  ;;  %5567 = vadd.xlane.f32.xlu1 %v5566_v14 }
 0xa3f   :  { %v8692_v43 = vpop.eup %8691  ;;  %v5557_v0 = vmul.f32 1.442695, %v5544_v45 }
 0xa40   :  { %v5535_v33 = vpop.xlane.xlu1 %5534  ;;  %v5569_v41 = vsel %vm1770_vm4, %v8692_v43, 0.0 }
 0xa41   :  { %8697 = vpow2.f32 %v5557_v0  ;;  %v5545_v53 = vsub.f32 %v5513_v26, %v5535_v33  ;;  %5570 = vadd.xlane.f32.xlu1 %v5569_v41 }
 0xa43   :  { %v8694_v20 = vpop.eup %8693  ;;  %v5559_v15 = vmul.f32 1.442695, %v5545_v53 }
 0xa44   :  { %v5572_v22 = vsel %vm1770_vm4, %v8694_v20, 0.0 }
 0xa45   :  { %8699 = vpow2.f32 %v5559_v15  ;;  %5573 = vadd.xlane.f32.xlu1 %v5572_v22 }
 0xa46   :  { %8701 = vpow2.f32 %v5561_v11 }
 0xa47   :  { %v8696_v48 = vpop.eup %8695 }
 0xa48   :  { %v5575_v38 = vsel %vm1770_vm4, %v8696_v48, 0.0 }
 0xa49   :  { %5576 = vadd.xlane.f32.xlu1 %v5575_v38 }
 0xa4b   :  { %v10243_v9 = vpop.eup %8697 }
 0xa4c   :  { %v5578_v32 = vsel %vm1770_vm4, %v10243_v9, 0.0 }
 0xa4d   :  { %5579 = vadd.xlane.f32.xlu1 %v5578_v32 }
 0xa4f   :  { %v10247_v39 = vpop.eup %8699 }
 0xa50   :  { %v5581_v5 = vsel %vm1770_vm4, %v10247_v39, 0.0  ;;  %v10251_v59 = vpop.eup %8701 }
 0xa51   :  { %5582 = vadd.xlane.f32.xlu1 %v5581_v5  ;;  %v5584_v23 = vsel %vm1770_vm4, %v10251_v59, 0.0 }
 0xa55   :  { %5585 = vadd.xlane.f32.xlu1 %v5584_v23 }
 0xac6   :  { %v5565_v51 = vpop.xlane.xlu1 %5564 }
 0xac7   :  { %8703 = vrcp.f32 %v5565_v51 }
 0xaca   :  { %v5568_v56 = vpop.xlane.xlu1 %5567 }
 0xacb   :  { %8705 = vrcp.f32 %v5568_v56 }
 0xace   :  { %v5571_v13 = vpop.xlane.xlu1 %5570 }
 0xacf   :  { %8707 = vrcp.f32 %v5571_v13 }
 0xad1   :  { %v8704_v34 = vpop.eup %8703 }
 0xad2   :  { %v5588_v25 = vmul.f32 %v8704_v34, %v8688_v24  ;;  %v5574_v60 = vpop.xlane.xlu1 %5573 }
 0xad3   :  { %8709 = vrcp.f32 %v5574_v60 }
 0xad4   :  { %v5604_v26 = vsel %vm1770_vm4, %v5588_v25, 0 }
 0xad5   :  { %v8706_v35 = vpop.eup %8705  ;;  %v10256_v10 = vand.u32 4294901760, %v5604_v26 }
 0xad6   :  { %v5590_v54 = vmul.f32 %v8706_v35, %v8690_v52  ;;  %v5577_v47 = vpop.xlane.xlu1 %5576 }
 0xad7   :  { %8711 = vrcp.f32 %v5577_v47  ;;  %v10259_v31 = vsub.f32 %v5604_v26, %v10256_v10 }
 0xad8   :  { %v5607_v50 = vsel %vm1770_vm4, %v5590_v54, 0 }
 0xad9   :  { %v8708_v30 = vpop.eup %8707  ;;  %v10262_v1 = vand.u32 4294901760, %v5607_v50  ;;  %v5702_v29 = vand.u32 4294901760, %v10259_v31 }
 0xada   :  { %v5592_v46 = vmul.f32 %v8708_v30, %v8692_v43  ;;  %v5580_v17 = vpop.xlane.xlu1 %5579 }
 0xadb   :  { %v10266_v42 = vsub.f32 %v5607_v50, %v10262_v1  ;;  %8713 = vrcp.f32 %v5580_v17  ;;  %v5703_v61 = vsub.f32 %v10259_v31, %v5702_v29 }
 0xadc   :  { %v5610_v24 = vsel %vm1770_vm4, %v5592_v46, 0 }
 0xadd   :  { %v8710_v27 = vpop.eup %8709  ;;  %v5704_v4 = vand.u32 4294901760, %v5703_v61  ;;  %v5712_v44 = vand.u32 4294901760, %v10266_v42  ;;  %v10273_v52 = vand.u32 4294901760, %v5610_v24 }
 0xade   :  { %v5594_v7 = vmul.f32 %v8710_v27, %v8694_v20  ;;  %v5583_v58 = vpop.xlane.xlu1 %5582 }
 0xadf   :  { %8715 = vrcp.f32 %v5583_v58  ;;  %7819 = vmatprep.mubr.f32.mxu0 %v5704_v4  ;;  %v5713_v14 = vsub.f32 %v10266_v42, %v5712_v44  ;;  %v10279_v49 = vsub.f32 %v5610_v24, %v10273_v52 }
 0xae0   :  { %v5613_v45 = vsel %vm1770_vm4, %v5594_v7, 0 }
 0xae1   :  { %v8712_v43 = vpop.eup %8711  ;;  %v5714_v0 = vand.u32 4294901760, %v5713_v14  ;;  %v5722_v37 = vand.u32 4294901760, %v10279_v49  ;;  %v10283_v33 = vand.u32 4294901760, %v5613_v45 }
 0xae2   :  { %v5596_v41 = vmul.f32 %v8712_v43, %v8696_v48  ;;  %v5586_v53 = vpop.xlane.xlu1 %5585 }
 0xae3   :  { %8717 = vrcp.f32 %v5586_v53  ;;  %7820 = vmatmul.mubr.f32.vlgmr.msra.gmra.mrb[24].mxu0 %v5714_v0  ;;  %v5723_v20 = vsub.f32 %v10279_v49, %v5722_v37  ;;  %v10289_v15 = vsub.f32 %v5613_v45, %v10283_v33 }
 0xae4   :  { %8254 = vmatpush3.bf16.msra.mxu0 %v10103_v36  ;;  %v5616_v11 = vsel %vm1770_vm4, %v5596_v41, 0 }
 0xae5   :  { %v8714_v22 = vpop.eup %8713  ;;  %8256 = vmatprep.subr.bf16.mxu0 %v10123_v28  ;;  %v5724_v38 = vand.u32 4294901760, %v5723_v20  ;;  %v5732_v48 = vand.u32 4294901760, %v10289_v15  ;;  %v10295_v32 = vand.u32 4294901760, %v5616_v11 }
 0xae6   :  { %v5598_v5 = vmul.f32 %v8714_v22, %v10243_v9 }
 0xae7   :  { %7822 = vmatprep.mubr.f32.mxu0 %v5724_v38  ;;  %v5733_v23 = vsub.f32 %v10289_v15, %v5732_v48  ;;  %v10302_v51 = vsub.f32 %v5616_v11, %v10295_v32 }
 0xae8   :  { %8258 = vmatpush3.bf16.msra.mxu0 %v10123_v28  ;;  %v5619_v36 = vsel %vm1770_vm4, %v5598_v5, 0 }
 0xae9   :  { %v8716_v56 = vpop.eup %8715  ;;  %8260 = vmatprep.subr.bf16.mxu0 %v10139_v16  ;;  %v5734_v13 = vand.u32 4294901760, %v5733_v23  ;;  %v5742_v34 = vand.u32 4294901760, %v10302_v51  ;;  %v10308_v25 = vand.u32 4294901760, %v5619_v36 }
 0xaea   :  { %v5600_v9 = vmul.f32 %v8716_v56, %v10247_v39 }
 0xaeb   :  { %7823 = vmatmul.mubr.f32.gmra.mrb[26].mxu0 %v5734_v13  ;;  %v5743_v60 = vsub.f32 %v10302_v51, %v5742_v34  ;;  %v10315_v26 = vsub.f32 %v5619_v36, %v10308_v25 }
 0xaec   :  { %8262 = vmatpush3.bf16.msra.mxu0 %v10139_v16  ;;  %v5622_v28 = vsel %vm1770_vm4, %v5600_v9, 0 }
 0xaed   :  { %v8718_v35 = vpop.eup %8717  ;;  %8264 = vmatprep.subr.bf16.mxu0 %v10159_v18  ;;  %v5744_v54 = vand.u32 4294901760, %v5743_v60  ;;  %v5752_v47 = vand.u32 4294901760, %v10315_v26  ;;  %v10321_v50 = vand.u32 4294901760, %v5622_v28 }
 0xaee   :  { %v5602_v39 = vmul.f32 %v8718_v35, %v10251_v59 }
 0xaef   :  { %7825 = vmatprep.mubr.f32.mxu0 %v5744_v54  ;;  %v5753_v30 = vsub.f32 %v10315_v26, %v5752_v47  ;;  %v5761_v46 = vsub.f32 %v5622_v28, %v10321_v50 }
 0xaf0   :  { %8266 = vmatpush3.bf16.msra.mxu0 %v10159_v18  ;;  %v5625_v16 = vsel %vm1770_vm4, %v5602_v39, 0 }
 0xaf1   :  { %8268 = vmatprep.subr.bf16.mxu0 %v10127_v6  ;;  %v5754_v17 = vand.u32 4294901760, %v5753_v30  ;;  %v5762_v61 = vand.u32 4294901760, %v5761_v46  ;;  %v10329_v24 = vand.u32 4294901760, %v5625_v16 }
 0xaf3   :  { %7826 = vmatmul.mubr.f32.gmra.mrb[28].mxu0 %v5754_v17  ;;  %v5763_v27 = vsub.f32 %v5761_v46, %v5762_v61  ;;  %v5771_v4 = vsub.f32 %v5625_v16, %v10329_v24 }
 0xaf5   :  { %v5764_v59 = vand.u32 4294901760, %v5763_v27  ;;  %v5772_v7 = vand.u32 4294901760, %v5771_v4 }
 0xaf7   :  { %7828 = vmatprep.mubr.f32.mxu0 %v5764_v59  ;;  %v5773_v58 = vsub.f32 %v5771_v4, %v5772_v7 }
 0xaf9   :  { %v5774_v14 = vand.u32 4294901760, %v5773_v58 }
 0xafb   :  { %7829 = vmatmul.mubr.f32.gmra.mrb[30].mxu0 %v5774_v14 }
 0xafc   :  { %7847 = vmatprep.mubr.f32.mxu0 %v10256_v10 }
 0xaff   :  { %7848 = vmatmul.mubr.f32.vlgmr.msra.gmra.mrb[24].mxu0 %v10262_v1 }
 0xb00   :  { %8270 = vmatpush3.bf16.msra.mxu0 %v10127_v6  ;;  %7850 = vmatprep.mubr.f32.mxu0 %v10273_v52 }
 0xb01   :  { %8272 = vmatprep.subr.bf16.mxu0 %v10131_v2 }
 0xb03   :  { %7851 = vmatmul.mubr.f32.gmra.mrb[26].mxu0 %v10283_v33 }
 0xb04   :  { %8274 = vmatpush3.bf16.msra.mxu0 %v10131_v2  ;;  %7853 = vmatprep.mubr.f32.mxu0 %v10295_v32 }
 0xb05   :  { %8276 = vmatprep.subr.bf16.mxu0 %v10135_v8 }
 0xb07   :  { %7854 = vmatmul.mubr.f32.gmra.mrb[28].mxu0 %v10308_v25 }
 0xb08   :  { %8278 = vmatpush3.bf16.msra.mxu0 %v10135_v8  ;;  %7856 = vmatprep.mubr.f32.mxu0 %v10321_v50 }
 0xb09   :  { %8280 = vmatprep.subr.bf16.mxu0 %v10137_v57 }
 0xb0b   :  { %7857 = vmatmul.mubr.f32.gmra.mrb[30].mxu0 %v10329_v24 }
 0xb0c   :  { %8282 = vmatpush3.bf16.msra.mxu0 %v10137_v57  ;;  %7875 = vmatprep.mubr.f32.mxu0 %v10259_v31 }
 0xb0d   :  { %8284 = vmatprep.subr.bf16.mxu0 %v9996_v19 }
 0xb0f   :  { %7876 = vmatmul.mubr.f32.vlgmr.msra.gmra.mrb[24].mxu0 %v10266_v42 }
 0xb10   :  { %8286 = vmatpush3.bf16.msra.mxu0 %v9996_v19  ;;  %7878 = vmatprep.mubr.f32.mxu0 %v10279_v49 }
 0xb11   :  { %8288 = vmatprep.subr.bf16.mxu0 %v10031_v40 }
 0xb13   :  { %7879 = vmatmul.mubr.f32.gmra.mrb[26].mxu0 %v10289_v15 }
 0xb14   :  { %8290 = vmatpush3.bf16.msra.mxu0 %v10031_v40  ;;  %7881 = vmatprep.mubr.f32.mxu0 %v10302_v51 }
 0xb15   :  { %8292 = vmatprep.subr.bf16.mxu0 %v10058_v21 }
 0xb17   :  { %7882 = vmatmul.mubr.f32.gmra.mrb[28].mxu0 %v10315_v26 }
 0xb18   :  { %8294 = vmatpush3.bf16.msra.mxu0 %v10058_v21  ;;  %7884 = vmatprep.mubr.f32.mxu0 %v5761_v46 }
 0xb19   :  { %8296 = vmatprep.subr.bf16.mxu0 %v10086_v12 }
 0xb1b   :  { %7885 = vmatmul.mubr.f32.gmra.mrb[30].mxu0 %v5771_v4 }
 0xb1c   :  { %8298 = vmatpush3.bf16.msra.mxu0 %v10086_v12  ;;  %7903 = vmatprep.mubr.f32.mxu0 %v5702_v29 }
 0xb1d   :  { %8300 = vmatprep.subr.bf16.mxu0 %v10145_v55 }
 0xb1f   :  { %7904 = vmatmul.mubr.f32.vlgmr.msra.gmra.mrb[24].mxu0 %v5712_v44 }
 0xb20   :  { %8302 = vmatpush3.bf16.msra.mxu0 %v10145_v55  ;;  %7906 = vmatprep.mubr.f32.mxu0 %v5722_v37 }
 0xb21   :  { %8304 = vmatprep.subr.bf16.mxu0 %v10151_v62 }
 0xb23   :  { %7907 = vmatmul.mubr.f32.gmra.mrb[26].mxu0 %v5732_v48 }
 0xb24   :  { %8306 = vmatpush3.bf16.msra.mxu0 %v10151_v62  ;;  %7909 = vmatprep.mubr.f32.mxu0 %v5742_v34 }
 0xb25   :  { %8308 = vmatprep.subr.bf16.mxu0 %v10155_v3 }
 0xb27   :  { %7910 = vmatmul.mubr.f32.gmra.mrb[28].mxu0 %v5752_v47 }
 0xb28   :  { %8310 = vmatpush3.bf16.msra.mxu0 %v10155_v3  ;;  %7912 = vmatprep.mubr.f32.mxu0 %v5762_v61 }
 0xb29   :  { %8312 = vmatprep.subr.bf16.mxu0 %v10157_v63 }
 0xb2b   :  { %7913 = vmatmul.mubr.f32.gmra.mrb[30].mxu0 %v5772_v7 }
 0xb2c   :  { %8314 = vmatpush3.bf16.msra.mxu0 %v10157_v63  ;;  %7931 = vmatprep.mubr.f32.mxu0 %v10256_v10 }
 0xb2d   :  { %8316 = vmatprep.subr.bf16.mxu0 %v9996_v19 }
 0xb2f   :  { %7932 = vmatmul.mubr.f32.vlgmr.msra.gmra.mrb[24].mxu0 %v10262_v1 }
 0xb30   :  { %8318 = vmatpush3.bf16.msra.mxu0 %v9996_v19  ;;  %7934 = vmatprep.mubr.f32.mxu0 %v10273_v52 }
 0xb31   :  { %8320 = vmatprep.subr.bf16.mxu0 %v10031_v40 }
 0xb33   :  { %7935 = vmatmul.mubr.f32.gmra.mrb[26].mxu0 %v10283_v33 }
 0xb34   :  { %8322 = vmatpush3.bf16.msra.mxu0 %v10031_v40  ;;  %7937 = vmatprep.mubr.f32.mxu0 %v10295_v32 }
 0xb35   :  { %8324 = vmatprep.subr.bf16.mxu0 %v10058_v21 }
 0xb37   :  { %7938 = vmatmul.mubr.f32.gmra.mrb[28].mxu0 %v10308_v25 }
 0xb38   :  { %8326 = vmatpush3.bf16.msra.mxu0 %v10058_v21  ;;  %7940 = vmatprep.mubr.f32.mxu0 %v10321_v50 }
 0xb39   :  { %8328 = vmatprep.subr.bf16.mxu0 %v10086_v12 }
 0xb3b   :  { %7941 = vmatmul.mubr.f32.gmra.mrb[30].mxu0 %v10329_v24 }
 0xb3c   :  { %8330 = vmatpush3.bf16.msra.mxu0 %v10086_v12  ;;  %7959 = vmatprep.mubr.f32.mxu0 %v10256_v10 }
 0xb3f   :  { %7960 = vmatmul.mubr.f32.vlgmr.msra.gmra.mrb[24].mxu0 %v10262_v1 }
 0xb40   :  { %7962 = vmatprep.mubr.f32.mxu0 %v10273_v52 }
 0xb43   :  { %7963 = vmatmul.mubr.f32.gmra.mrb[26].mxu0 %v10283_v33 }
 0xb44   :  { %7965 = vmatprep.mubr.f32.mxu0 %v10295_v32 }
 0xb47   :  { %7966 = vmatmul.mubr.f32.gmra.mrb[28].mxu0 %v10308_v25 }
 0xb48   :  { %7968 = vmatprep.mubr.f32.mxu0 %v10321_v50 }
 0xb4b   :  { %7969 = vmatmul.mubr.f32.gmra.mrb[30].mxu0 %v10329_v24 }
 0xc12   :  { %v7961_v19 = vpop.f32.mrb[24].mxu0 }
 0xc13   :  { %v6466_v40 = vmax.f32 %v7961_v19, 0.0  ;;  %v6419_v21 = vpop.f32.mrb[25].mxu0 }
 0xc14   :  { %v6465_v12 = vmax.f32 %v6419_v21, 0.0 }
 0xc15   :  { %v6476_v2 = vsel %vm4607_vm12, %v6466_v40, -inf }
 0xc16   :  { %6477 = vmax.xlane.f32.xlu1 %v6476_v2  ;;  %v7964_v6 = vpop.f32.mrb[26].mxu0  ;;  %v6473_v62 = vsel %vm4607_vm12, %v6465_v12, -inf }
 0xc17   :  { %v6468_v8 = vmax.f32 %v7964_v6, 0.0  ;;  %v6431_v57 = vpop.f32.mrb[27].mxu0 }
 0xc18   :  { %v6467_v55 = vmax.f32 %v6431_v57, 0.0 }
 0xc19   :  { %v6482_v3 = vsel %vm4607_vm12, %v6468_v8, -inf }
 0xc1a   :  { %6474 = vmax.xlane.f32.xlu1 %v6473_v62  ;;  %6483 = vmax.xlane.f32.xlu0 %v6482_v3  ;;  %v7967_v63 = vpop.f32.mrb[28].mxu0  ;;  %v6479_v1 = vsel %vm4607_vm12, %v6467_v55, -inf }
 0xc1b   :  { %v6470_v18 = vmax.f32 %v7967_v63, 0.0  ;;  %v6443_v10 = vpop.f32.mrb[29].mxu0 }
 0xc1c   :  { %v6469_v31 = vmax.f32 %v6443_v10, 0.0 }
 0xc1d   :  { %v6488_v29 = vsel %vm4607_vm12, %v6470_v18, -inf }
 0xc1e   :  { %6480 = vmax.xlane.f32.xlu1 %v6479_v1  ;;  %6489 = vmax.xlane.f32.xlu0 %v6488_v29  ;;  %v7970_v42 = vpop.f32.mrb[30].mxu0  ;;  %v6485_v45 = vsel %vm4607_vm12, %v6469_v31, -inf }
 0xc1f   :  { %v6472_v44 = vmax.f32 %v7970_v42, 0.0  ;;  %v6455_v52 = vpop.f32.mrb[31].mxu0 }
 0xc20   :  { %v6471_v49 = vmax.f32 %v6455_v52, 0.0 }
 0xc21   :  { %v6494_v43 = vsel %vm4607_vm12, %v6472_v44, -inf }
 0xc22   :  { %6486 = vmax.xlane.f32.xlu1 %v6485_v45  ;;  %6495 = vmax.xlane.f32.xlu0 %v6494_v43  ;;  %v6491_v0 = vsel %vm4607_vm12, %v6471_v49, -inf }
 0xc26   :  { %6492 = vmax.xlane.f32.xlu1 %v6491_v0 }
 0xca3   :  { %v6478_v37 = vpop.xlane.xlu1 %6477 }
 0xca4   :  { %v6498_v33 = vsub.f32 %v6466_v40, %v6478_v37 }
 0xca6   :  { %v6507_v41 = vmul.f32 1.442695, %v6498_v33 }
 0xca7   :  { %v6475_v53 = vpop.xlane.xlu1 %6474  ;;  %v6484_v20 = vpop.xlane.xlu0 %6483 }
 0xca8   :  { %8719 = vpow2.f32 %v6507_v41  ;;  %v6497_v15 = vsub.f32 %v6465_v12, %v6475_v53  ;;  %v6500_v11 = vsub.f32 %v6468_v8, %v6484_v20 }
 0xcaa   :  { %v6505_v22 = vmul.f32 1.442695, %v6497_v15  ;;  %v6511_v38 = vmul.f32 1.442695, %v6500_v11 }
 0xcab   :  { %v6481_v48 = vpop.xlane.xlu1 %6480  ;;  %v6490_v32 = vpop.xlane.xlu0 %6489 }
 0xcac   :  { %8721 = vpow2.f32 %v6505_v22  ;;  %v6499_v5 = vsub.f32 %v6467_v55, %v6481_v48  ;;  %v6502_v23 = vsub.f32 %v6470_v18, %v6490_v32 }
 0xcad   :  { %8723 = vpow2.f32 %v6511_v38 }
 0xcae   :  { %v6509_v51 = vmul.f32 1.442695, %v6499_v5  ;;  %v6515_v36 = vmul.f32 1.442695, %v6502_v23 }
 0xcaf   :  { %v6487_v56 = vpop.xlane.xlu1 %6486  ;;  %v6496_v13 = vpop.xlane.xlu0 %6495 }
 0xcb0   :  { %8725 = vpow2.f32 %v6509_v51  ;;  %v6501_v34 = vsub.f32 %v6469_v31, %v6487_v56  ;;  %v6504_v25 = vsub.f32 %v6472_v44, %v6496_v13 }
 0xcb1   :  { %8727 = vpow2.f32 %v6515_v36 }
 0xcb2   :  { %v8720_v9 = vpop.eup %8719  ;;  %v6513_v60 = vmul.f32 1.442695, %v6501_v34  ;;  %v6519_v26 = vmul.f32 1.442695, %v6504_v25 }
 0xcb3   :  { %v6493_v28 = vpop.xlane.xlu1 %6492  ;;  %v6524_v35 = vsel %vm4607_vm12, %v8720_v9, 0.0 }
 0xcb4   :  { %8729 = vpow2.f32 %v6513_v60  ;;  %v6503_v54 = vsub.f32 %v6471_v49, %v6493_v28  ;;  %6525 = vadd.xlane.f32.xlu0 %v6524_v35 }
 0xcb5   :  { %8731 = vpow2.f32 %v6519_v26 }
 0xcb6   :  { %v8722_v47 = vpop.eup %8721  ;;  %v6517_v50 = vmul.f32 1.442695, %v6503_v54 }
 0xcb7   :  { %v8724_v39 = vpop.eup %8723  ;;  %v6521_v30 = vsel %vm4607_vm12, %v8722_v47, 0.0 }
 0xcb8   :  { %8733 = vpow2.f32 %v6517_v50  ;;  %v6530_v46 = vsel %vm4607_vm12, %v8724_v39, 0.0  ;;  %6522 = vadd.xlane.f32.xlu1 %v6521_v30 }
 0xcb9   :  { %6531 = vadd.xlane.f32.xlu0 %v6530_v46 }
 0xcba   :  { %v8726_v16 = vpop.eup %8725 }
 0xcbb   :  { %v8728_v17 = vpop.eup %8727  ;;  %v6527_v61 = vsel %vm4607_vm12, %v8726_v16, 0.0 }
 0xcbc   :  { %v6536_v24 = vsel %vm4607_vm12, %v8728_v17, 0.0  ;;  %6528 = vadd.xlane.f32.xlu1 %v6527_v61 }
 0xcbd   :  { %6537 = vadd.xlane.f32.xlu0 %v6536_v24 }
 0xcbe   :  { %v8730_v27 = vpop.eup %8729 }
 0xcbf   :  { %v8732_v4 = vpop.eup %8731  ;;  %v6533_v59 = vsel %vm4607_vm12, %v8730_v27, 0.0 }
 0xcc0   :  { %v6542_v7 = vsel %vm4607_vm12, %v8732_v4, 0.0  ;;  %6534 = vadd.xlane.f32.xlu1 %v6533_v59 }
 0xcc1   :  { %6543 = vadd.xlane.f32.xlu0 %v6542_v7 }
 0xcc2   :  { %v8734_v58 = vpop.eup %8733 }
 0xcc3   :  { %v6539_v14 = vsel %vm4607_vm12, %v8734_v58, 0.0 }
 0xcc4   :  { %6540 = vadd.xlane.f32.xlu1 %v6539_v14 }
 0xd41   :  { %v6526_v19 = vpop.xlane.xlu0 %6525 }
 0xd42   :  { %8735 = vrcp.f32 %v6526_v19 }
 0xd45   :  { %v6523_v40 = vpop.xlane.xlu1 %6522 }
 0xd46   :  { %v6532_v21 = vpop.xlane.xlu0 %6531  ;;  %8737 = vrcp.f32 %v6523_v40 }
 0xd47   :  { %8739 = vrcp.f32 %v6532_v21 }
 0xd49   :  { %v6529_v12 = vpop.xlane.xlu1 %6528 }
 0xd4a   :  { %v6538_v2 = vpop.xlane.xlu0 %6537  ;;  %8741 = vrcp.f32 %v6529_v12 }
 0xd4b   :  { %8743 = vrcp.f32 %v6538_v2 }
 0xd4c   :  { %v8736_v6 = vpop.eup %8735 }
 0xd4d   :  { %v6548_v8 = vmul.f32 %v8736_v6, %v8720_v9  ;;  %v6535_v57 = vpop.xlane.xlu1 %6534 }
 0xd4e   :  { %v6544_v55 = vpop.xlane.xlu0 %6543  ;;  %8745 = vrcp.f32 %v6535_v57 }
 0xd4f   :  { %6562 = vst.msk [vmem:[%s10457_s6 + $0x8] sm:$0xff] %vm4607_vm12, %v6548_v8  ;;  %8747 = vrcp.f32 %v6544_v55 }
 0xd50   :  { %v8738_v62 = vpop.eup %8737 }
 0xd51   :  { %v8740_v3 = vpop.eup %8739  ;;  %v6546_v63 = vmul.f32 %v8738_v62, %v8722_v47  ;;  %v6541_v18 = vpop.xlane.xlu1 %6540 }
 0xd52   :  { %v6552_v10 = vmul.f32 %v8740_v3, %v8724_v39  ;;  %8749 = vrcp.f32 %v6541_v18 }
 0xd53   :  { %6561 = vst.msk [vmem:[%s10457_s6] sm:$0xff] %vm4607_vm12, %v6546_v63 }
 0xd54   :  { %v8742_v31 = vpop.eup %8741  ;;  %6564 = vst.msk [vmem:[%s10457_s6 + $0x18] sm:$0xff] %vm4607_vm12, %v6552_v10 }
 0xd55   :  { %v8744_v1 = vpop.eup %8743  ;;  %v6550_v29 = vmul.f32 %v8742_v31, %v8726_v16 }
 0xd56   :  { %v6556_v42 = vmul.f32 %v8744_v1, %v8728_v17 }
 0xd57   :  { %6563 = vst.msk [vmem:[%s10457_s6 + $0x10] sm:$0xff] %vm4607_vm12, %v6550_v29 }
 0xd58   :  { %v8746_v44 = vpop.eup %8745  ;;  %6566 = vst.msk [vmem:[%s10457_s6 + $0x28] sm:$0xff] %vm4607_vm12, %v6556_v42 }
 0xd59   :  { %v8748_v52 = vpop.eup %8747  ;;  %v6554_v49 = vmul.f32 %v8746_v44, %v8730_v27 }
 0xd5a   :  { %v6560_v45 = vmul.f32 %v8748_v52, %v8732_v4 }
 0xd5b   :  { %6565 = vst.msk [vmem:[%s10457_s6 + $0x20] sm:$0xff] %vm4607_vm12, %v6554_v49 }
 0xd5c   :  { %v8750_v43 = vpop.eup %8749  ;;  %6568 = vst.msk [vmem:[%s10457_s6 + $0x38] sm:$0xff] %vm4607_vm12, %v6560_v45 }
 0xd5d   :  { %v6558_v0 = vmul.f32 %v8750_v43, %v8734_v58 }
 0xd5f   :  { %6567 = vst.msk [vmem:[%s10457_s6 + $0x30] sm:$0xff] %vm4607_vm12, %v6558_v0 }

</bundles_post_ra>
